<compile_context>
chip_gen: v7x
topology: tpu7x:2x2x1
jax: 0.10.0
libtpu: 0.0.40
codegen_flags: <defaults>
</compile_context>

<pallas_src>
import numpy as np

import jax
import jax.numpy as jnp
from jax import lax
from jax.experimental import pallas as pl
from jax.experimental.pallas import tpu as pltpu


def _silu(h):
    # sigmoid via EUP exp + approx reciprocal (off the VALU critical path)
    return h * pl.reciprocal(1.0 + jnp.exp(-h), approx=True)


def node_model_kernel(tbl_ref, counts_ref, x_ref, dest_ref, ea_ref, *rest):
    """rest = (w0x, w0a, b0, w1, b1, ..., out_ref, acc_ref, cnt_ref).

    tbl_ref / counts_ref are the scalar-prefetch (SMEM) schedule: tbl_ref is
    consumed by the index_maps, counts_ref gates the accumulation steps.
    """
    del tbl_ref  # only used by the data-dependent index_maps
    *params, out_ref, acc_ref, cnt_ref = rest

    tile_n, d = x_ref.shape
    tile_e = ea_ref.shape[0]
    i = pl.program_id(0)
    j = pl.program_id(1)

    @pl.when(j == 0)
    def _():
        acc_ref[...] = jnp.zeros_like(acc_ref)
        cnt_ref[...] = jnp.zeros_like(cnt_ref)

    # ---- tiled scatter_mean over this node tile's OWN edge-tile range -------
    @pl.when(j < counts_ref[i])
    def _():
        # one-hot (node, edge) block; edges destined outside this node tile
        # (incl. padded edges with dest = -1) match nothing.
        local = dest_ref[...] - i * tile_n                        # (1, tile_e)
        iota = lax.broadcasted_iota(jnp.int32, (tile_n, tile_e), 0)
        onehot = (iota == local).astype(jnp.bfloat16)             # exact 0/1
        acc_ref[...] += jnp.dot(onehot, ea_ref[...],
                                preferred_element_type=jnp.float32)
        # edge counts from the same one-hot via a tiny MXU pass (no XLU reduce,
        # no wrapper-side ones-column concat / extra HBM pass over edge_attr).
        cnt_ref[...] += jnp.dot(onehot, jnp.ones((tile_e, 1), jnp.bfloat16),
                                preferred_element_type=jnp.float32)

    # ---- finalize: mean-normalize + run the MLP on this node tile -----------
    @pl.when(j == pl.num_programs(1) - 1)
    def _():
        # exact divide: runs once per node tile, off the hot edge loop
        agg = acc_ref[...] / jnp.maximum(cnt_ref[...], 1.0)

        # first Linear: cat([x, agg]) @ W0 + b0 as two matmuls (no lane concat)
        w0x, w0a, b0 = params[0], params[1], params[2]
        h = (jnp.dot(x_ref[...], w0x[...], preferred_element_type=jnp.float32)
             + jnp.dot(agg.astype(jnp.bfloat16), w0a[...],
                       preferred_element_type=jnp.float32)
             + b0[...])

        rest_params = params[3:]
        n_rest = len(rest_params) // 2
        if n_rest > 0:
            h = _silu(h)
        for l in range(n_rest):
            w = rest_params[2 * l]
            b = rest_params[2 * l + 1]
            h = jnp.dot(h.astype(jnp.bfloat16), w[...],
                        preferred_element_type=jnp.float32) + b[...]
            if l != n_rest - 1:
                h = _silu(h)

        # TODO(synk): output feature dim D=32 stays lane-padded (module-fixed);
        # a fully lane-dense (or bf16) output would need wrapper-side packing.
        out_ref[...] = h.astype(out_ref.dtype)


def prepare_params(weights, biases):
    """One-time layout/cast of MLP params (hoisted out of the per-call path).

    weights[l]: [in_l, out_l] (already transposed vs torch's (out, in)),
    biases[l]:  [out_l].  The first-layer weight is pre-split into its x / agg
    halves so the kernel never concatenates along lanes.  Weights -> bf16 (MXU
    operands), biases stay f32.
    """
    d = weights[0].shape[1]          # dim_hidden (f=None path: in0 == 2*d)
    w0 = weights[0]
    params = [w0[:d].astype(jnp.bfloat16),
              w0[d:2 * d].astype(jnp.bfloat16),
              biases[0].reshape(1, -1).astype(jnp.float32)]
    for w, b in zip(weights[1:], biases[1:]):
        params.append(w.astype(jnp.bfloat16))
        params.append(b.reshape(1, -1).astype(jnp.float32))
    return params


def compute_edge_tile_schedule(graph_node_counts, graph_edge_counts,
                               tile_n, tile_e, n_padded, e_padded):
    """Host-side (static) schedule for the block-diagonal scatter.

    Assumes graphs are packed block-diagonally (graph g's nodes and edges are
    contiguous).  Returns:
      edge_tile_table : int32[node_tiles * max_edge_tiles]  (flat, SMEM-cheap)
          table[i*max_edge_tiles + j] = edge-tile block index visited by node
          tile i at grid step j.  Overhang steps (j >= counts[i]) repeat the
          last useful tile so the pipeline elides their DMA.
      tile_counts     : int32[node_tiles]  edge tiles actually carrying edges
          destined to node tile i (kernel skips steps j >= count).
      max_edge_tiles  : static grid extent along the edge axis (>= 1).
    """
    graph_node_counts = np.asarray(graph_node_counts, np.int64)
    graph_edge_counts = np.asarray(graph_edge_counts, np.int64)
    node_off = np.concatenate([[0], np.cumsum(graph_node_counts)])
    edge_off = np.concatenate([[0], np.cumsum(graph_edge_counts)])
    node_tiles = n_padded // tile_n
    edge_tiles = max(e_padded // tile_e, 1)

    starts = np.zeros(node_tiles, np.int64)
    counts = np.zeros(node_tiles, np.int64)
    for i in range(node_tiles):
        lo_n, hi_n = i * tile_n, (i + 1) * tile_n
        gs = np.nonzero((node_off[:-1] < hi_n) & (node_off[1:] > lo_n))[0]
        if gs.size == 0:
            continue
        lo_e, hi_e = edge_off[gs[0]], edge_off[gs[-1] + 1]
        if hi_e <= lo_e:
            continue
        t_lo = lo_e // tile_e
        t_hi = min(-(-hi_e // tile_e), edge_tiles)
        starts[i], counts[i] = t_lo, max(t_hi - t_lo, 0)

    max_edge_tiles = max(int(counts.max()) if node_tiles else 0, 1)
    table = np.zeros((node_tiles, max_edge_tiles), np.int64)
    for i in range(node_tiles):
        last = max(int(counts[i]), 1) - 1
        for j in range(max_edge_tiles):
            table[i, j] = min(int(starts[i]) + min(j, last), edge_tiles - 1)
    return (jnp.asarray(table.reshape(-1), jnp.int32),
            jnp.asarray(counts, jnp.int32),
            max_edge_tiles)


def node_model_forward(x, dest, edge_attr, params, edge_tile_table, tile_counts,
                       *, max_edge_tiles, tile_n=256, tile_e=1024):
    """x: [N, D], dest: [E] int32, edge_attr: [E, D], params: prepare_params().

    edge_tile_table / tile_counts / max_edge_tiles come from
    compute_edge_tile_schedule() (block-diagonal graph packing).

    Tile sizing: multiples of 128 on v5e, 256 on v6e/v7x; tile_e of 1024-2048
    at production edge counts; keep N/tile_n >= 2 so v7x's two TensorCores are
    both fed.  VMEM use is small here; for very large tile sweeps on v7x set
    CompilerParams(vmem_limit_bytes=...) with headroom under 64 MiB physical.
    """
    n, d = x.shape
    e = edge_attr.shape[0]

    n_pad = (-n) % tile_n
    e_pad = (-e) % tile_e
    n_p, e_p = n + n_pad, e + e_pad

    x_p = jnp.pad(x.astype(jnp.bfloat16), ((0, n_pad), (0, 0)))
    ea_p = jnp.pad(edge_attr.astype(jnp.bfloat16), ((0, e_pad), (0, 0)))
    # padded edges get dest = -1 -> match no node, contribute nothing
    dest_p = jnp.pad(dest.astype(jnp.int32), (0, e_pad),
                     constant_values=-1).reshape(1, e_p)

    grid = (n_p // tile_n, max_edge_tiles)
    mt = max_edge_tiles

    in_specs = [
        pl.BlockSpec((tile_n, d), lambda i, j, *_: (i, 0)),                      # x
        pl.BlockSpec((1, tile_e),
                     lambda i, j, tbl, cnt: (0, tbl[i * mt + j])),               # dest
        pl.BlockSpec((tile_e, d),
                     lambda i, j, tbl, cnt: (tbl[i * mt + j], 0)),               # edge_attr
    ]
    for p in params:                                               # weights/biases
        in_specs.append(pl.BlockSpec(p.shape, lambda i, j, *_: (0, 0)))

    out = pl.pallas_call(
        node_model_kernel,
        out_shape=jax.ShapeDtypeStruct((n_p, d), jnp.float32),
        grid_spec=pltpu.PrefetchScalarGridSpec(
            num_scalar_prefetch=2,
            grid=grid,
            in_specs=in_specs,
            out_specs=pl.BlockSpec((tile_n, d), lambda i, j, *_: (i, 0)),
            scratch_shapes=[pltpu.VMEM((tile_n, d), jnp.float32),   # sums acc
                            pltpu.VMEM((tile_n, 1), jnp.float32)]), # counts acc
        compiler_params=pltpu.CompilerParams(
            dimension_semantics=("parallel", "arbitrary")),
    )(edge_tile_table, tile_counts, x_p, dest_p, ea_p, *params)
    return out[:n]


def node_model_reference(x, dest, edge_attr, weights, biases):
    """Pure-JAX f32 reference for verification."""
    n = x.shape[0]
    sums = jax.ops.segment_sum(edge_attr, dest, num_segments=n)
    counts = jax.ops.segment_sum(jnp.ones((edge_attr.shape[0],), jnp.float32),
                                 dest, num_segments=n)
    agg = sums / jnp.maximum(counts, 1.0)[:, None]
    h = jnp.concatenate([x, agg], axis=1)
    num_layers = len(weights)
    for l, (w, b) in enumerate(zip(weights, biases)):
        h = h @ w + b
        if l != num_layers - 1:
            h = jax.nn.silu(h)
    return h


if __name__ == "__main__":
    # Module hyperparameters (dims['f'] == 0 branch, f=None at call time)
    n_hidden = 2
    dim_hidden = 32
    D = dim_hidden

    # Small packed batch of graphs (block-diagonal scatter).  Edge counts are
    # deliberately non-uniform so node tiles get different edge-tile counts and
    # the scalar-prefetch block-skip path is exercised.
    num_graphs = 16
    graph_node_counts = np.full(num_graphs, 32, np.int64)            # N = 512
    graph_edge_counts = np.array([32] * 8 + [160] * 8, np.int64)     # E = 1536
    N = int(graph_node_counts.sum())
    E = int(graph_edge_counts.sum())

    # Demo tiles (small problem); at production E use tile_e = 1024-2048.
    tile_n, tile_e = 256, 512

    key = jax.random.PRNGKey(0)
    k_x, k_ea, k_dest, k_w = jax.random.split(key, 4)

    x = jax.random.normal(k_x, (N, D), dtype=jnp.float32)
    edge_attr = jax.random.normal(k_ea, (E, D), dtype=jnp.float32)

    # dest: each edge points at a node of its own graph (block-diagonal)
    node_off = np.concatenate([[0], np.cumsum(graph_node_counts)])
    edge_graph = np.repeat(np.arange(num_graphs), graph_edge_counts)
    u = jax.random.uniform(k_dest, (E,))
    dest = (jnp.asarray(node_off[:-1][edge_graph], jnp.int32)
            + jnp.floor(u * jnp.asarray(graph_node_counts[edge_graph],
                                        jnp.float32)).astype(jnp.int32))

    # MLP layer sizes: [2*D] + n_hidden*[D] + [D]  -> n_hidden+1 Linear layers
    layer_vec = [2 * D] + n_hidden * [D] + [D]
    weights, biases = [], []
    wkeys = jax.random.split(k_w, len(layer_vec) - 1)
    for l in range(len(layer_vec) - 1):
        fan_in, fan_out = layer_vec[l], layer_vec[l + 1]
        weights.append(0.1 * jax.random.normal(wkeys[l], (fan_in, fan_out),
                                               dtype=jnp.float32))
        biases.append(0.01 * jnp.arange(fan_out, dtype=jnp.float32))

    # One-time param layout/cast + host-side static edge-tile schedule.
    params = prepare_params(weights, biases)
    n_p = N + ((-N) % tile_n)
    e_p = E + ((-E) % tile_e)
    edge_tile_table, tile_counts, max_edge_tiles = compute_edge_tile_schedule(
        graph_node_counts, graph_edge_counts, tile_n, tile_e, n_p, e_p)

    fwd = jax.jit(node_model_forward,
                  static_argnames=("max_edge_tiles", "tile_n", "tile_e"))
    out = fwd(x, dest, edge_attr, params, edge_tile_table, tile_counts,
              max_edge_tiles=max_edge_tiles, tile_n=tile_n, tile_e=tile_e)
    out = jax.block_until_ready(out)

    ref = node_model_reference(x, dest, edge_attr, weights, biases)
    assert out.shape == (N, D)
    # bf16 MXU operands (x, edge_attr, agg, weights) -> loosened tolerance vs
    # the f32 reference; the scatter-mean normalization itself is exact.
    assert jnp.allclose(out, ref, atol=5e-2, rtol=5e-2), "mismatch vs reference"

    print("KERNEL_OK")
</pallas_src>

<mosaic_0001>
module attributes {stable_mosaic.version = 11 : i64} {
  func.func @node_model_kernel(%arg0: i32, %arg1: i32, %arg2: memref<6xi32, #tpu.memory_space<smem>>, %arg3: memref<2xi32, #tpu.memory_space<smem>>, %arg4: memref<256x32xbf16, #tpu.memory_space<vmem>>, %arg5: memref<1x512xi32, #tpu.memory_space<vmem>>, %arg6: memref<512x32xbf16, #tpu.memory_space<vmem>>, %arg7: memref<32x32xbf16, #tpu.memory_space<vmem>>, %arg8: memref<32x32xbf16, #tpu.memory_space<vmem>>, %arg9: memref<1x32xf32, #tpu.memory_space<vmem>>, %arg10: memref<32x32xbf16, #tpu.memory_space<vmem>>, %arg11: memref<1x32xf32, #tpu.memory_space<vmem>>, %arg12: memref<32x32xbf16, #tpu.memory_space<vmem>>, %arg13: memref<1x32xf32, #tpu.memory_space<vmem>>, %arg14: memref<256x32xf32, #tpu.memory_space<vmem>>, %arg15: memref<256x32xf32, #tpu.memory_space<vmem>>, %arg16: memref<256x1xf32, #tpu.memory_space<vmem>>) attributes {dimension_semantics = [#tpu.dimension_semantics<parallel>, #tpu.dimension_semantics<arbitrary>], iteration_bounds = array<i64: 2, 3>, scalar_prefetch = 2 : i64, scratch_operands = 2 : i64, tpu.core_type = #tpu.core_type<tc>, window_params = [{transform_indices = @transform_0, window_bounds = array<i64: 256, 32>}, {transform_indices = @transform_1, window_bounds = array<i64: 1, 512>}, {transform_indices = @transform_2, window_bounds = array<i64: 512, 32>}, {pipeline_mode = #tpu.pipeline_mode<synchronous>, transform_indices = @transform_3, window_bounds = array<i64: 32, 32>}, {pipeline_mode = #tpu.pipeline_mode<synchronous>, transform_indices = @transform_4, window_bounds = array<i64: 32, 32>}, {pipeline_mode = #tpu.pipeline_mode<synchronous>, transform_indices = @transform_5, window_bounds = array<i64: 1, 32>}, {pipeline_mode = #tpu.pipeline_mode<synchronous>, transform_indices = @transform_6, window_bounds = array<i64: 32, 32>}, {pipeline_mode = #tpu.pipeline_mode<synchronous>, transform_indices = @transform_7, window_bounds = array<i64: 1, 32>}, {pipeline_mode = #tpu.pipeline_mode<synchronous>, transform_indices = @transform_8, window_bounds = array<i64: 32, 32>}, {pipeline_mode = #tpu.pipeline_mode<synchronous>, transform_indices = @transform_9, window_bounds = array<i64: 1, 32>}, {transform_indices = @transform_10, window_bounds = array<i64: 256, 32>}]} {
    %c0_i32 = arith.constant 0 : i32
    %0 = arith.cmpi eq, %arg1, %c0_i32 : i32
    %1 = arith.extui %0 : i1 to i32
    %c0_i32_0 = arith.constant 0 : i32
    %2 = arith.cmpi ne, %1, %c0_i32_0 : i32
    scf.if %2 {
      %cst = arith.constant 0.000000e+00 : f32
      %11 = vector.broadcast %cst : f32 to vector<256x32xf32>
      %c0 = arith.constant 0 : index
      %c0_3 = arith.constant 0 : index
      %12 = vector.load %arg15[%c0, %c0_3] : memref<256x32xf32, #tpu.memory_space<vmem>>, vector<256x32xf32>
      tpu.vector_store %arg15[%c0, %c0_3], %11 {strides = array<i32>} : memref<256x32xf32, #tpu.memory_space<vmem>>, vector<256x32xf32>,
      %cst_4 = arith.constant 0.000000e+00 : f32
      %13 = vector.broadcast %cst_4 : f32 to vector<256x1xf32>
      %c0_5 = arith.constant 0 : index
      %c0_6 = arith.constant 0 : index
      %14 = vector.load %arg16[%c0_5, %c0_6] : memref<256x1xf32, #tpu.memory_space<vmem>>, vector<256x1xf32>
      tpu.vector_store %arg16[%c0_5, %c0_6], %13 {strides = array<i32>} : memref<256x1xf32, #tpu.memory_space<vmem>>, vector<256x1xf32>,
    } else {
    }
    %3 = arith.index_cast %arg0 : i32 to index
    %4 = memref.load %arg3[%3] : memref<2xi32, #tpu.memory_space<smem>>
    %5 = arith.cmpi slt, %arg1, %4 : i32
    %6 = arith.extui %5 : i1 to i32
    %c0_i32_1 = arith.constant 0 : i32
    %7 = arith.cmpi ne, %6, %c0_i32_1 : i32
    scf.if %7 {
      %c0 = arith.constant 0 : index
      %c0_3 = arith.constant 0 : index
      %11 = vector.load %arg5[%c0, %c0_3] : memref<1x512xi32, #tpu.memory_space<vmem>>, vector<1x512xi32>
      %c256_i32 = arith.constant 256 : i32
      %12 = arith.muli %arg0, %c256_i32 : i32
      %13 = vector.broadcast %12 : i32 to vector<1x512xi32>
      %14 = arith.subi %11, %13 : vector<1x512xi32>
      %15 = tpu.iota {dimensions = array<i32: 0>} : vector<256x512xi32>
      %16 = vector.broadcast %14 : vector<1x512xi32> to vector<256x512xi32>
      %17 = arith.cmpi eq, %15, %16 : vector<256x512xi32>
      %18 = arith.extui %17 : vector<256x512xi1> to vector<256x512xi32>
      %19 = arith.sitofp %18 : vector<256x512xi32> to vector<256x512xf32>
      %20 = arith.truncf %19 : vector<256x512xf32> to vector<256x512xbf16>
      %c0_4 = arith.constant 0 : index
      %c0_5 = arith.constant 0 : index
      %21 = vector.load %arg15[%c0_4, %c0_5] : memref<256x32xf32, #tpu.memory_space<vmem>>, vector<256x32xf32>
      %c0_6 = arith.constant 0 : index
      %c0_7 = arith.constant 0 : index
      %22 = vector.load %arg6[%c0_6, %c0_7] : memref<512x32xbf16, #tpu.memory_space<vmem>>, vector<512x32xbf16>
      %cst = arith.constant dense<0.000000e+00> : vector<256x32xf32>
      %23 = tpu.matmul %20, %22, %cst {dimension_numbers = #tpu.dot_dimension_numbers<[1], [0], [0], [1], [0, 0, 1, 1], [], []>} : vector<256x512xbf16>, vector<512x32xbf16>, vector<256x32xf32> -> vector<256x32xf32>
      %24 = arith.addf %21, %23 : vector<256x32xf32>
      %c0_8 = arith.constant 0 : index
      %c0_9 = arith.constant 0 : index
      %25 = vector.load %arg15[%c0_8, %c0_9] : memref<256x32xf32, #tpu.memory_space<vmem>>, vector<256x32xf32>
      tpu.vector_store %arg15[%c0_8, %c0_9], %24 {strides = array<i32>} : memref<256x32xf32, #tpu.memory_space<vmem>>, vector<256x32xf32>,
      %c0_10 = arith.constant 0 : index
      %c0_11 = arith.constant 0 : index
      %26 = vector.load %arg16[%c0_10, %c0_11] : memref<256x1xf32, #tpu.memory_space<vmem>>, vector<256x1xf32>
      %cst_12 = arith.constant 1.000000e+00 : bf16
      %27 = vector.broadcast %cst_12 : bf16 to vector<512x1xbf16>
      %cst_13 = arith.constant dense<0.000000e+00> : vector<256x1xf32>
      %28 = tpu.matmul %20, %27, %cst_13 {dimension_numbers = #tpu.dot_dimension_numbers<[1], [0], [0], [1], [0, 0, 1, 1], [], []>} : vector<256x512xbf16>, vector<512x1xbf16>, vector<256x1xf32> -> vector<256x1xf32>
      %29 = arith.addf %26, %28 : vector<256x1xf32>
      %c0_14 = arith.constant 0 : index
      %c0_15 = arith.constant 0 : index
      %30 = vector.load %arg16[%c0_14, %c0_15] : memref<256x1xf32, #tpu.memory_space<vmem>>, vector<256x1xf32>
      tpu.vector_store %arg16[%c0_14, %c0_15], %29 {strides = array<i32>} : memref<256x1xf32, #tpu.memory_space<vmem>>, vector<256x1xf32>,
    } else {
    }
    %c2_i32 = arith.constant 2 : i32
    %8 = arith.cmpi eq, %arg1, %c2_i32 : i32
    %9 = arith.extui %8 : i1 to i32
    %c0_i32_2 = arith.constant 0 : i32
    %10 = arith.cmpi ne, %9, %c0_i32_2 : i32
    scf.if %10 {
      %c0 = arith.constant 0 : index
      %c0_3 = arith.constant 0 : index
      %11 = vector.load %arg15[%c0, %c0_3] : memref<256x32xf32, #tpu.memory_space<vmem>>, vector<256x32xf32>
      %c0_4 = arith.constant 0 : index
      %c0_5 = arith.constant 0 : index
      %12 = vector.load %arg16[%c0_4, %c0_5] : memref<256x1xf32, #tpu.memory_space<vmem>>, vector<256x1xf32>
      %cst = arith.constant 1.000000e+00 : f32
      %13 = vector.broadcast %cst : f32 to vector<256x1xf32>
      %14 = arith.maximumf %12, %13 : vector<256x1xf32>
      %15 = vector.broadcast %14 : vector<256x1xf32> to vector<256x32xf32>
      %16 = arith.divf %11, %15 : vector<256x32xf32>
      %c0_6 = arith.constant 0 : index
      %c0_7 = arith.constant 0 : index
      %17 = vector.load %arg4[%c0_6, %c0_7] : memref<256x32xbf16, #tpu.memory_space<vmem>>, vector<256x32xbf16>
      %c0_8 = arith.constant 0 : index
      %c0_9 = arith.constant 0 : index
      %18 = vector.load %arg7[%c0_8, %c0_9] : memref<32x32xbf16, #tpu.memory_space<vmem>>, vector<32x32xbf16>
      %cst_10 = arith.constant dense<0.000000e+00> : vector<256x32xf32>
      %19 = tpu.matmul %17, %18, %cst_10 {dimension_numbers = #tpu.dot_dimension_numbers<[1], [0], [0], [1], [0, 0, 1, 1], [], []>} : vector<256x32xbf16>, vector<32x32xbf16>, vector<256x32xf32> -> vector<256x32xf32>
      %20 = arith.truncf %16 : vector<256x32xf32> to vector<256x32xbf16>
      %c0_11 = arith.constant 0 : index
      %c0_12 = arith.constant 0 : index
      %21 = vector.load %arg8[%c0_11, %c0_12] : memref<32x32xbf16, #tpu.memory_space<vmem>>, vector<32x32xbf16>
      %cst_13 = arith.constant dense<0.000000e+00> : vector<256x32xf32>
      %22 = tpu.matmul %20, %21, %cst_13 {dimension_numbers = #tpu.dot_dimension_numbers<[1], [0], [0], [1], [0, 0, 1, 1], [], []>} : vector<256x32xbf16>, vector<32x32xbf16>, vector<256x32xf32> -> vector<256x32xf32>
      %23 = arith.addf %19, %22 : vector<256x32xf32>
      %c0_14 = arith.constant 0 : index
      %c0_15 = arith.constant 0 : index
      %24 = vector.load %arg9[%c0_14, %c0_15] : memref<1x32xf32, #tpu.memory_space<vmem>>, vector<1x32xf32>
      %25 = vector.broadcast %24 : vector<1x32xf32> to vector<256x32xf32>
      %26 = arith.addf %23, %25 : vector<256x32xf32>
      %cst_16 = arith.constant 0.000000e+00 : f32
      %27 = vector.broadcast %cst_16 : f32 to vector<256x32xf32>
      %28 = arith.subf %27, %26 : vector<256x32xf32>
      %29 = math.exp %28 : vector<256x32xf32>
      %cst_17 = arith.constant 1.000000e+00 : f32
      %30 = vector.broadcast %cst_17 : f32 to vector<256x32xf32>
      %31 = arith.addf %30, %29 : vector<256x32xf32>
      %32 = tpu.reciprocal %31 {approx = true} : vector<256x32xf32> -> vector<256x32xf32>
      %33 = arith.mulf %26, %32 : vector<256x32xf32>
      %34 = arith.truncf %33 : vector<256x32xf32> to vector<256x32xbf16>
      %c0_18 = arith.constant 0 : index
      %c0_19 = arith.constant 0 : index
      %35 = vector.load %arg10[%c0_18, %c0_19] : memref<32x32xbf16, #tpu.memory_space<vmem>>, vector<32x32xbf16>
      %cst_20 = arith.constant dense<0.000000e+00> : vector<256x32xf32>
      %36 = tpu.matmul %34, %35, %cst_20 {dimension_numbers = #tpu.dot_dimension_numbers<[1], [0], [0], [1], [0, 0, 1, 1], [], []>} : vector<256x32xbf16>, vector<32x32xbf16>, vector<256x32xf32> -> vector<256x32xf32>
      %c0_21 = arith.constant 0 : index
      %c0_22 = arith.constant 0 : index
      %37 = vector.load %arg11[%c0_21, %c0_22] : memref<1x32xf32, #tpu.memory_space<vmem>>, vector<1x32xf32>
      %38 = vector.broadcast %37 : vector<1x32xf32> to vector<256x32xf32>
      %39 = arith.addf %36, %38 : vector<256x32xf32>
      %cst_23 = arith.constant 0.000000e+00 : f32
      %40 = vector.broadcast %cst_23 : f32 to vector<256x32xf32>
      %41 = arith.subf %40, %39 : vector<256x32xf32>
      %42 = math.exp %41 : vector<256x32xf32>
      %cst_24 = arith.constant 1.000000e+00 : f32
      %43 = vector.broadcast %cst_24 : f32 to vector<256x32xf32>
      %44 = arith.addf %43, %42 : vector<256x32xf32>
      %45 = tpu.reciprocal %44 {approx = true} : vector<256x32xf32> -> vector<256x32xf32>
      %46 = arith.mulf %39, %45 : vector<256x32xf32>
      %47 = arith.truncf %46 : vector<256x32xf32> to vector<256x32xbf16>
      %c0_25 = arith.constant 0 : index
      %c0_26 = arith.constant 0 : index
      %48 = vector.load %arg12[%c0_25, %c0_26] : memref<32x32xbf16, #tpu.memory_space<vmem>>, vector<32x32xbf16>
      %cst_27 = arith.constant dense<0.000000e+00> : vector<256x32xf32>
      %49 = tpu.matmul %47, %48, %cst_27 {dimension_numbers = #tpu.dot_dimension_numbers<[1], [0], [0], [1], [0, 0, 1, 1], [], []>} : vector<256x32xbf16>, vector<32x32xbf16>, vector<256x32xf32> -> vector<256x32xf32>
      %c0_28 = arith.constant 0 : index
      %c0_29 = arith.constant 0 : index
      %50 = vector.load %arg13[%c0_28, %c0_29] : memref<1x32xf32, #tpu.memory_space<vmem>>, vector<1x32xf32>
      %51 = vector.broadcast %50 : vector<1x32xf32> to vector<256x32xf32>
      %52 = arith.addf %49, %51 : vector<256x32xf32>
      %c0_30 = arith.constant 0 : index
      %c0_31 = arith.constant 0 : index
      %53 = vector.load %arg14[%c0_30, %c0_31] : memref<256x32xf32, #tpu.memory_space<vmem>>, vector<256x32xf32>
      tpu.vector_store %arg14[%c0_30, %c0_31], %52 {strides = array<i32>} : memref<256x32xf32, #tpu.memory_space<vmem>>, vector<256x32xf32>,
    } else {
    }
    return
  }
  func.func @transform_0(%arg0: i32, %arg1: i32, %arg2: memref<6xi32, #tpu.memory_space<smem>>, %arg3: memref<2xi32, #tpu.memory_space<smem>>) -> (i32, i32) {
    %c0_i32 = arith.constant 0 : i32
    %c0_i32_0 = arith.constant 0 : i32
    return %arg0, %c0_i32 : i32, i32
  }
  func.func @transform_1(%arg0: i32, %arg1: i32, %arg2: memref<6xi32, #tpu.memory_space<smem>>, %arg3: memref<2xi32, #tpu.memory_space<smem>>) -> (i32, i32) {
    %c3_i32 = arith.constant 3 : i32
    %0 = arith.muli %arg0, %c3_i32 : i32
    %1 = arith.addi %0, %arg1 : i32
    %2 = arith.index_cast %1 : i32 to index
    %3 = memref.load %arg2[%2] : memref<6xi32, #tpu.memory_space<smem>>
    %c0_i32 = arith.constant 0 : i32
    %c0_i32_0 = arith.constant 0 : i32
    return %c0_i32, %3 : i32, i32
  }
  func.func @transform_2(%arg0: i32, %arg1: i32, %arg2: memref<6xi32, #tpu.memory_space<smem>>, %arg3: memref<2xi32, #tpu.memory_space<smem>>) -> (i32, i32) {
    %c3_i32 = arith.constant 3 : i32
    %0 = arith.muli %arg0, %c3_i32 : i32
    %1 = arith.addi %0, %arg1 : i32
    %2 = arith.index_cast %1 : i32 to index
    %3 = memref.load %arg2[%2] : memref<6xi32, #tpu.memory_space<smem>>
    %c0_i32 = arith.constant 0 : i32
    %c0_i32_0 = arith.constant 0 : i32
    return %3, %c0_i32 : i32, i32
  }
  func.func @transform_3(%arg0: i32, %arg1: i32, %arg2: memref<6xi32, #tpu.memory_space<smem>>, %arg3: memref<2xi32, #tpu.memory_space<smem>>) -> (i32, i32) {
    %c0_i32 = arith.constant 0 : i32
    %c0_i32_0 = arith.constant 0 : i32
    %c0_i32_1 = arith.constant 0 : i32
    return %c0_i32, %c0_i32_0 : i32, i32
  }
  func.func @transform_4(%arg0: i32, %arg1: i32, %arg2: memref<6xi32, #tpu.memory_space<smem>>, %arg3: memref<2xi32, #tpu.memory_space<smem>>) -> (i32, i32) {
    %c0_i32 = arith.constant 0 : i32
    %c0_i32_0 = arith.constant 0 : i32
    %c0_i32_1 = arith.constant 0 : i32
    return %c0_i32, %c0_i32_0 : i32, i32
  }
  func.func @transform_5(%arg0: i32, %arg1: i32, %arg2: memref<6xi32, #tpu.memory_space<smem>>, %arg3: memref<2xi32, #tpu.memory_space<smem>>) -> (i32, i32) {
    %c0_i32 = arith.constant 0 : i32
    %c0_i32_0 = arith.constant 0 : i32
    %c0_i32_1 = arith.constant 0 : i32
    return %c0_i32, %c0_i32_0 : i32, i32
  }
  func.func @transform_6(%arg0: i32, %arg1: i32, %arg2: memref<6xi32, #tpu.memory_space<smem>>, %arg3: memref<2xi32, #tpu.memory_space<smem>>) -> (i32, i32) {
    %c0_i32 = arith.constant 0 : i32
    %c0_i32_0 = arith.constant 0 : i32
    %c0_i32_1 = arith.constant 0 : i32
    return %c0_i32, %c0_i32_0 : i32, i32
  }
  func.func @transform_7(%arg0: i32, %arg1: i32, %arg2: memref<6xi32, #tpu.memory_space<smem>>, %arg3: memref<2xi32, #tpu.memory_space<smem>>) -> (i32, i32) {
    %c0_i32 = arith.constant 0 : i32
    %c0_i32_0 = arith.constant 0 : i32
    %c0_i32_1 = arith.constant 0 : i32
    return %c0_i32, %c0_i32_0 : i32, i32
  }
  func.func @transform_8(%arg0: i32, %arg1: i32, %arg2: memref<6xi32, #tpu.memory_space<smem>>, %arg3: memref<2xi32, #tpu.memory_space<smem>>) -> (i32, i32) {
    %c0_i32 = arith.constant 0 : i32
    %c0_i32_0 = arith.constant 0 : i32
    %c0_i32_1 = arith.constant 0 : i32
    return %c0_i32, %c0_i32_0 : i32, i32
  }
  func.func @transform_9(%arg0: i32, %arg1: i32, %arg2: memref<6xi32, #tpu.memory_space<smem>>, %arg3: memref<2xi32, #tpu.memory_space<smem>>) -> (i32, i32) {
    %c0_i32 = arith.constant 0 : i32
    %c0_i32_0 = arith.constant 0 : i32
    %c0_i32_1 = arith.constant 0 : i32
    return %c0_i32, %c0_i32_0 : i32, i32
  }
  func.func @transform_10(%arg0: i32, %arg1: i32, %arg2: memref<6xi32, #tpu.memory_space<smem>>, %arg3: memref<2xi32, #tpu.memory_space<smem>>) -> (i32, i32) {
    %c0_i32 = arith.constant 0 : i32
    %c0_i32_0 = arith.constant 0 : i32
    return %arg0, %c0_i32 : i32, i32
  }
}

</mosaic_0001>

<bundles_post_ra>
// kernel: node_model_forward.1
= control target key start
LH: loop header
LB: loop body
LE: loop exit
PB: predicated region body
PF: predicated region fallthrough
CT: control target
= control target key end

     0   :  { %s7976_s0 = inlined_call_operand.vmem [shape: s32[6], index: 0, kind: input, shape index: {}]   ;;  %s7977_s2 = inlined_call_operand.vmem [shape: bf16[512,32], index: 2, kind: input, shape index: {}]   ;;  %s7978_s3 = inlined_call_operand.vmem [shape: s32[1,1536], index: 3, kind: input, shape index: {}]   ;;  %s7979_s4 = inlined_call_operand.vmem [shape: bf16[1536,32], index: 4, kind: input, shape index: {}]   ;;  %s7980_s5 = inlined_call_operand.vmem [shape: bf16[32,32], index: 5, kind: input, shape index: {}]   ;;  %s7981_s6 = inlined_call_operand.vmem [shape: bf16[32,32], index: 6, kind: input, shape index: {}]   ;;  %s7982_s7 = inlined_call_operand.vmem [shape: f32[1,32], index: 7, kind: input, shape index: {}]   ;;  %s7983_s8 = inlined_call_operand.vmem [shape: bf16[32,32], index: 8, kind: input, shape index: {}]   ;;  %s7984_s9 = inlined_call_operand.vmem [shape: f32[1,32], index: 9, kind: input, shape index: {}]   ;;  %s7985_s10 = inlined_call_operand.vmem [shape: bf16[32,32], index: 10, kind: input, shape index: {}]   ;;  %s7986_s11 = inlined_call_operand.vmem [shape: f32[1,32], index: 11, kind: input, shape index: {}]   ;;  %s7987_s12 = inlined_call_operand.vmem [shape: f32[512,32], index: 12, kind: output, shape index: {}]   ;;  %s7988_s1 = inlined_call_operand.vmem [shape: s32[2], index: 1, kind: input, shape index: {}]  }
   0x1   :  { %8058 = sst [smem:[#allocation15_spill]] %s7977_s2  ;;  %s17_s23 = sshll.u32 %s7976_s0, 4  ;;  %s18_s23 = int_to_ptr.vmem [resolvable:$true] %s17_s23 }
   0x2   :  { %s21_s26 = sshll.u32 %s7988_s1, 4  ;;  %s5730_s27 = scalar_lea.vmem %s18_s23, 16  ;;  %s22_s26 = int_to_ptr.vmem [resolvable:$true] %s21_s26 }
   0x3   :  { %p5731_p0 = scmp.ne.s32.totalorder %s18_s23, %s5730_s27  ;;  %p5735_p1 = scmp.lt.s32.totalorder %s18_s23, %s18_s23 }
   0x4   :  { %p5736_p2 = scmp.lt.s32.totalorder %s5730_s27, %s5730_s27 }
   0x6   :  { %p5737_p3 = por %p5736_p2, %p5735_p1 }
   0x8   :  { %p5738_p4 = pnand %p5737_p3, %p5731_p0 }
   0xa   :  { %5741 = shalt.err (!%p5738_p4)  }
   0xb   :  { %s5796_s28 = smov [#allocation5]   ;;  %s5742_s29 = scalar_lea.vmem %s22_s26, 16 }
   0xc   :  { %20 = dma.vmem_to_smem %s18_s23, 16, %s5796_s28, [#allocation4] }
   0xd   :  { %p5743_p5 = scmp.ne.s32.totalorder %s22_s26, %s5742_s29  ;;  %p5747_p6 = scmp.lt.s32.totalorder %s22_s26, %s22_s26 }
   0xe   :  { %p5748_p7 = scmp.lt.s32.totalorder %s5742_s29, %s5742_s29 }
  0x10   :  { %p5749_p8 = por %p5748_p7, %p5747_p6 }
  0x12   :  { %p5750_p9 = pnand %p5749_p8, %p5743_p5 }
  0x14   :  { %5753 = shalt.err (!%p5750_p9)  }
  0x15   :  { %s5797_s0 = smov [#allocation6]  }
  0x16   :  { %24 = dma.vmem_to_smem %s22_s26, 16, %s5797_s0, [#allocation4] }
  0x17   :  { %5774 = dma.done.wait [#allocation4], 32 }
  0x18   :  { %5775 = vsyncadd [#allocation4], 4294967264 }
  0x19   :  { %26 = sfence }
  0x1a   :  { %s5873_s1 = smov 0   ;;  %s5875_s30 = smov 0  }
  0x1b   :  { %s5877_s13 = smov 0   ;;  %s5879_s14 = smov 0  }
  0x1c   :  { %s5881_s15 = smov 0  }
  0x1d LB: > { %s41_s16 = sadd.s32 1, %s5786_s13  ;;  %s44_s17 = sadd.s32 1, %s5790_s14  ;;  %s5794_s15 = sphi %s5881_s15, %s32_s15   ;;  %s5790_s14 = sphi %s5879_s14, %s8375_s14   ;;  %s5786_s13 = sphi %s5877_s13, %s8374_s13   ;;  %s5782_s30 = sphi %s5875_s30, %s8373_s30   ;;  %s5778_s1 = sphi %s5873_s1, %s8372_s1  }
  0x1e   : > { %p42_p10 = scmp.ge.s32.totalorder %s41_s16, 3  ;;  %p4089_p11 = scmp.ge.s32.totalorder %s5794_s15, 1 }
  0x1f   : > { %p382_p12 = scmp.lt.s32.totalorder %s5794_s15, 7 }
  0x20   : > { %s8377_s16 = smov (%p42_p10, %s41_s16), 0  ;;  %s8379_s17 = smov (!%p42_p10, %s44_s17), %s5790_s14 }
  0x21   : > { %8059 = sst [smem:[#allocation8_spill]] %s8377_s16  ;;  %p383_p13 = pnand %p4089_p11, %p382_p12 }
  0x22   : > { %p46_p0 = scmp.ge.s32.totalorder %s8379_s17, 2  ;;  %s4090_s18 = sshll.u32 (!%p383_p13), %s5782_s30, 5 }
  0x23   : > { %386 = sbr.rel (%p383_p13) target bundleno = 1595 (0x63b), region = 60  ;;  %p436_p1 = scmp.lt.s32.totalorder (!%p383_p13), %s4090_s18, 63 }
  0x24   : > { %s8381_s17 = smov (%p46_p0, %s8379_s17), 0  ;;  %s441_s19 = smul.u32 (!%p383_p13), 3, %s5782_s30 }
  0x25   : > { %8060 = sst [smem:[#allocation9_spill]] %s8381_s17  ;;  %s8061_s2 = sld [smem:[#allocation15_spill]] (!%p383_p13) }
  0x26   : > { %s442_s20 = sadd.s32 (!%p383_p13), %s5778_s1, %s441_s19  ;;  %p4097_p4 = scmp.ne.s32.totalorder (!%p383_p13), %s5778_s1, 0 }
  0x27   : > { %s443_s21 = sld [smem:[#allocation5 + %s442_s20]] (!%p383_p13) }
  0x28   : > { %s454_s22 = sld [smem:[#allocation5 + %s442_s20]] (!%p383_p13) }
  0x2a   : > { %s8383_s18 = smov (!%p436_p1, %s4090_s18), 63  ;;  %vm476_vm0 = vcmask (!%p4097_p4), 261120   ;;  %vm509_vm1 = vcmask (!%p4097_p4), 7168   ;;  %v5798_v0 = vmov (!%p4097_p4), 0.0  }
  0x2b   : > { %s4091_s23 = sshll.u32 %s8383_s18, 2  ;;  %s4096_s24 = sshll.u32 %s8383_s18, 3  ;;  %477 = vst.msk [vmem:[#allocation2] sm:$0xff] (!%p4097_p4), %vm476_vm0, %v5798_v0  ;;  %478 = vst.msk [vmem:[#allocation2 + $0x8] sm:$0xff] (!%p4097_p4), %vm476_vm0, %v5798_v0 }
  0x2c   : > { %s5913_s27 = scalar_lea.vmem %s8061_s2, %s4091_s23  ;;  %s5918_s0 = scalar_lea.vmem %s7987_s12, %s4096_s24  ;;  %479 = vst.msk [vmem:[#allocation2 + $0x10] sm:$0xff] (!%p4097_p4), %vm476_vm0, %v5798_v0  ;;  %480 = vst.msk [vmem:[#allocation2 + $0x18] sm:$0xff] (!%p4097_p4), %vm476_vm0, %v5798_v0 }
  0x2d   : > { %s4092_s17 = sshll.u32 %s443_s21, 2  ;;  %475 = sbr.rel (%p4097_p4) target bundleno = 75 (0x4b), region = 64  ;;  %481 = vst.msk [vmem:[#allocation2 + $0x20] sm:$0xff] (!%p4097_p4), %vm476_vm0, %v5798_v0  ;;  %482 = vst.msk [vmem:[#allocation2 + $0x28] sm:$0xff] (!%p4097_p4), %vm476_vm0, %v5798_v0 }
  0x2e   : > { %s4093_s16 = sshll.u32 %s454_s22, 6  ;;  %p445_p2 = scmp.lt.s32.totalorder %s4092_s17, 11  ;;  %483 = vst.msk [vmem:[#allocation2 + $0x30] sm:$0xff] (!%p4097_p4), %vm476_vm0, %v5798_v0  ;;  %484 = vst.msk [vmem:[#allocation2 + $0x38] sm:$0xff] (!%p4097_p4), %vm476_vm0, %v5798_v0 }
  0x2f   : > { %p456_p3 = scmp.lt.s32.totalorder %s4093_s16, 191  ;;  %485 = vst.msk [vmem:[#allocation2 + $0x40] sm:$0xff] (!%p4097_p4), %vm476_vm0, %v5798_v0  ;;  %486 = vst.msk [vmem:[#allocation2 + $0x48] sm:$0xff] (!%p4097_p4), %vm476_vm0, %v5798_v0 }
  0x30   : > { %s8385_s17 = smov (!%p445_p2, %s4092_s17), 11  ;;  %487 = vst.msk [vmem:[#allocation2 + $0x50] sm:$0xff] (!%p4097_p4), %vm476_vm0, %v5798_v0  ;;  %488 = vst.msk [vmem:[#allocation2 + $0x58] sm:$0xff] (!%p4097_p4), %vm476_vm0, %v5798_v0 }
  0x31   : > { %s8387_s16 = smov (!%p456_p3, %s4093_s16), 191  ;;  %s447_s20 = scalar_lea.vmem %s7978_s3, %s8385_s17  ;;  %489 = vst.msk [vmem:[#allocation2 + $0x60] sm:$0xff] (!%p4097_p4), %vm476_vm0, %v5798_v0  ;;  %490 = vst.msk [vmem:[#allocation2 + $0x68] sm:$0xff] (!%p4097_p4), %vm476_vm0, %v5798_v0 }
  0x32   : > { %s4094_s25 = sshll.u32 %s8387_s16, 2  ;;  %491 = vst.msk [vmem:[#allocation2 + $0x70] sm:$0xff] (!%p4097_p4), %vm476_vm0, %v5798_v0  ;;  %492 = vst.msk [vmem:[#allocation2 + $0x78] sm:$0xff] (!%p4097_p4), %vm476_vm0, %v5798_v0 }
  0x33   : > { %s5929_s2 = scalar_lea.vmem %s7979_s4, %s4094_s25  ;;  %493 = vst.msk [vmem:[#allocation2 + $0x80] sm:$0xff] (!%p4097_p4), %vm476_vm0, %v5798_v0  ;;  %494 = vst.msk [vmem:[#allocation2 + $0x88] sm:$0xff] (!%p4097_p4), %vm476_vm0, %v5798_v0 }
  0x34   : > { %495 = vst.msk [vmem:[#allocation2 + $0x90] sm:$0xff] %vm476_vm0, %v5798_v0  ;;  %496 = vst.msk [vmem:[#allocation2 + $0x98] sm:$0xff] %vm476_vm0, %v5798_v0 }
  0x35   : > { %497 = vst.msk [vmem:[#allocation2 + $0xa0] sm:$0xff] %vm476_vm0, %v5798_v0  ;;  %498 = vst.msk [vmem:[#allocation2 + $0xa8] sm:$0xff] %vm476_vm0, %v5798_v0 }
  0x36   : > { %499 = vst.msk [vmem:[#allocation2 + $0xb0] sm:$0xff] %vm476_vm0, %v5798_v0  ;;  %500 = vst.msk [vmem:[#allocation2 + $0xb8] sm:$0xff] %vm476_vm0, %v5798_v0 }
  0x37   : > { %501 = vst.msk [vmem:[#allocation2 + $0xc0] sm:$0xff] %vm476_vm0, %v5798_v0  ;;  %502 = vst.msk [vmem:[#allocation2 + $0xc8] sm:$0xff] %vm476_vm0, %v5798_v0 }
  0x38   : > { %503 = vst.msk [vmem:[#allocation2 + $0xd0] sm:$0xff] %vm476_vm0, %v5798_v0  ;;  %504 = vst.msk [vmem:[#allocation2 + $0xd8] sm:$0xff] %vm476_vm0, %v5798_v0 }
  0x39   : > { %505 = vst.msk [vmem:[#allocation2 + $0xe0] sm:$0xff] %vm476_vm0, %v5798_v0  ;;  %506 = vst.msk [vmem:[#allocation2 + $0xe8] sm:$0xff] %vm476_vm0, %v5798_v0 }
  0x3a   : > { %507 = vst.msk [vmem:[#allocation2 + $0xf0] sm:$0xff] %vm476_vm0, %v5798_v0  ;;  %508 = vst.msk [vmem:[#allocation2 + $0xf8] sm:$0xff] %vm476_vm0, %v5798_v0 }
  0x3b   : > { %510 = vst.msk [vmem:[#allocation3] sm:$0xff] %vm509_vm1, %v5798_v0  ;;  %511 = vst.msk [vmem:[#allocation3 + $0x8] sm:$0xff] %vm509_vm1, %v5798_v0 }
  0x3c   : > { %512 = vst.msk [vmem:[#allocation3 + $0x10] sm:$0xff] %vm509_vm1, %v5798_v0  ;;  %513 = vst.msk [vmem:[#allocation3 + $0x18] sm:$0xff] %vm509_vm1, %v5798_v0 }
  0x3d   : > { %514 = vst.msk [vmem:[#allocation3 + $0x20] sm:$0xff] %vm509_vm1, %v5798_v0  ;;  %515 = vst.msk [vmem:[#allocation3 + $0x28] sm:$0xff] %vm509_vm1, %v5798_v0 }
  0x3e   : > { %516 = vst.msk [vmem:[#allocation3 + $0x30] sm:$0xff] %vm509_vm1, %v5798_v0  ;;  %517 = vst.msk [vmem:[#allocation3 + $0x38] sm:$0xff] %vm509_vm1, %v5798_v0 }
  0x3f   : > { %518 = vst.msk [vmem:[#allocation3 + $0x40] sm:$0xff] %vm509_vm1, %v5798_v0  ;;  %519 = vst.msk [vmem:[#allocation3 + $0x48] sm:$0xff] %vm509_vm1, %v5798_v0 }
  0x40   : > { %520 = vst.msk [vmem:[#allocation3 + $0x50] sm:$0xff] %vm509_vm1, %v5798_v0  ;;  %521 = vst.msk [vmem:[#allocation3 + $0x58] sm:$0xff] %vm509_vm1, %v5798_v0 }
  0x41   : > { %522 = vst.msk [vmem:[#allocation3 + $0x60] sm:$0xff] %vm509_vm1, %v5798_v0  ;;  %523 = vst.msk [vmem:[#allocation3 + $0x68] sm:$0xff] %vm509_vm1, %v5798_v0 }
  0x42   : > { %524 = vst.msk [vmem:[#allocation3 + $0x70] sm:$0xff] %vm509_vm1, %v5798_v0  ;;  %525 = vst.msk [vmem:[#allocation3 + $0x78] sm:$0xff] %vm509_vm1, %v5798_v0 }
  0x43   : > { %526 = vst.msk [vmem:[#allocation3 + $0x80] sm:$0xff] %vm509_vm1, %v5798_v0  ;;  %527 = vst.msk [vmem:[#allocation3 + $0x88] sm:$0xff] %vm509_vm1, %v5798_v0 }
  0x44   : > { %528 = vst.msk [vmem:[#allocation3 + $0x90] sm:$0xff] %vm509_vm1, %v5798_v0  ;;  %529 = vst.msk [vmem:[#allocation3 + $0x98] sm:$0xff] %vm509_vm1, %v5798_v0 }
  0x45   : > { %530 = vst.msk [vmem:[#allocation3 + $0xa0] sm:$0xff] %vm509_vm1, %v5798_v0  ;;  %531 = vst.msk [vmem:[#allocation3 + $0xa8] sm:$0xff] %vm509_vm1, %v5798_v0 }
  0x46   : > { %532 = vst.msk [vmem:[#allocation3 + $0xb0] sm:$0xff] %vm509_vm1, %v5798_v0  ;;  %533 = vst.msk [vmem:[#allocation3 + $0xb8] sm:$0xff] %vm509_vm1, %v5798_v0 }
  0x47   : > { %534 = vst.msk [vmem:[#allocation3 + $0xc0] sm:$0xff] %vm509_vm1, %v5798_v0  ;;  %535 = vst.msk [vmem:[#allocation3 + $0xc8] sm:$0xff] %vm509_vm1, %v5798_v0 }
  0x48   : > { %536 = vst.msk [vmem:[#allocation3 + $0xd0] sm:$0xff] %vm509_vm1, %v5798_v0  ;;  %537 = vst.msk [vmem:[#allocation3 + $0xd8] sm:$0xff] %vm509_vm1, %v5798_v0 }
  0x49   : > { %538 = vst.msk [vmem:[#allocation3 + $0xe0] sm:$0xff] %vm509_vm1, %v5798_v0  ;;  %539 = vst.msk [vmem:[#allocation3 + $0xe8] sm:$0xff] %vm509_vm1, %v5798_v0 }
  0x4a   : > { %540 = vst.msk [vmem:[#allocation3 + $0xf0] sm:$0xff] %vm509_vm1, %v5798_v0  ;;  %541 = vst.msk [vmem:[#allocation3 + $0xf8] sm:$0xff] %vm509_vm1, %v5798_v0 }
  0x4b PF: > { %s542_s16 = sld [smem:[#allocation6 + %s5782_s30]] }
  0x51   : > { %p4098_p5 = scmp.ge.s32.totalorder %s5778_s1, %s542_s16 }
  0x53   : > { %546 = sbr.rel (%p4098_p5) target bundleno = 600 (0x258), region = 68 }
  0x5a   : > { %v5352_v1 = vld [vmem:[%s5929_s2 + $0x40] sm:$0xff]   ;;  %v5356_v5 = vld [vmem:[%s5929_s2 + $0x48] sm:$0xff]   ;;  %v5360_v9 = vld [vmem:[%s5929_s2 + $0x50] sm:$0xff]   ;;  %v551_v22 = vlaneseq  ;;  %s4099_s21 = sshll.u32 %s5782_s30, 8  ;;  %v5799_v43 = vmov 1065369472  }
  0x5b   : > { %v5353_v2 = vld [vmem:[%s5929_s2 + $0xc0] sm:$0xff]   ;;  %4610 = vmatprep.subr.bf16.mxu0 %v5352_v1  ;;  %v5357_v6 = vld [vmem:[%s5929_s2 + $0xc8] sm:$0xff]   ;;  %v5361_v10 = vld [vmem:[%s5929_s2 + $0xd0] sm:$0xff]   ;;  %v549_v36 = vstv %s4099_s21  ;;  %v8062_v50 = vmov 0  ;;  %v8034_v51 = vmov 1.0|1.0  }
  0x5c   : > { %v5354_v3 = vld [vmem:[%s5929_s2] sm:$0xff]   ;;  %4722 = vmatprep.subr.bf16.mxu1 %v5353_v2  ;;  %v5358_v7 = vld [vmem:[%s5929_s2 + $0x8] sm:$0xff]   ;;  %v5362_v11 = vld [vmem:[%s5929_s2 + $0x10] sm:$0xff]   ;;  %v6087_v27 = vshrl.u32 %v551_v22, 7  ;;  %v8064_v52 = vmov 0  ;;  %v8066_v53 = vmov 0 }
  0x5d   : > { %v5355_v4 = vld [vmem:[%s5929_s2 + $0x80] sm:$0xff]   ;;  %4611 = vmatpush3.bf16.msra.mxu0 %v5354_v3  ;;  %v5359_v8 = vld [vmem:[%s5929_s2 + $0x88] sm:$0xff]   ;;  %v5363_v12 = vld [vmem:[%s5929_s2 + $0x90] sm:$0xff]   ;;  %v8068_v56 = vmov 0  ;;  %v8070_v57 = vmov 0  ;;  %v8072_v58 = vmov 0 }
  0x5e   : > { %4723 = vmatpush3.bf16.msra.mxu1 %v5355_v4  ;;  %4612 = vmatprep.subr.bf16.mxu0 %v5356_v5  ;;  %v5364_v13 = vld [vmem:[%s5929_s2 + $0x58] sm:$0xff]   ;;  %v5368_v17 = vld [vmem:[%s5929_s2 + $0x60] sm:$0xff]   ;;  %v5372_v21 = vld [vmem:[%s5929_s2 + $0x68] sm:$0xff]   ;;  %v590_v32 = vsub.s32 1, %v6087_v27  ;;  %v598_v34 = vsub.s32 3, %v6087_v27  ;;  %v586_v37 = vsub.s32 0, %v6087_v27 }
  0x5f   : > { %4724 = vmatprep.subr.bf16.mxu1 %v5357_v6  ;;  %v5365_v14 = vld [vmem:[%s5929_s2 + $0xd8] sm:$0xff]   ;;  %v5369_v18 = vld [vmem:[%s5929_s2 + $0xe0] sm:$0xff]   ;;  %v5373_v23 = vld [vmem:[%s5929_s2 + $0xe8] sm:$0xff]   ;;  %v594_v39 = vsub.s32 2, %v6087_v27  ;;  %v553_v42 = vadd.s32 8, %v6087_v27  ;;  %v554_v44 = vadd.s32 16, %v6087_v27 }
  0x60   : > { %v5366_v15 = vld [vmem:[%s5929_s2 + $0x18] sm:$0xff]   ;;  %v5370_v19 = vld [vmem:[%s5929_s2 + $0x20] sm:$0xff]   ;;  %v5374_v24 = vld [vmem:[%s5929_s2 + $0x28] sm:$0xff]   ;;  %v555_v45 = vadd.s32 24, %v6087_v27  ;;  %v556_v54 = vadd.s32 32, %v6087_v27  ;;  %v557_v55 = vadd.s32 40, %v6087_v27 }
  0x61   : > { %4613 = vmatpush3.bf16.msra.mxu0 %v5358_v7  ;;  %v5367_v16 = vld [vmem:[%s5929_s2 + $0x98] sm:$0xff]   ;;  %v5371_v20 = vld [vmem:[%s5929_s2 + $0xa0] sm:$0xff]   ;;  %v5375_v25 = vld [vmem:[%s5929_s2 + $0xa8] sm:$0xff]   ;;  %v8074_v59 = vmov 0  ;;  %v8076_v60 = vmov 0  ;;  %v8078_v61 = vmov 0 }
  0x62   : > { %4725 = vmatpush3.bf16.msra.mxu1 %v5359_v8  ;;  %4614 = vmatprep.subr.bf16.mxu0 %v5360_v9  ;;  %v5376_v26 = vld [vmem:[%s5929_s2 + $0x70] sm:$0xff]   ;;  %v5380_v31 = vld [vmem:[%s5929_s2 + $0x78] sm:$0xff]   ;;  %v547_v40 = vld [vmem:[%s447_s20] sm:$0xf]  ;;  %v8080_v62 = vmov 0  ;;  %v6211_v63 = vadd.s32 48, %v6087_v27 }
  0x63   : > { %4726 = vmatprep.subr.bf16.mxu1 %v5361_v10  ;;  %v5377_v28 = vld [vmem:[%s5929_s2 + $0xf0] sm:$0xff]   ;;  %v5381_v33 = vld [vmem:[%s5929_s2 + $0xf8] sm:$0xff]   ;;  %v550_v41 = vsub.s32 %v547_v40, %v549_v36  ;;  %v6214_v0 = vadd.s32 56, %v6087_v27  ;;  %v6217_v1 = vadd.s32 64, %v6087_v27  ;;  %v6220_v2 = vadd.s32 72, %v6087_v27 }
  0x64   : > { %v5378_v29 = vld [vmem:[%s5929_s2 + $0x30] sm:$0xff]   ;;  %v5382_v35 = vld [vmem:[%s5929_s2 + $0x38] sm:$0xff]   ;;  %v6227_v3 = vadd.s32 80, %v6087_v27  ;;  %v6230_v4 = vadd.s32 88, %v6087_v27  ;;  %v6233_v5 = vadd.s32 96, %v6087_v27  ;;  %v6236_v6 = vadd.s32 104, %v6087_v27 }
  0x65   : > { %4615 = vmatpush3.bf16.msra.mxu0 %v5362_v11  ;;  %v5379_v30 = vld [vmem:[%s5929_s2 + $0xb0] sm:$0xff]   ;;  %v5383_v38 = vld [vmem:[%s5929_s2 + $0xb8] sm:$0xff]   ;;  %v6111_v46 = vrot.slane %v550_v41, %v590_v32  ;;  %v6113_v47 = vrot.slane %v550_v41, %v598_v34  ;;  %v6115_v48 = vrot.slane %v550_v41, %v586_v37  ;;  %v6117_v49 = vrot.slane %v550_v41, %v594_v39 }
  0x66   : > { %4727 = vmatpush3.bf16.msra.mxu1 %v5363_v12  ;;  %4616 = vmatprep.subr.bf16.mxu0 %v5364_v13  ;;  %v6247_v7 = vadd.s32 144, %v6087_v27  ;;  %v6250_v8 = vadd.s32 152, %v6087_v27  ;;  %v6259_v9 = vadd.s32 160, %v6087_v27  ;;  %v6262_v10 = vadd.s32 168, %v6087_v27 }
  0x67   : > { %4728 = vmatprep.subr.bf16.mxu1 %v5365_v14  ;;  %vm601_vm2 = vcmp.eq.s32.totalorder %v6087_v27, %v6111_v46  ;;  %vm605_vm3 = vcmp.eq.s32.totalorder %v553_v42, %v6111_v46  ;;  %vm603_vm4 = vcmp.eq.s32.totalorder %v6087_v27, %v6113_v47  ;;  %vm607_vm5 = vcmp.eq.s32.totalorder %v553_v42, %v6113_v47 }
  0x68   : > { %vm6125_vm6 = vmpackc.low %vm605_vm3, %vm601_vm2  ;;  %vm600_vm7 = vcmp.eq.s32.totalorder %v6087_v27, %v6115_v48  ;;  %vm604_vm8 = vcmp.eq.s32.totalorder %v553_v42, %v6115_v48  ;;  %vm602_vm9 = vcmp.eq.s32.totalorder %v6087_v27, %v6117_v49  ;;  %vm606_vm10 = vcmp.eq.s32.totalorder %v553_v42, %v6117_v49 }
  0x69   : > { %4617 = vmatpush3.bf16.msra.mxu0 %v5366_v15  ;;  %v8063_v50 = vsel %vm6125_vm6, 4294967295, %v8062_v50  ;;  %4261 = vmatprep.mubr.msk.bf16.mxu0 %vm6125_vm6, %v8034_v51  ;;  %vm6138_vm11 = vmpackc.low %vm607_vm5, %vm603_vm4  ;;  %vm609_vm12 = vcmp.eq.s32.totalorder %v554_v44, %v6111_v46  ;;  %vm613_vm13 = vcmp.eq.s32.totalorder %v555_v45, %v6111_v46  ;;  %vm611_vm15 = vcmp.eq.s32.totalorder %v554_v44, %v6113_v47 }
  0x6a   : > { %4729 = vmatpush3.bf16.msra.mxu1 %v5367_v16  ;;  %4618 = vmatprep.subr.bf16.mxu0 %v5368_v17  ;;  %v8065_v52 = vsel %vm6138_vm11, 4294967295, %v8064_v52  ;;  %vm6147_vm14 = vmpackc.low %vm604_vm8, %vm600_vm7  ;;  %vm615_vm0 = vcmp.eq.s32.totalorder %v555_v45, %v6113_v47  ;;  %vm608_vm3 = vcmp.eq.s32.totalorder %v554_v44, %v6115_v48  ;;  %vm612_vm4 = vcmp.eq.s32.totalorder %v555_v45, %v6115_v48 }
  0x6b   : > { %4730 = vmatprep.subr.bf16.mxu1 %v5369_v18  ;;  %4325 = vmatprep.mubr.msk.bf16.mxu1 %vm6138_vm11, %v8034_v51  ;;  %v8067_v53 = vsel %vm6147_vm14, 4294967295, %v8066_v53  ;;  %vm6158_vm1 = vmpackc.low %vm606_vm10, %vm602_vm9  ;;  %vm610_vm7 = vcmp.eq.s32.totalorder %v554_v44, %v6117_v49  ;;  %vm614_vm8 = vcmp.eq.s32.totalorder %v555_v45, %v6117_v49  ;;  %vm617_vm9 = vcmp.eq.s32.totalorder %v556_v54, %v6111_v46 }
  0x6c   : > { %v8069_v56 = vsel %vm6158_vm1, 4294967295, %v8068_v56  ;;  %vm6166_vm2 = vmpackc.low %vm613_vm13, %vm609_vm12  ;;  %vm621_vm10 = vcmp.eq.s32.totalorder %v557_v55, %v6111_v46  ;;  %vm619_vm13 = vcmp.eq.s32.totalorder %v556_v54, %v6113_v47  ;;  %v6271_v11 = vadd.s32 176, %v6087_v27 }
  0x6d   : > { %4619 = vmatpush3.bf16.msra.mxu0 %v5370_v19  ;;  %v8071_v57 = vsel %vm6166_vm2, 4294967295, %v8070_v57  ;;  %vm6176_vm5 = vmpackc.low %vm615_vm0, %vm611_vm15  ;;  %vm623_vm15 = vcmp.eq.s32.totalorder %v557_v55, %v6113_v47  ;;  %v6274_v12 = vadd.s32 184, %v6087_v27  ;;  %v8082_v13 = vmov 0 }
  0x6e   : > { %4731 = vmatpush3.bf16.msra.mxu1 %v5371_v20  ;;  %4620 = vmatprep.subr.bf16.mxu0 %v5372_v21  ;;  %v8073_v58 = vsel %vm6176_vm5, 4294967295, %v8072_v58  ;;  %vm6188_vm12 = vmpackc.low %vm612_vm4, %vm608_vm3  ;;  %vm616_vm4 = vcmp.eq.s32.totalorder %v556_v54, %v6115_v48  ;;  %v6292_v14 = vadd.s32 192, %v6087_v27  ;;  %v8085_v15 = vmov 0 }
  0x6f   : > { %4732 = vmatprep.subr.bf16.mxu1 %v5373_v23  ;;  %v8075_v59 = vsel %vm6188_vm12, 4294967295, %v8074_v59  ;;  %vm6195_vm0 = vmpackc.low %vm614_vm8, %vm610_vm7  ;;  %vm620_vm7 = vcmp.eq.s32.totalorder %v557_v55, %v6115_v48  ;;  %vm618_vm8 = vcmp.eq.s32.totalorder %v556_v54, %v6117_v49  ;;  %v8089_v16 = vmov 0 }
  0x70   : > { %v8077_v60 = vsel %vm6195_vm0, 4294967295, %v8076_v60  ;;  %vm6206_vm3 = vmpackc.low %vm623_vm15, %vm619_vm13  ;;  %v8093_v17 = vmov 0  ;;  %v6348_v18 = vadd.s32 200, %v6087_v27  ;;  %v6365_v19 = vadd.s32 208, %v6087_v27 }
  0x71   : > { %4621 = vmatpush3.bf16.msra.mxu0 %v5374_v24  ;;  %v8081_v62 = vsel %vm6206_vm3, 4294967295, %v8080_v62  ;;  %vm6280_vm15 = vmpackc.low %vm620_vm7, %vm616_vm4  ;;  %vm8084_vm4 = vcmp.eq.s32.totalorder %v557_v55, %v6117_v49  ;;  %v6384_v20 = vadd.s32 216, %v6087_v27  ;;  %v6401_v21 = vadd.s32 224, %v6087_v27 }
  0x72   : > { %4733 = vmatpush3.bf16.msra.mxu1 %v5375_v25  ;;  %4622 = vmatprep.subr.bf16.mxu0 %v5376_v26  ;;  %v8083_v13 = vsel %vm6280_vm15, 4294967295, %v8082_v13  ;;  %vm6298_vm7 = vmpackc.low %vm8084_vm4, %vm618_vm8  ;;  %vm8088_vm8 = vcmp.eq.s32.totalorder %v6214_v0, %v6111_v46  ;;  %v8097_v22 = vmov 0  ;;  %v6439_v23 = vadd.s32 232, %v6087_v27 }
  0x73   : > { %4734 = vmatprep.subr.bf16.mxu1 %v5377_v28  ;;  %v8086_v15 = vsel %vm6298_vm7, 4294967295, %v8085_v15  ;;  %v8101_v24 = vmov 0  ;;  %v8105_v25 = vmov 0  ;;  %v8109_v26 = vmov 0 }
  0x74   : > { %v8113_v28 = vmov 0  ;;  %v8121_v32 = vmov 0  ;;  %v8125_v34 = vmov 0  ;;  %v6611_v36 = vadd.s32 120, %v6087_v27 }
  0x75   : > { %4623 = vmatpush3.bf16.msra.mxu0 %v5378_v29  ;;  %v6535_v29 = vadd.s32 240, %v6087_v27  ;;  %v8133_v37 = vmov 0  ;;  %v8141_v39 = vmov 0  ;;  %v8146_v40 = vmov 0 }
  0x76   : > { %4735 = vmatpush3.bf16.msra.mxu1 %v5379_v30  ;;  %4624 = vmatprep.subr.bf16.mxu0 %v5380_v31  ;;  %v8117_v30 = vmov 0  ;;  %v6558_v31 = vadd.s32 248, %v6087_v27  ;;  %v8150_v41 = vmov 0  ;;  %vm8152_vm11 = vcmp.eq.s32.totalorder %v6247_v7, %v6115_v48 }
  0x77   : > { %4736 = vmatprep.subr.bf16.mxu1 %v5381_v33  ;;  %v6571_v33 = vadd.s32 112, %v6087_v27  ;;  %v8154_v42 = vmov 0  ;;  %v8160_v44 = vmov 0  ;;  %v8165_v45 = vmov 0 }
  0x78   : > { %v8167_v54 = vmov 0  ;;  %v8170_v55 = vmov 0 }
  0x79   : > { %4625 = vmatpush3.bf16.msra.mxu0 %v5382_v35  ;;  %v8129_v35 = vmov 0  ;;  %vm659_vm6 = vcmp.eq.s32.totalorder %v6571_v33, %v6113_v47 }
  0x7a   : > { %4737 = vmatpush3.bf16.msra.mxu1 %v5383_v38  ;;  %4834 = vmatprep.subr.bf16.mxu0 %v5799_v43  ;;  %v8137_v38 = vmov 0 }
  0x7b   : > { %4946 = vmatprep.subr.bf16.mxu1 %v5799_v43 }
  0x7c   : > { %4263 = vmatmul.mubr.msk.bf16.vlgmr.msra.gmra.mrb[0].mxu0 %vm6147_vm14, %v8034_v51  ;;  %vm661_vm14 = vcmp.eq.s32.totalorder %v6611_v36, %v6111_v46 }
  0x7d   : > { %4327 = vmatmul.mubr.msk.bf16.vlgmr.msra.gmra.mrb[0].mxu1 %vm6158_vm1, %v8034_v51  ;;  %4835 = vmatpush3.bf16.msra.mxu0 %v5799_v43  ;;  %vm8135_vm1 = vcmp.eq.s32.totalorder %v6233_v5, %v6111_v46 }
  0x7e   : > { %4947 = vmatpush3.bf16.msra.mxu1 %v5799_v43  ;;  %4265 = vmatprep.mubr.msk.bf16.mxu0 %vm6166_vm2, %v8034_v51  ;;  %vm8145_vm2 = vcmp.eq.s32.totalorder %v6250_v8, %v6111_v46 }
  0x7f   : > { %4329 = vmatprep.mubr.msk.bf16.mxu1 %vm6176_vm5, %v8034_v51  ;;  %4836 = vmatprep.subr.bf16.mxu0 %v5799_v43  ;;  %vm6200_vm5 = vmpackc.low %vm621_vm10, %vm617_vm9  ;;  %vm8096_vm9 = vcmp.eq.s32.totalorder %v6214_v0, %v6115_v48 }
  0x80   : > { %4948 = vmatprep.subr.bf16.mxu1 %v5799_v43  ;;  %v8079_v61 = vsel %vm6200_vm5, 4294967295, %v8078_v61 }
  0x81   : > { %4837 = vmatpush3.bf16.msra.mxu0 %v5799_v43 }
  0x82   : > { %4949 = vmatpush3.bf16.msra.mxu1 %v5799_v43  ;;  %4838 = vmatprep.subr.bf16.mxu0 %v5799_v43 }
  0x83   : > { %4950 = vmatprep.subr.bf16.mxu1 %v5799_v43 }
  0x84   : > { %4267 = vmatmul.mubr.msk.bf16.gmra.mrb[4].mxu0 %vm6188_vm12, %v8034_v51 }
  0x85   : > { %4331 = vmatmul.mubr.msk.bf16.gmra.mrb[4].mxu1 %vm6195_vm0, %v8034_v51  ;;  %4269 = vmatprep.mubr.msk.bf16.mxu0 %vm6200_vm5, %v8034_v51  ;;  %vm8087_vm5 = vcmp.eq.s32.totalorder %v6211_v63, %v6111_v46 }
  0x86   : > { %4333 = vmatprep.mubr.msk.bf16.mxu1 %vm6206_vm3, %v8034_v51  ;;  %4839 = vmatpush3.bf16.msra.mxu0 %v5799_v43  ;;  %vm6316_vm4 = vmpackc.low %vm8088_vm8, %vm8087_vm5  ;;  %vm8091_vm5 = vcmp.eq.s32.totalorder %v6211_v63, %v6113_v47  ;;  %vm8092_vm8 = vcmp.eq.s32.totalorder %v6214_v0, %v6113_v47  ;;  %vm8095_vm3 = vcmp.eq.s32.totalorder %v6211_v63, %v6115_v48 }
  0x87   : > { %4951 = vmatpush3.bf16.msra.mxu1 %v5799_v43  ;;  %4840 = vmatprep.subr.bf16.mxu0 %v5799_v43  ;;  %v8090_v16 = vsel %vm6316_vm4, 4294967295, %v8089_v16  ;;  %vm6335_vm0 = vmpackc.low %vm8092_vm8, %vm8091_vm5  ;;  %vm8144_vm5 = vcmp.eq.s32.totalorder %v6247_v7, %v6111_v46 }
  0x88   : > { %4952 = vmatprep.subr.bf16.mxu1 %v5799_v43  ;;  %v8094_v17 = vsel %vm6335_vm0, 4294967295, %v8093_v17 }
  0x8a   : > { %4841 = vmatpush3.bf16.msra.mxu0 %v5799_v43 }
  0x8b   : > { %4953 = vmatpush3.bf16.msra.mxu1 %v5799_v43  ;;  %4842 = vmatprep.subr.bf16.mxu0 %v5799_v43 }
  0x8c   : > { %4271 = vmatmul.mubr.msk.bf16.gmra.mrb[8].mxu0 %vm6280_vm15, %v8034_v51  ;;  %4954 = vmatprep.subr.bf16.mxu1 %v5799_v43 }
  0x8d   : > { %4335 = vmatmul.mubr.msk.bf16.gmra.mrb[8].mxu1 %vm6298_vm7, %v8034_v51  ;;  %4273 = vmatprep.mubr.msk.bf16.mxu0 %vm6316_vm4, %v8034_v51  ;;  %vm8104_vm4 = vcmp.eq.s32.totalorder %v6220_v2, %v6111_v46  ;;  %vm652_vm7 = vcmp.eq.s32.totalorder %v6236_v6, %v6115_v48 }
  0x8e   : > { %4337 = vmatprep.mubr.msk.bf16.mxu1 %vm6335_vm0, %v8034_v51  ;;  %4843 = vmatpush3.bf16.msra.mxu0 %v5799_v43  ;;  %vm6422_vm0 = vmpackc.low %vm8096_vm9, %vm8095_vm3  ;;  %vm8099_vm3 = vcmp.eq.s32.totalorder %v6211_v63, %v6117_v49  ;;  %vm8100_vm9 = vcmp.eq.s32.totalorder %v6214_v0, %v6117_v49  ;;  %v8175_v63 = vmov 0  ;;  %v8177_v0 = vmov 0 }
  0x8f   : > { %4955 = vmatpush3.bf16.msra.mxu1 %v5799_v43  ;;  %v8098_v22 = vsel %vm6422_vm0, 4294967295, %v8097_v22  ;;  %4844 = vmatprep.subr.bf16.mxu0 %v5799_v43  ;;  %vm6447_vm10 = vmpackc.low %vm8100_vm9, %vm8099_vm3  ;;  %vm8103_vm9 = vcmp.eq.s32.totalorder %v6217_v1, %v6111_v46 }
  0x90   : > { %4956 = vmatprep.subr.bf16.mxu1 %v5799_v43  ;;  %v8102_v24 = vsel %vm6447_vm10, 4294967295, %v8101_v24  ;;  %vm6469_vm15 = vmpackc.low %vm8104_vm4, %vm8103_vm9  ;;  %vm8107_vm4 = vcmp.eq.s32.totalorder %v6217_v1, %v6113_v47  ;;  %vm8108_vm9 = vcmp.eq.s32.totalorder %v6220_v2, %v6113_v47 }
  0x91   : > { %v8106_v25 = vsel %vm6469_vm15, 4294967295, %v8105_v25  ;;  %vm6488_vm13 = vmpackc.low %vm8108_vm9, %vm8107_vm4  ;;  %vm8111_vm4 = vcmp.eq.s32.totalorder %v6217_v1, %v6115_v48  ;;  %vm8112_vm9 = vcmp.eq.s32.totalorder %v6220_v2, %v6115_v48 }
  0x92   : > { %4845 = vmatpush3.bf16.msra.mxu0 %v5799_v43  ;;  %v8110_v26 = vsel %vm6488_vm13, 4294967295, %v8109_v26  ;;  %vm6524_vm8 = vmpackc.low %vm8112_vm9, %vm8111_vm4  ;;  %vm8115_vm4 = vcmp.eq.s32.totalorder %v6217_v1, %v6117_v49  ;;  %vm8116_vm9 = vcmp.eq.s32.totalorder %v6220_v2, %v6117_v49  ;;  %v568_v1 = vadd.s32 128, %v6087_v27 }
  0x93   : > { %4957 = vmatpush3.bf16.msra.mxu1 %v5799_v43  ;;  %v8114_v28 = vsel %vm6524_vm8, 4294967295, %v8113_v28  ;;  %vm6546_vm3 = vmpackc.low %vm8116_vm9, %vm8115_vm4  ;;  %4846 = vmatprep.subr.bf16.mxu0 %v5799_v43  ;;  %vm8119_vm4 = vcmp.eq.s32.totalorder %v6227_v3, %v6111_v46  ;;  %vm8120_vm9 = vcmp.eq.s32.totalorder %v6230_v4, %v6111_v46  ;;  %v569_v2 = vadd.s32 136, %v6087_v27 }
  0x94   : > { %4275 = vmatmul.mubr.msk.bf16.gmra.mrb[12].mxu0 %vm6422_vm0, %v8034_v51  ;;  %v8118_v30 = vsel %vm6546_vm3, 4294967295, %v8117_v30  ;;  %4958 = vmatprep.subr.bf16.mxu1 %v5799_v43  ;;  %v8187_v27 = vmov 0 }
  0x95   : > { %4339 = vmatmul.mubr.msk.bf16.gmra.mrb[12].mxu1 %vm6447_vm10, %v8034_v51  ;;  %4277 = vmatprep.mubr.msk.bf16.mxu0 %vm6469_vm15, %v8034_v51  ;;  %vm6566_vm15 = vmpackc.low %vm8120_vm9, %vm8119_vm4  ;;  %vm8123_vm4 = vcmp.eq.s32.totalorder %v6227_v3, %v6113_v47  ;;  %vm8124_vm9 = vcmp.eq.s32.totalorder %v6230_v4, %v6113_v47 }
  0x96   : > { %4341 = vmatprep.mubr.msk.bf16.mxu1 %vm6488_vm13, %v8034_v51  ;;  %v8122_v32 = vsel %vm6566_vm15, 4294967295, %v8121_v32  ;;  %4847 = vmatpush3.bf16.msra.mxu0 %v5799_v43  ;;  %vm6587_vm10 = vmpackc.low %vm8124_vm9, %vm8123_vm4  ;;  %vm8127_vm4 = vcmp.eq.s32.totalorder %v6227_v3, %v6115_v48  ;;  %vm8128_vm9 = vcmp.eq.s32.totalorder %v6230_v4, %v6115_v48 }
  0x97   : > { %v8126_v34 = vsel %vm6587_vm10, 4294967295, %v8125_v34  ;;  %4959 = vmatpush3.bf16.msra.mxu1 %v5799_v43  ;;  %vm6606_vm12 = vmpackc.low %vm8128_vm9, %vm8127_vm4  ;;  %4848 = vmatprep.subr.bf16.mxu0 %v5799_v43  ;;  %vm8131_vm4 = vcmp.eq.s32.totalorder %v6227_v3, %v6117_v49  ;;  %vm8132_vm9 = vcmp.eq.s32.totalorder %v6230_v4, %v6117_v49  ;;  %v8182_v3 = vmov 0 }
  0x98   : > { %v8130_v35 = vsel %vm6606_vm12, 4294967295, %v8129_v35  ;;  %4960 = vmatprep.subr.bf16.mxu1 %v5799_v43  ;;  %vm6627_vm13 = vmpackc.low %vm8132_vm9, %vm8131_vm4  ;;  %vm8136_vm4 = vcmp.eq.s32.totalorder %v6236_v6, %v6111_v46  ;;  %v8193_v4 = vmov 0 }
  0x99   : > { %v8134_v37 = vsel %vm6627_vm13, 4294967295, %v8133_v37  ;;  %vm6645_vm9 = vmpackc.low %vm8136_vm4, %vm8135_vm1  ;;  %vm8139_vm1 = vcmp.eq.s32.totalorder %v6233_v5, %v6113_v47  ;;  %vm8140_vm4 = vcmp.eq.s32.totalorder %v6236_v6, %v6113_v47 }
  0x9a   : > { %v8138_v38 = vsel %vm6645_vm9, 4294967295, %v8137_v38  ;;  %4849 = vmatpush3.bf16.msra.mxu0 %v5799_v43  ;;  %vm6667_vm0 = vmpackc.low %vm8140_vm4, %vm8139_vm1  ;;  %vm648_vm4 = vcmp.eq.s32.totalorder %v6233_v5, %v6115_v48 }
  0x9b   : > { %v8142_v39 = vsel %vm6667_vm0, 4294967295, %v8141_v39  ;;  %4961 = vmatpush3.bf16.msra.mxu1 %v5799_v43  ;;  %vm6684_vm1 = vmpackc.low %vm8145_vm2, %vm8144_vm5  ;;  %vm650_vm5 = vcmp.eq.s32.totalorder %v6233_v5, %v6117_v49  ;;  %vm8157_vm0 = vcmp.eq.s32.totalorder %v6250_v8, %v6117_v49  ;;  %v8158_v43 = vmov 0 }
  0x9c   : > { %4279 = vmatmul.mubr.msk.bf16.gmra.mrb[16].mxu0 %vm6524_vm8, %v8034_v51  ;;  %8143 = vst [vmem:[#allocation10_spill] sm:$0xff] %v8142_v39  ;;  %v8147_v40 = vsel %vm6684_vm1, 4294967295, %v8146_v40  ;;  %vm657_vm8 = vcmp.eq.s32.totalorder %v6571_v33, %v6111_v46  ;;  %vm8156_vm1 = vcmp.eq.s32.totalorder %v6247_v7, %v6117_v49  ;;  %v8198_v5 = vmov 0 }
  0x9d   : > { %4343 = vmatmul.mubr.msk.bf16.gmra.mrb[16].mxu1 %vm6546_vm3, %v8034_v51  ;;  %4281 = vmatprep.mubr.msk.bf16.mxu0 %vm6566_vm15, %v8034_v51  ;;  %vm8148_vm15 = vcmp.eq.s32.totalorder %v6247_v7, %v6113_v47  ;;  %vm8149_vm3 = vcmp.eq.s32.totalorder %v6250_v8, %v6113_v47  ;;  %vm6733_vm9 = vmpackc.low %vm8157_vm0, %vm8156_vm1  ;;  %vm8174_vm1 = vcmp.eq.s32.totalorder %v6262_v10, %v6113_v47  ;;  %v8206_v7 = vmov 0 }
  0x9e   : > { %4345 = vmatprep.mubr.msk.bf16.mxu1 %vm6587_vm10, %v8034_v51  ;;  %vm6701_vm2 = vmpackc.low %vm8149_vm3, %vm8148_vm15  ;;  %vm654_vm10 = vcmp.eq.s32.totalorder %v6236_v6, %v6117_v49  ;;  %vm8153_vm15 = vcmp.eq.s32.totalorder %v6250_v8, %v6115_v48  ;;  %v8159_v43 = vsel %vm6733_vm9, 4294967295, %v8158_v43  ;;  %v8202_v6 = vmov 0 }
  0x9f   : > { %v8151_v41 = vsel %vm6701_vm2, 4294967295, %v8150_v41  ;;  %vm6719_vm3 = vmpackc.low %vm8153_vm15, %vm8152_vm11  ;;  %vm663_vm2 = vcmp.eq.s32.totalorder %v6611_v36, %v6113_v47  ;;  %vm8163_vm15 = vcmp.eq.s32.totalorder %v6259_v9, %v6111_v46  ;;  %vm8204_vm9 = vcmp.eq.s32.totalorder %v6271_v11, %v6117_v49 }
  0xa0   : > { %v8155_v42 = vsel %vm6719_vm3, 4294967295, %v8154_v42  ;;  %vm6737_vm11 = vmpackc.low %vm652_vm7, %vm648_vm4  ;;  %vm8164_vm3 = vcmp.eq.s32.totalorder %v6262_v10, %v6111_v46  ;;  %vm8173_vm7 = vcmp.eq.s32.totalorder %v6259_v9, %v6113_v47  ;;  %v8208_v8 = vmov 0 }
  0xa1   : > { %v8161_v44 = vsel %vm6737_vm11, 4294967295, %v8160_v44  ;;  %vm6747_vm13 = vmpackc.low %vm8164_vm3, %vm8163_vm15 }
  0xa2   : > { %8162 = vst [vmem:[#allocation11_spill] sm:$0xff] %v8161_v44  ;;  %v8166_v45 = vsel %vm6747_vm13, 4294967295, %v8165_v45  ;;  %vm6751_vm12 = vmpackc.low %vm654_vm10, %vm650_vm5  ;;  %vm8181_vm10 = vcmp.eq.s32.totalorder %v6262_v10, %v6115_v48  ;;  %vm8186_vm5 = vcmp.eq.s32.totalorder %v6262_v10, %v6117_v49  ;;  %vm8201_vm13 = vcmp.eq.s32.totalorder %v6274_v12, %v6115_v48 }
  0xa3   : > { %v8168_v54 = vsel %vm6751_vm12, 4294967295, %v8167_v54  ;;  %vm6755_vm0 = vmpackc.low %vm661_vm14, %vm657_vm8  ;;  %vm8180_vm14 = vcmp.eq.s32.totalorder %v6259_v9, %v6115_v48  ;;  %v8214_v10 = vmov 0 }
  0xa4   : > { %8169 = vst [vmem:[#allocation12_spill] sm:$0xff] %v8168_v54  ;;  %v8171_v55 = vsel %vm6755_vm0, 4294967295, %v8170_v55  ;;  %vm6765_vm4 = vmpackc.low %vm8174_vm1, %vm8173_vm7  ;;  %vm8189_vm7 = vnez %v8134_v37  ;;  %vm8190_vm1 = vnez %v8138_v38 }
  0xa5   : > { %8172 = vst [vmem:[#allocation13_spill] sm:$0xff] %v8171_v55  ;;  %v8176_v63 = vsel %vm6765_vm4, 4294967295, %v8175_v63  ;;  %vm6769_vm3 = vmpackc.low %vm663_vm2, %vm659_vm6  ;;  %vm8184_vm6 = vnez %v8130_v35  ;;  %vm8185_vm2 = vcmp.eq.s32.totalorder %v6259_v9, %v6117_v49  ;;  %4347 = vmatmul.mubr.msk.bf16.gmra.mrb[20].mxu1 %vm8189_vm7, %v8034_v51  ;;  %vm8196_vm7 = vcmp.eq.s32.totalorder %v6271_v11, %v6113_v47 }
  0xa6   : > { %v8178_v0 = vsel %vm6769_vm3, 4294967295, %v8177_v0  ;;  %vm6781_vm8 = vmpackc.low %vm8181_vm10, %vm8180_vm14  ;;  %4283 = vmatmul.mubr.msk.bf16.gmra.mrb[20].mxu0 %vm8184_vm6, %v8034_v51  ;;  %vm8191_vm14 = vcmp.eq.s32.totalorder %v6271_v11, %v6111_v46  ;;  %vm8192_vm10 = vcmp.eq.s32.totalorder %v6274_v12, %v6111_v46  ;;  %vm8200_vm4 = vcmp.eq.s32.totalorder %v6271_v11, %v6115_v48 }
  0xa7   : > { %8179 = vst [vmem:[#allocation14_spill] sm:$0xff] %v8178_v0  ;;  %v8183_v3 = vsel %vm6781_vm8, 4294967295, %v8182_v3  ;;  %vm6794_vm15 = vmpackc.low %vm8186_vm5, %vm8185_vm2  ;;  %4285 = vmatprep.mubr.msk.bf16.mxu0 %vm8190_vm1, %v8034_v51  ;;  %vm8195_vm2 = vnez %v8142_v39  ;;  %vm656_vm5 = vcmp.eq.s32.totalorder %v6571_v33, %v6115_v48  ;;  %vm660_vm1 = vcmp.eq.s32.totalorder %v6611_v36, %v6115_v48 }
  0xa8   : > { %v8188_v27 = vsel %vm6794_vm15, 4294967295, %v8187_v27  ;;  %vm6810_vm6 = vmpackc.low %vm8192_vm10, %vm8191_vm14  ;;  %4349 = vmatprep.mubr.msk.bf16.mxu1 %vm8195_vm2, %v8034_v51  ;;  %vm8197_vm15 = vcmp.eq.s32.totalorder %v6274_v12, %v6113_v47  ;;  %vm658_vm10 = vcmp.eq.s32.totalorder %v6571_v33, %v6117_v49  ;;  %vm662_vm2 = vcmp.eq.s32.totalorder %v6611_v36, %v6117_v49 }
  0xa9   : > { %v8194_v4 = vsel %vm6810_vm6, 4294967295, %v8193_v4  ;;  %vm6827_vm14 = vmpackc.low %vm8197_vm15, %vm8196_vm7  ;;  %vm665_vm6 = vcmp.eq.s32.totalorder %v568_v1, %v6111_v46  ;;  %vm669_vm8 = vcmp.eq.s32.totalorder %v569_v2, %v6111_v46  ;;  %vm667_vm7 = vcmp.eq.s32.totalorder %v568_v1, %v6113_v47 }
  0xaa   : > { %v8199_v5 = vsel %vm6827_vm14, 4294967295, %v8198_v5  ;;  %vm6843_vm15 = vmpackc.low %vm8201_vm13, %vm8200_vm4  ;;  %vm671_vm14 = vcmp.eq.s32.totalorder %v569_v2, %v6113_v47  ;;  %vm8205_vm3 = vcmp.eq.s32.totalorder %v6274_v12, %v6117_v49  ;;  %vm8210_vm13 = vcmp.eq.s32.totalorder %v6292_v14, %v6111_v46 }
  0xab   : > { %v8203_v6 = vsel %vm6843_vm15, 4294967295, %v8202_v6  ;;  %vm6855_vm0 = vmpackc.low %vm8205_vm3, %vm8204_vm9  ;;  %vm8211_vm4 = vcmp.eq.s32.totalorder %v6348_v18, %v6111_v46  ;;  %v8212_v9 = vmov 0  ;;  %v8216_v11 = vmov 0 }
  0xac   : > { %v8207_v7 = vsel %vm6855_vm0, 4294967295, %v8206_v7  ;;  %vm6859_vm12 = vmpackc.low %vm660_vm1, %vm656_vm5  ;;  %vm8218_vm3 = vcmp.eq.s32.totalorder %v6292_v14, %v6113_v47  ;;  %vm8219_vm1 = vcmp.eq.s32.totalorder %v6348_v18, %v6113_v47  ;;  %v8220_v12 = vmov 0 }
  0xad   : > { %v8209_v8 = vsel %vm6859_vm12, 4294967295, %v8208_v8  ;;  %vm6869_vm15 = vmpackc.low %vm8211_vm4, %vm8210_vm13  ;;  %v8222_v33 = vmov 0  ;;  %v8226_v36 = vmov 0  ;;  %v8231_v39 = vmov 0 }
  0xae   : > { %v8213_v9 = vsel %vm6869_vm15, 4294967295, %v8212_v9  ;;  %vm6873_vm11 = vmpackc.low %vm662_vm2, %vm658_vm10  ;;  %vm8228_vm10 = vnez %v8161_v44  ;;  %v8267_v44 = vmov 0 }
  0xaf   : > { %v8215_v10 = vsel %vm6873_vm11, 4294967295, %v8214_v10  ;;  %vm6877_vm9 = vmpackc.low %vm669_vm8, %vm665_vm6  ;;  %vm8224_vm8 = vcmp.eq.s32.totalorder %v6292_v14, %v6115_v48  ;;  %vm8225_vm6 = vcmp.eq.s32.totalorder %v6348_v18, %v6115_v48  ;;  %4287 = vmatmul.mubr.msk.bf16.gmra.mrb[24].mxu0 %vm8228_vm10, %v8034_v51 }
  0xb0   : > { %v8217_v11 = vsel %vm6877_vm9, 4294967295, %v8216_v11  ;;  %vm6887_vm5 = vmpackc.low %vm8219_vm1, %vm8218_vm3  ;;  %vm8233_vm3 = vnez %v8168_v54  ;;  %vm8234_vm1 = vnez %v8171_v55  ;;  %v8246_v55 = vmov 0 }
  0xb1   : > { %v8221_v12 = vsel %vm6887_vm5, 4294967295, %v8220_v12  ;;  %vm6891_vm13 = vmpackc.low %vm671_vm14, %vm667_vm7  ;;  %vm8229_vm14 = vcmp.eq.s32.totalorder %v6292_v14, %v6117_v49  ;;  %vm8230_vm7 = vcmp.eq.s32.totalorder %v6348_v18, %v6117_v49  ;;  %4351 = vmatmul.mubr.msk.bf16.gmra.mrb[24].mxu1 %vm8233_vm3, %v8034_v51  ;;  %4289 = vmatprep.mubr.msk.bf16.mxu0 %vm8234_vm1, %v8034_v51  ;;  %v8237_v14 = vmov 0 }
  0xb2   : > { %v8223_v33 = vsel %vm6891_vm13, 4294967295, %v8222_v33  ;;  %vm6901_vm2 = vmpackc.low %vm8225_vm6, %vm8224_vm8  ;;  %vm8235_vm8 = vcmp.eq.s32.totalorder %v6365_v19, %v6111_v46  ;;  %vm8236_vm6 = vcmp.eq.s32.totalorder %v6384_v20, %v6111_v46  ;;  %vm8241_vm1 = vcmp.eq.s32.totalorder %v6384_v20, %v6113_v47 }
  0xb3   : > { %v8227_v36 = vsel %vm6901_vm2, 4294967295, %v8226_v36  ;;  %vm6914_vm4 = vmpackc.low %vm8230_vm7, %vm8229_vm14  ;;  %vm8239_vm14 = vnez %v8178_v0  ;;  %vm8240_vm7 = vcmp.eq.s32.totalorder %v6365_v19, %v6113_v47  ;;  %v8242_v18 = vmov 0 }
  0xb4   : > { %v8232_v39 = vsel %vm6914_vm4, 4294967295, %v8231_v39  ;;  %vm6930_vm10 = vmpackc.low %vm8236_vm6, %vm8235_vm8  ;;  %4353 = vmatprep.mubr.msk.bf16.mxu1 %vm8239_vm14, %v8034_v51  ;;  %vm8244_vm8 = vcmp.eq.s32.totalorder %v6365_v19, %v6115_v48  ;;  %vm8245_vm6 = vcmp.eq.s32.totalorder %v6384_v20, %v6115_v48  ;;  %vm8248_vm14 = vcmp.eq.s32.totalorder %v6365_v19, %v6117_v49 }
  0xb5   : > { %v8238_v14 = vsel %vm6930_vm10, 4294967295, %v8237_v14  ;;  %vm6943_vm3 = vmpackc.low %vm8241_vm1, %vm8240_vm7  ;;  %vm8249_vm4 = vcmp.eq.s32.totalorder %v6384_v20, %v6117_v49  ;;  %v8250_v51 = vmov 0  ;;  %vm8252_vm7 = vcmp.eq.s32.totalorder %v6401_v21, %v6111_v46 }
  0xb6   : > { %v8243_v18 = vsel %vm6943_vm3, 4294967295, %v8242_v18  ;;  %vm6953_vm10 = vmpackc.low %vm8245_vm6, %vm8244_vm8  ;;  %vm8253_vm3 = vcmp.eq.s32.totalorder %v6439_v23, %v6111_v46  ;;  %v8254_v0 = vmov 0  ;;  %vm8256_vm6 = vcmp.eq.s32.totalorder %v6401_v21, %v6113_v47 }
  0xb7   : > { %v8247_v55 = vsel %vm6953_vm10, 4294967295, %v8246_v55  ;;  %vm6963_vm1 = vmpackc.low %vm8249_vm4, %vm8248_vm14  ;;  %vm8257_vm10 = vcmp.eq.s32.totalorder %v6439_v23, %v6113_v47  ;;  %v8258_v19 = vmov 0  ;;  %vm8260_vm14 = vcmp.eq.s32.totalorder %v6401_v21, %v6115_v48 }
  0xb8   : > { %v8251_v51 = vsel %vm6963_vm1, 4294967295, %v8250_v51  ;;  %vm6973_vm8 = vmpackc.low %vm8253_vm3, %vm8252_vm7  ;;  %vm8261_vm1 = vcmp.eq.s32.totalorder %v6439_v23, %v6115_v48  ;;  %v8262_v20 = vmov 0  ;;  %v8264_v54 = vmov 1.0|1.0  }
  0xb9   : > { %v8255_v0 = vsel %vm6973_vm8, 4294967295, %v8254_v0  ;;  %vm6983_vm4 = vmpackc.low %vm8257_vm10, %vm8256_vm6  ;;  %4291 = vmatmul.mubr.msk.bf16.gmra.mrb[28].mxu0 %vm6859_vm12, %v8264_v54  ;;  %vm8265_vm10 = vcmp.eq.s32.totalorder %v6401_v21, %v6117_v49  ;;  %vm8266_vm7 = vcmp.eq.s32.totalorder %v6439_v23, %v6117_v49  ;;  %4355 = vmatmul.mubr.msk.bf16.gmra.mrb[28].mxu1 %vm6873_vm11, %v8264_v54  ;;  %v8271_v21 = vmov 0 }
  0xba   : > { %v8259_v19 = vsel %vm6983_vm4, 4294967295, %v8258_v19  ;;  %vm6993_vm3 = vmpackc.low %vm8261_vm1, %vm8260_vm14  ;;  %4293 = vmatprep.mubr.msk.bf16.mxu0 %vm6877_vm9, %v8264_v54  ;;  %vm8269_vm1 = vcmp.eq.s32.totalorder %v6535_v29, %v6111_v46  ;;  %vm8270_vm14 = vcmp.eq.s32.totalorder %v6558_v31, %v6111_v46  ;;  %4357 = vmatprep.mubr.msk.bf16.mxu1 %vm6891_vm13, %v8264_v54  ;;  %vm8273_vm9 = vcmp.eq.s32.totalorder %v6535_v29, %v6113_v47 }
  0xbb   : > { %v8263_v20 = vsel %vm6993_vm3, 4294967295, %v8262_v20  ;;  %vm7006_vm6 = vmpackc.low %vm8266_vm7, %vm8265_vm10  ;;  %vm664_vm10 = vcmp.eq.s32.totalorder %v568_v1, %v6115_v48  ;;  %vm668_vm7 = vcmp.eq.s32.totalorder %v569_v2, %v6115_v48  ;;  %vm8274_vm11 = vcmp.eq.s32.totalorder %v6558_v31, %v6113_v47 }
  0xbc   : > { %v8268_v44 = vsel %vm7006_vm6, 4294967295, %v8267_v44  ;;  %vm7022_vm12 = vmpackc.low %vm8270_vm14, %vm8269_vm1  ;;  %v8275_v46 = vmov 0  ;;  %vm666_vm1 = vcmp.eq.s32.totalorder %v568_v1, %v6117_v49  ;;  %vm670_vm14 = vcmp.eq.s32.totalorder %v569_v2, %v6117_v49  ;;  %v1052_v1 = vld [vmem:[#allocation2 + $0x20] sm:$0xff] }
  0xbd   : > { %v8272_v21 = vsel %vm7022_vm12, 4294967295, %v8271_v21  ;;  %vm7037_vm6 = vmpackc.low %vm8274_vm11, %vm8273_vm9  ;;  %vm8277_vm13 = vcmp.eq.s32.totalorder %v6535_v29, %v6115_v48  ;;  %vm8278_vm12 = vcmp.eq.s32.totalorder %v6558_v31, %v6115_v48  ;;  %v8279_v23 = vmov 0 }
  0xbe   : > { %v8276_v46 = vsel %vm7037_vm6, 4294967295, %v8275_v46  ;;  %vm7049_vm3 = vmpackc.low %vm8278_vm12, %vm8277_vm13  ;;  %vm8281_vm11 = vcmp.eq.s32.totalorder %v6535_v29, %v6117_v49  ;;  %vm8282_vm9 = vcmp.eq.s32.totalorder %v6558_v31, %v6117_v49  ;;  %v8283_v47 = vmov 0  ;;  %v8336_v49 = vld [vmem:[#allocation10_spill] sm:$0xff] }
  0xbf   : > { %v8280_v23 = vsel %vm7049_vm3, 4294967295, %v8279_v23  ;;  %vm7059_vm6 = vmpackc.low %vm8282_vm9, %vm8281_vm11  ;;  %vm8289_vm12 = vnez %v8147_v40  ;;  %vm8290_vm13 = vnez %v8151_v41  ;;  %vm8295_vm11 = vnez %v8183_v3 }
  0xc0   : > { %v8284_v47 = vsel %vm7059_vm6, 4294967295, %v8283_v47  ;;  %vm7063_vm4 = vmpackc.low %vm668_vm7, %vm664_vm10  ;;  %vm8291_vm10 = vnez %v8155_v42  ;;  %vm8292_vm7 = vnez %v8159_v43  ;;  %vm8296_vm9 = vnez %v8188_v27 }
  0xc1   : > { %vm7067_vm8 = vmpackc.low %vm670_vm14, %vm666_vm1  ;;  %4295 = vmatmul.mubr.msk.bf16.gmra.mrb[32].mxu0 %vm7063_vm4, %v8264_v54  ;;  %vm8293_vm1 = vnez %v8166_v45  ;;  %vm8294_vm14 = vnez %v8176_v63 }
  0xc2   : > { %4359 = vmatmul.mubr.msk.bf16.gmra.mrb[32].mxu1 %vm7067_vm8, %v8264_v54  ;;  %4297 = vmatprep.mubr.msk.bf16.mxu0 %vm8289_vm12, %v8264_v54 }
  0xc3   : > { %4361 = vmatprep.mubr.msk.bf16.mxu1 %vm8290_vm13, %v8264_v54 }
  0xc9   : > { %4299 = vmatmul.mubr.msk.bf16.gmra.mrb[36].mxu0 %vm8291_vm10, %v8264_v54  ;;  %vm8297_vm10 = vnez %v8194_v4  ;;  %v1051_v4 = vld [vmem:[#allocation2 + $0x18] sm:$0xff] }
  0xca   : > { %4363 = vmatmul.mubr.msk.bf16.gmra.mrb[36].mxu1 %vm8292_vm7, %v8264_v54  ;;  %4301 = vmatprep.mubr.msk.bf16.mxu0 %vm8293_vm1, %v8264_v54  ;;  %vm8298_vm7 = vnez %v8199_v5  ;;  %vm8299_vm1 = vnez %v8203_v6 }
  0xcb   : > { %4365 = vmatprep.mubr.msk.bf16.mxu1 %vm8294_vm14, %v8264_v54 }
  0xd1   : > { %4303 = vmatmul.mubr.msk.bf16.gmra.mrb[40].mxu0 %vm8295_vm11, %v8264_v54 }
  0xd2   : > { %4367 = vmatmul.mubr.msk.bf16.gmra.mrb[40].mxu1 %vm8296_vm9, %v8264_v54  ;;  %4305 = vmatprep.mubr.msk.bf16.mxu0 %vm8297_vm10, %v8264_v54 }
  0xd3   : > { %4369 = vmatprep.mubr.msk.bf16.mxu1 %vm8298_vm7, %v8264_v54  ;;  %vm8300_vm7 = vnez %v8232_v39 }
  0xd9   : > { %4307 = vmatmul.mubr.msk.bf16.gmra.mrb[44].mxu0 %vm8299_vm1, %v8264_v54  ;;  %vm8301_vm1 = vnez %v8238_v14 }
  0xda   : > { %4371 = vmatmul.mubr.msk.bf16.gmra.mrb[44].mxu1 %vm6855_vm0, %v8264_v54  ;;  %4309 = vmatprep.mubr.msk.bf16.mxu0 %vm6869_vm15, %v8264_v54  ;;  %vm8302_vm0 = vnez %v8243_v18  ;;  %vm8303_vm15 = vnez %v8247_v55 }
  0xdb   : > { %4373 = vmatprep.mubr.msk.bf16.mxu1 %vm6887_vm5, %v8264_v54  ;;  %vm8304_vm5 = vnez %v8251_v51 }
  0xe1   : > { %4311 = vmatmul.mubr.msk.bf16.gmra.mrb[48].mxu0 %vm6901_vm2, %v8264_v54  ;;  %vm8305_vm2 = vnez %v8255_v0 }
  0xe2   : > { %4375 = vmatmul.mubr.msk.bf16.gmra.mrb[48].mxu1 %vm8300_vm7, %v8264_v54  ;;  %4313 = vmatprep.mubr.msk.bf16.mxu0 %vm8301_vm1, %v8264_v54  ;;  %vm8306_vm7 = vnez %v8259_v19  ;;  %vm8307_vm1 = vnez %v8263_v20 }
  0xe3   : > { %4377 = vmatprep.mubr.msk.bf16.mxu1 %vm8302_vm0, %v8264_v54  ;;  %vm8308_vm0 = vnez %v8268_v44 }
  0xe9   : > { %4315 = vmatmul.mubr.msk.bf16.gmra.mrb[52].mxu0 %vm8303_vm15, %v8264_v54  ;;  %vm8309_vm15 = vnez %v8272_v21 }
  0xea   : > { %4379 = vmatmul.mubr.msk.bf16.gmra.mrb[52].mxu1 %vm8304_vm5, %v8264_v54  ;;  %4317 = vmatprep.mubr.msk.bf16.mxu0 %vm8305_vm2, %v8264_v54  ;;  %vm8310_vm5 = vnez %v8276_v46 }
  0xeb   : > { %4381 = vmatprep.mubr.msk.bf16.mxu1 %vm8306_vm7, %v8264_v54 }
  0xf1   : > { %4319 = vmatmul.mubr.msk.bf16.gmra.mrb[56].mxu0 %vm8307_vm1, %v8264_v54  ;;  %vm8311_vm1 = vnez %v8063_v50  ;;  %v8338_v50 = vld [vmem:[#allocation11_spill] sm:$0xff] }
  0xf2   : > { %4383 = vmatmul.mubr.msk.bf16.gmra.mrb[56].mxu1 %vm8308_vm0, %v8264_v54  ;;  %4321 = vmatprep.mubr.msk.bf16.mxu0 %vm8309_vm15, %v8264_v54  ;;  %vm8312_vm0 = vnez %v8065_v52  ;;  %vm8313_vm15 = vnez %v8067_v53  ;;  %v8340_v52 = vld [vmem:[#allocation12_spill] sm:$0xff]  ;;  %v8342_v53 = vld [vmem:[#allocation13_spill] sm:$0xff] }
  0xf3   : > { %4385 = vmatprep.mubr.msk.bf16.mxu1 %vm8310_vm5, %v8264_v54  ;;  %vm8314_vm5 = vnez %v8069_v56  ;;  %v8344_v56 = vld [vmem:[#allocation14_spill] sm:$0xff] }
  0xf9   : > { %4323 = vmatmul.mubr.msk.bf16.gmra.mrb[60].mxu0 %vm7049_vm3, %v8264_v54  ;;  %vm8315_vm3 = vnez %v8071_v57 }
  0xfa   : > { %4387 = vmatmul.mubr.msk.bf16.gmra.mrb[60].mxu1 %vm7059_vm6, %v8264_v54  ;;  %4389 = vmatprep.mubr.msk.bf16.mxu0 %vm8311_vm1, %v8264_v54  ;;  %vm8316_vm6 = vnez %v8073_v58  ;;  %vm8317_vm1 = vnez %v8075_v59 }
  0xfb   : > { %4453 = vmatprep.mubr.msk.bf16.mxu1 %vm8312_vm0, %v8264_v54  ;;  %vm8318_vm0 = vnez %v8077_v60 }
 0x101   : > { %4391 = vmatmul.mubr.msk.bf16.vlgmr.msra.gmra.mrb[64].mxu0 %vm8313_vm15, %v8264_v54  ;;  %vm8319_vm15 = vnez %v8079_v61 }
 0x102   : > { %4455 = vmatmul.mubr.msk.bf16.vlgmr.msra.gmra.mrb[64].mxu1 %vm8314_vm5, %v8264_v54  ;;  %4393 = vmatprep.mubr.msk.bf16.mxu0 %vm8315_vm3, %v8264_v54  ;;  %vm8320_vm5 = vnez %v8081_v62  ;;  %vm8321_vm3 = vnez %v8083_v13 }
 0x103   : > { %4457 = vmatprep.mubr.msk.bf16.mxu1 %vm8316_vm6, %v8264_v54  ;;  %vm8322_vm6 = vnez %v8086_v15 }
 0x109   : > { %4395 = vmatmul.mubr.msk.bf16.gmra.mrb[68].mxu0 %vm8317_vm1, %v8264_v54  ;;  %vm8323_vm1 = vnez %v8090_v16 }
 0x10a   : > { %4459 = vmatmul.mubr.msk.bf16.gmra.mrb[68].mxu1 %vm8318_vm0, %v8264_v54  ;;  %4397 = vmatprep.mubr.msk.bf16.mxu0 %vm8319_vm15, %v8264_v54  ;;  %vm8324_vm0 = vnez %v8094_v17  ;;  %vm8325_vm15 = vnez %v8098_v22  ;;  %v1048_v17 = vld [vmem:[#allocation2] sm:$0xff] }
 0x10b   : > { %4461 = vmatprep.mubr.msk.bf16.mxu1 %vm8320_vm5, %v8264_v54  ;;  %vm8326_vm5 = vnez %v8102_v24 }
 0x111   : > { %4399 = vmatmul.mubr.msk.bf16.gmra.mrb[72].mxu0 %vm8321_vm3, %v8264_v54  ;;  %vm8327_vm3 = vnez %v8106_v25 }
 0x112   : > { %4463 = vmatmul.mubr.msk.bf16.gmra.mrb[72].mxu1 %vm8322_vm6, %v8264_v54  ;;  %4401 = vmatprep.mubr.msk.bf16.mxu0 %vm8323_vm1, %v8264_v54  ;;  %vm8328_vm6 = vnez %v8110_v26  ;;  %vm8329_vm1 = vnez %v8114_v28  ;;  %v1049_v28 = vld [vmem:[#allocation2 + $0x8] sm:$0xff] }
 0x113   : > { %4465 = vmatprep.mubr.msk.bf16.mxu1 %vm8324_vm0, %v8264_v54  ;;  %vm8330_vm0 = vnez %v8118_v30 }
 0x119   : > { %4403 = vmatmul.mubr.msk.bf16.gmra.mrb[76].mxu0 %vm8325_vm15, %v8264_v54  ;;  %vm8331_vm15 = vnez %v8122_v32 }
 0x11a   : > { %4467 = vmatmul.mubr.msk.bf16.gmra.mrb[76].mxu1 %vm8326_vm5, %v8264_v54  ;;  %4405 = vmatprep.mubr.msk.bf16.mxu0 %vm8327_vm3, %v8264_v54  ;;  %vm8332_vm5 = vnez %v8126_v34  ;;  %vm8333_vm3 = vnez %v8130_v35 }
 0x11b   : > { %4469 = vmatprep.mubr.msk.bf16.mxu1 %vm8328_vm6, %v8264_v54  ;;  %vm8334_vm6 = vnez %v8134_v37 }
 0x121   : > { %4407 = vmatmul.mubr.msk.bf16.gmra.mrb[80].mxu0 %vm8329_vm1, %v8264_v54  ;;  %vm8335_vm1 = vnez %v8138_v38 }
 0x122   : > { %4471 = vmatmul.mubr.msk.bf16.gmra.mrb[80].mxu1 %vm8330_vm0, %v8264_v54  ;;  %4409 = vmatprep.mubr.msk.bf16.mxu0 %vm8331_vm15, %v8264_v54  ;;  %vm8337_vm0 = vnez %v8336_v49  ;;  %vm8339_vm15 = vnez %v8338_v50 }
 0x123   : > { %4473 = vmatprep.mubr.msk.bf16.mxu1 %vm8332_vm5, %v8264_v54  ;;  %vm8341_vm5 = vnez %v8340_v52  ;;  %v1053_v52 = vld [vmem:[#allocation2 + $0x28] sm:$0xff] }
 0x129   : > { %4411 = vmatmul.mubr.msk.bf16.gmra.mrb[84].mxu0 %vm8333_vm3, %v8264_v54  ;;  %vm8343_vm3 = vnez %v8342_v53 }
 0x12a   : > { %4475 = vmatmul.mubr.msk.bf16.gmra.mrb[84].mxu1 %vm8334_vm6, %v8264_v54  ;;  %4413 = vmatprep.mubr.msk.bf16.mxu0 %vm8335_vm1, %v8264_v54  ;;  %vm8345_vm6 = vnez %v8344_v56  ;;  %vm8346_vm1 = vnez %v8209_v8 }
 0x12b   : > { %4477 = vmatprep.mubr.msk.bf16.mxu1 %vm8337_vm0, %v8264_v54  ;;  %vm8347_vm0 = vnez %v8215_v10 }
 0x131   : > { %4415 = vmatmul.mubr.msk.bf16.gmra.mrb[88].mxu0 %vm8339_vm15, %v8264_v54  ;;  %vm8348_vm15 = vnez %v8217_v11 }
 0x132   : > { %4479 = vmatmul.mubr.msk.bf16.gmra.mrb[88].mxu1 %vm8341_vm5, %v8264_v54  ;;  %4417 = vmatprep.mubr.msk.bf16.mxu0 %vm8343_vm3, %v8264_v54  ;;  %vm8349_vm5 = vnez %v8223_v33  ;;  %vm8350_vm3 = vnez %v8155_v42 }
 0x133   : > { %4481 = vmatprep.mubr.msk.bf16.mxu1 %vm8345_vm6, %v8264_v54  ;;  %vm8351_vm6 = vnez %v8159_v43 }
 0x139   : > { %4419 = vmatmul.mubr.msk.bf16.gmra.mrb[92].mxu0 %vm8346_vm1, %v8264_v54  ;;  %vm8359_vm1 = vnez %v8232_v39 }
 0x13a   : > { %4483 = vmatmul.mubr.msk.bf16.gmra.mrb[92].mxu1 %vm8347_vm0, %v8264_v54  ;;  %4421 = vmatprep.mubr.msk.bf16.mxu0 %vm8348_vm15, %v8264_v54  ;;  %vm8360_vm0 = vnez %v8238_v14  ;;  %vm8361_vm15 = vnez %v8243_v18 }
 0x13b   : > { %4485 = vmatprep.mubr.msk.bf16.mxu1 %vm8349_vm5, %v8264_v54  ;;  %vm8362_vm5 = vnez %v8247_v55 }
 0x141   : > { %4423 = vmatmul.mubr.msk.bf16.gmra.mrb[96].mxu0 %vm7063_vm4, %v8264_v54  ;;  %vm8352_vm4 = vnez %v8166_v45  ;;  %v1050_v45 = vld [vmem:[#allocation2 + $0x10] sm:$0xff] }
 0x142   : > { %4487 = vmatmul.mubr.msk.bf16.gmra.mrb[96].mxu1 %vm7067_vm8, %v8264_v54  ;;  %4425 = vmatprep.mubr.msk.bf16.mxu0 %vm8289_vm12, %v8264_v54  ;;  %vm8353_vm8 = vnez %v8199_v5  ;;  %vm8354_vm12 = vnez %v8203_v6 }
 0x143   : > { %4489 = vmatprep.mubr.msk.bf16.mxu1 %vm8290_vm13, %v8264_v54  ;;  %vm1690_vm13 = vcmask 261120  }
 0x149   : > { %4427 = vmatmul.mubr.msk.bf16.gmra.mrb[100].mxu0 %vm8350_vm3, %v8264_v54  ;;  %vm8363_vm3 = vnez %v8251_v51 }
 0x14a   : > { %4491 = vmatmul.mubr.msk.bf16.gmra.mrb[100].mxu1 %vm8351_vm6, %v8264_v54  ;;  %4429 = vmatprep.mubr.msk.bf16.mxu0 %vm8352_vm4, %v8264_v54  ;;  %vm8366_vm6 = vnez %v8272_v21  ;;  %vm8367_vm4 = vnez %v8276_v46 }
 0x14b   : > { %4493 = vmatprep.mubr.msk.bf16.mxu1 %vm8294_vm14, %v8264_v54  ;;  %vm8356_vm14 = vnez %v8213_v9 }
 0x14f   : > { %v4626_v57 = vpop.f32.mrb[0].mxu0 }
 0x150   : > { %v4738_v58 = vpop.f32.mrb[0].mxu1  ;;  %v4627_v59 = vpop.f32.mrb[1].mxu0 }
 0x151   : > { %4431 = vmatmul.mubr.msk.bf16.gmra.mrb[104].mxu0 %vm8295_vm11, %v8264_v54  ;;  %v4628_v60 = vadd.f32 %v4627_v59, %v4626_v57  ;;  %v4739_v61 = vpop.f32.mrb[1].mxu1  ;;  %v4629_v62 = vpop.f32.mrb[2].mxu0  ;;  %vm8357_vm11 = vnez %v8221_v12 }
 0x152   : > { %4495 = vmatmul.mubr.msk.bf16.gmra.mrb[104].mxu1 %vm8296_vm9, %v8264_v54  ;;  %4433 = vmatprep.mubr.msk.bf16.mxu0 %vm8297_vm10, %v8264_v54  ;;  %v4740_v13 = vadd.f32 %v4739_v61, %v4738_v58  ;;  %v4741_v15 = vpop.f32.mrb[2].mxu1  ;;  %v4630_v16 = vpop.f32.mrb[3].mxu0  ;;  %vm8355_vm10 = vnez %v8207_v7  ;;  %vm8358_vm9 = vnez %v8227_v36 }
 0x153   : > { %4497 = vmatprep.mubr.msk.bf16.mxu1 %vm8353_vm8, %v8264_v54  ;;  %v4631_v22 = vadd.f32 %v4630_v16, %v4629_v62  ;;  %v4742_v24 = vpop.f32.mrb[3].mxu1  ;;  %vm8368_vm8 = vnez %v8280_v23 }
 0x154   : > { %v1532_v25 = vadd.f32 %v4740_v13, %v4628_v60  ;;  %v4743_v26 = vadd.f32 %v4742_v24, %v4741_v15  ;;  %v1054_v15 = vld [vmem:[#allocation2 + $0x30] sm:$0xff]  ;;  %v1055_v24 = vld [vmem:[#allocation2 + $0x38] sm:$0xff] }
 0x156   : > { %v1658_v29 = vadd.f32 %v1532_v25, %v1048_v17  ;;  %v1535_v30 = vadd.f32 %v4743_v26, %v4631_v22 }
 0x157   : > { %v4632_v31 = vpop.f32.mrb[4].mxu0 }
 0x158   : > { %1691 = vst.msk [vmem:[#allocation2] sm:$0xff] %vm1690_vm13, %v1658_v29  ;;  %v1659_v32 = vadd.f32 %v1535_v30, %v1049_v28  ;;  %v4744_v34 = vpop.f32.mrb[4].mxu1  ;;  %v4633_v35 = vpop.f32.mrb[5].mxu0 }
 0x159   : > { %4435 = vmatmul.mubr.msk.bf16.gmra.mrb[108].mxu0 %vm8354_vm12, %v8264_v54  ;;  %v4634_v37 = vadd.f32 %v4633_v35, %v4632_v31  ;;  %v4745_v38 = vpop.f32.mrb[5].mxu1  ;;  %v4635_v40 = vpop.f32.mrb[6].mxu0  ;;  %vm8369_vm12 = vnez %v8284_v47 }
 0x15a   : > { %4499 = vmatmul.mubr.msk.bf16.gmra.mrb[108].mxu1 %vm8355_vm10, %v8264_v54  ;;  %4437 = vmatprep.mubr.msk.bf16.mxu0 %vm8356_vm14, %v8264_v54  ;;  %1692 = vst.msk [vmem:[#allocation2 + $0x8] sm:$0xff] %vm1690_vm13, %v1659_v32  ;;  %v4746_v41 = vadd.f32 %v4745_v38, %v4744_v34  ;;  %v4747_v42 = vpop.f32.mrb[6].mxu1  ;;  %v4636_v43 = vpop.f32.mrb[7].mxu0  ;;  %vm2109_vm10 = vcmask 7168  }
 0x15b   : > { %4501 = vmatprep.mubr.msk.bf16.mxu1 %vm8357_vm11, %v8264_v54  ;;  %v4637_v63 = vadd.f32 %v4636_v43, %v4635_v40  ;;  %v4748_v2 = vpop.f32.mrb[7].mxu1 }
 0x15c   : > { %v1540_v3 = vadd.f32 %v4746_v41, %v4634_v37  ;;  %v4749_v27 = vadd.f32 %v4748_v2, %v4747_v42  ;;  %v1056_v37 = vld [vmem:[#allocation2 + $0x40] sm:$0xff]  ;;  %v1057_v42 = vld [vmem:[#allocation2 + $0x48] sm:$0xff] }
 0x15e   : > { %v1660_v5 = vadd.f32 %v1540_v3, %v1050_v45  ;;  %v1543_v6 = vadd.f32 %v4749_v27, %v4637_v63 }
 0x15f   : > { %v4638_v7 = vpop.f32.mrb[8].mxu0 }
 0x160   : > { %1693 = vst.msk [vmem:[#allocation2 + $0x10] sm:$0xff] %vm1690_vm13, %v1660_v5  ;;  %v1661_v8 = vadd.f32 %v1543_v6, %v1051_v4  ;;  %v4750_v9 = vpop.f32.mrb[8].mxu1  ;;  %v4639_v10 = vpop.f32.mrb[9].mxu0 }
 0x161   : > { %4439 = vmatmul.mubr.msk.bf16.gmra.mrb[112].mxu0 %vm8358_vm9, %v8264_v54  ;;  %v4640_v11 = vadd.f32 %v4639_v10, %v4638_v7  ;;  %v4751_v12 = vpop.f32.mrb[9].mxu1  ;;  %v4641_v39 = vpop.f32.mrb[10].mxu0 }
 0x162   : > { %4503 = vmatmul.mubr.msk.bf16.gmra.mrb[112].mxu1 %vm8359_vm1, %v8264_v54  ;;  %4441 = vmatprep.mubr.msk.bf16.mxu0 %vm8360_vm0, %v8264_v54  ;;  %1694 = vst.msk [vmem:[#allocation2 + $0x18] sm:$0xff] %vm1690_vm13, %v1661_v8  ;;  %v4752_v33 = vadd.f32 %v4751_v12, %v4750_v9  ;;  %v4753_v36 = vpop.f32.mrb[10].mxu1  ;;  %v4642_v14 = vpop.f32.mrb[11].mxu0  ;;  %v1058_v9 = vld [vmem:[#allocation2 + $0x50] sm:$0xff]  ;;  %v1059_v12 = vld [vmem:[#allocation2 + $0x58] sm:$0xff] }
 0x163   : > { %4505 = vmatprep.mubr.msk.bf16.mxu1 %vm8361_vm15, %v8264_v54  ;;  %v4643_v48 = vadd.f32 %v4642_v14, %v4641_v39  ;;  %v4754_v49 = vpop.f32.mrb[11].mxu1 }
 0x164   : > { %v1548_v50 = vadd.f32 %v4752_v33, %v4640_v11  ;;  %v4755_v18 = vadd.f32 %v4754_v49, %v4753_v36 }
 0x166   : > { %v1662_v53 = vadd.f32 %v1548_v50, %v1052_v1  ;;  %v1551_v56 = vadd.f32 %v4755_v18, %v4643_v48 }
 0x167   : > { %v4644_v57 = vpop.f32.mrb[12].mxu0 }
 0x168   : > { %1695 = vst.msk [vmem:[#allocation2 + $0x20] sm:$0xff] %vm1690_vm13, %v1662_v53  ;;  %v1663_v55 = vadd.f32 %v1551_v56, %v1053_v52  ;;  %v4756_v58 = vpop.f32.mrb[12].mxu1  ;;  %v4645_v59 = vpop.f32.mrb[13].mxu0 }
 0x169   : > { %4443 = vmatmul.mubr.msk.bf16.gmra.mrb[116].mxu0 %vm8362_vm5, %v8264_v54  ;;  %v4646_v60 = vadd.f32 %v4645_v59, %v4644_v57  ;;  %v4757_v61 = vpop.f32.mrb[13].mxu1  ;;  %v4647_v51 = vpop.f32.mrb[14].mxu0  ;;  %v1060_v57 = vld [vmem:[#allocation2 + $0x60] sm:$0xff] }
 0x16a   : > { %4507 = vmatmul.mubr.msk.bf16.gmra.mrb[116].mxu1 %vm8363_vm3, %v8264_v54  ;;  %4445 = vmatprep.mubr.msk.bf16.mxu0 %vm8305_vm2, %v8264_v54  ;;  %1696 = vst.msk [vmem:[#allocation2 + $0x28] sm:$0xff] %vm1690_vm13, %v1663_v55  ;;  %v4758_v62 = vadd.f32 %v4757_v61, %v4756_v58  ;;  %v4759_v0 = vpop.f32.mrb[14].mxu1  ;;  %v4648_v13 = vpop.f32.mrb[15].mxu0  ;;  %vm8364_vm2 = vnez %v8263_v20  ;;  %v1061_v61 = vld [vmem:[#allocation2 + $0x68] sm:$0xff] }
 0x16b   : > { %4509 = vmatprep.mubr.msk.bf16.mxu1 %vm8306_vm7, %v8264_v54  ;;  %v4649_v16 = vadd.f32 %v4648_v13, %v4647_v51  ;;  %v4760_v17 = vpop.f32.mrb[15].mxu1  ;;  %vm8365_vm7 = vnez %v8268_v44 }
 0x16c   : > { %v1556_v22 = vadd.f32 %v4758_v62, %v4646_v60  ;;  %v4761_v19 = vadd.f32 %v4760_v17, %v4759_v0 }
 0x16e   : > { %v1664_v25 = vadd.f32 %v1556_v22, %v1054_v15  ;;  %v1559_v26 = vadd.f32 %v4761_v19, %v4649_v16 }
 0x16f   : > { %v4650_v28 = vpop.f32.mrb[16].mxu0 }
 0x170   : > { %1697 = vst.msk [vmem:[#allocation2 + $0x30] sm:$0xff] %vm1690_vm13, %v1664_v25  ;;  %v1665_v20 = vadd.f32 %v1559_v26, %v1055_v24  ;;  %v4762_v29 = vpop.f32.mrb[16].mxu1  ;;  %v4651_v30 = vpop.f32.mrb[17].mxu0 }
 0x171   : > { %4447 = vmatmul.mubr.msk.bf16.gmra.mrb[120].mxu0 %vm8364_vm2, %v8264_v54  ;;  %v4652_v31 = vadd.f32 %v4651_v30, %v4650_v28  ;;  %v4763_v32 = vpop.f32.mrb[17].mxu1  ;;  %v4653_v44 = vpop.f32.mrb[18].mxu0  ;;  %v1062_v28 = vld [vmem:[#allocation2 + $0x70] sm:$0xff] }
 0x172   : > { %4511 = vmatmul.mubr.msk.bf16.gmra.mrb[120].mxu1 %vm8365_vm7, %v8264_v54  ;;  %4449 = vmatprep.mubr.msk.bf16.mxu0 %vm8366_vm6, %v8264_v54  ;;  %1698 = vst.msk [vmem:[#allocation2 + $0x38] sm:$0xff] %vm1690_vm13, %v1665_v20  ;;  %v4764_v34 = vadd.f32 %v4763_v32, %v4762_v29  ;;  %v4765_v21 = vpop.f32.mrb[18].mxu1  ;;  %v4654_v35 = vpop.f32.mrb[19].mxu0  ;;  %v1063_v32 = vld [vmem:[#allocation2 + $0x78] sm:$0xff] }
 0x173   : > { %4513 = vmatprep.mubr.msk.bf16.mxu1 %vm8367_vm4, %v8264_v54  ;;  %v4655_v38 = vadd.f32 %v4654_v35, %v4653_v44  ;;  %v4766_v40 = vpop.f32.mrb[19].mxu1 }
 0x174   : > { %v1564_v41 = vadd.f32 %v4764_v34, %v4652_v31  ;;  %v4767_v46 = vadd.f32 %v4766_v40, %v4765_v21 }
 0x176   : > { %v1666_v43 = vadd.f32 %v1564_v41, %v1056_v37  ;;  %v1567_v45 = vadd.f32 %v4767_v46, %v4655_v38 }
 0x178   : > { %1699 = vst.msk [vmem:[#allocation2 + $0x40] sm:$0xff] %vm1690_vm13, %v1666_v43  ;;  %v1667_v2 = vadd.f32 %v1567_v45, %v1057_v42  ;;  %v4768_v3 = vpop.f32.mrb[20].mxu1 }
 0x179   : > { %4451 = vmatmul.mubr.msk.bf16.gmra.mrb[124].mxu0 %vm8368_vm8, %v8264_v54  ;;  %v4656_v63 = vpop.f32.mrb[20].mxu0  ;;  %v4769_v5 = vpop.f32.mrb[21].mxu1 }
 0x17a   : > { %4515 = vmatmul.mubr.msk.bf16.gmra.mrb[124].mxu1 %vm8369_vm12, %v8264_v54  ;;  %v4657_v27 = vpop.f32.mrb[21].mxu0  ;;  %1700 = vst.msk [vmem:[#allocation2 + $0x48] sm:$0xff] %vm1690_vm13, %v1667_v2  ;;  %v4770_v23 = vadd.f32 %v4769_v5, %v4768_v3  ;;  %v4771_v7 = vpop.f32.mrb[22].mxu1  ;;  %v1065_v5 = vld [vmem:[#allocation2 + $0x88] sm:$0xff] }
 0x17b   : > { %v4658_v4 = vadd.f32 %v4657_v27, %v4656_v63  ;;  %v4659_v6 = vpop.f32.mrb[22].mxu0  ;;  %v4772_v47 = vpop.f32.mrb[23].mxu1  ;;  %v1064_v63 = vld [vmem:[#allocation2 + $0x80] sm:$0xff] }
 0x17c   : > { %v4660_v8 = vpop.f32.mrb[23].mxu0  ;;  %v4773_v11 = vadd.f32 %v4772_v47, %v4771_v7 }
 0x17d   : > { %v4661_v10 = vadd.f32 %v4660_v8, %v4659_v6  ;;  %v1572_v54 = vadd.f32 %v4770_v23, %v4658_v4 }
 0x17f   : > { %v1668_v39 = vadd.f32 %v1572_v54, %v1058_v9  ;;  %v1575_v33 = vadd.f32 %v4773_v11, %v4661_v10 }
 0x181   : > { %1701 = vst.msk [vmem:[#allocation2 + $0x50] sm:$0xff] %vm1690_vm13, %v1668_v39  ;;  %v1669_v14 = vadd.f32 %v1575_v33, %v1059_v12 }
 0x182   : > { %v4662_v36 = vpop.f32.mrb[24].mxu0 }
 0x183   : > { %v4663_v48 = vpop.f32.mrb[25].mxu0  ;;  %1702 = vst.msk [vmem:[#allocation2 + $0x58] sm:$0xff] %vm1690_vm13, %v1669_v14 }
 0x184   : > { %v4774_v1 = vpop.f32.mrb[24].mxu1  ;;  %v4664_v49 = vadd.f32 %v4663_v48, %v4662_v36  ;;  %v4665_v18 = vpop.f32.mrb[26].mxu0  ;;  %v1066_v36 = vld [vmem:[#allocation2 + $0x90] sm:$0xff] }
 0x185   : > { %v4775_v50 = vpop.f32.mrb[25].mxu1  ;;  %v4666_v56 = vpop.f32.mrb[27].mxu0 }
 0x186   : > { %v4776_v52 = vadd.f32 %v4775_v50, %v4774_v1  ;;  %v4777_v53 = vpop.f32.mrb[26].mxu1  ;;  %v4667_v55 = vadd.f32 %v4666_v56, %v4665_v18  ;;  %v1067_v50 = vld [vmem:[#allocation2 + $0x98] sm:$0xff] }
 0x187   : > { %v4778_v58 = vpop.f32.mrb[27].mxu1 }
 0x188   : > { %v1580_v59 = vadd.f32 %v4776_v52, %v4664_v49  ;;  %v4779_v60 = vadd.f32 %v4778_v58, %v4777_v53 }
 0x18a   : > { %v1670_v51 = vadd.f32 %v1580_v59, %v1060_v57  ;;  %v1583_v62 = vadd.f32 %v4779_v60, %v4667_v55 }
 0x18c   : > { %v4668_v0 = vpop.f32.mrb[28].mxu0  ;;  %1703 = vst.msk [vmem:[#allocation2 + $0x60] sm:$0xff] %vm1690_vm13, %v1670_v51  ;;  %v1671_v13 = vadd.f32 %v1583_v62, %v1061_v61  ;;  %v4780_v15 = vpop.f32.mrb[28].mxu1 }
 0x18d   : > { %v4669_v16 = vpop.f32.mrb[29].mxu0  ;;  %v4781_v22 = vpop.f32.mrb[29].mxu1 }
 0x18e   : > { %v4670_v17 = vadd.f32 %v4669_v16, %v4668_v0  ;;  %v4671_v19 = vpop.f32.mrb[30].mxu0  ;;  %1704 = vst.msk [vmem:[#allocation2 + $0x68] sm:$0xff] %vm1690_vm13, %v1671_v13  ;;  %v4782_v24 = vadd.f32 %v4781_v22, %v4780_v15  ;;  %v4783_v25 = vpop.f32.mrb[30].mxu1  ;;  %v1068_v0 = vld [vmem:[#allocation2 + $0xa0] sm:$0xff]  ;;  %v1069_v22 = vld [vmem:[#allocation2 + $0xa8] sm:$0xff] }
 0x18f   : > { %v4672_v26 = vpop.f32.mrb[31].mxu0  ;;  %v4784_v29 = vpop.f32.mrb[31].mxu1 }
 0x190   : > { %v4673_v20 = vadd.f32 %v4672_v26, %v4671_v19  ;;  %v1588_v30 = vadd.f32 %v4782_v24, %v4670_v17  ;;  %v4785_v31 = vadd.f32 %v4784_v29, %v4783_v25 }
 0x192   : > { %v1672_v44 = vadd.f32 %v1588_v30, %v1062_v28  ;;  %v1591_v34 = vadd.f32 %v4785_v31, %v4673_v20 }
 0x194   : > { %v4674_v21 = vpop.f32.mrb[32].mxu0  ;;  %1705 = vst.msk [vmem:[#allocation2 + $0x70] sm:$0xff] %vm1690_vm13, %v1672_v44  ;;  %v1673_v35 = vadd.f32 %v1591_v34, %v1063_v32 }
 0x195   : > { %v4786_v37 = vpop.f32.mrb[32].mxu1  ;;  %v4675_v38 = vpop.f32.mrb[33].mxu0 }
 0x196   : > { %v4676_v40 = vadd.f32 %v4675_v38, %v4674_v21  ;;  %v4787_v41 = vpop.f32.mrb[33].mxu1  ;;  %v4677_v46 = vpop.f32.mrb[34].mxu0  ;;  %1706 = vst.msk [vmem:[#allocation2 + $0x78] sm:$0xff] %vm1690_vm13, %v1673_v35  ;;  %v1070_v21 = vld [vmem:[#allocation2 + $0xb0] sm:$0xff] }
 0x197   : > { %v4788_v42 = vadd.f32 %v4787_v41, %v4786_v37  ;;  %v4789_v43 = vpop.f32.mrb[34].mxu1  ;;  %v4678_v45 = vpop.f32.mrb[35].mxu0  ;;  %v1071_v41 = vld [vmem:[#allocation2 + $0xb8] sm:$0xff] }
 0x198   : > { %v4679_v2 = vadd.f32 %v4678_v45, %v4677_v46  ;;  %v4790_v3 = vpop.f32.mrb[35].mxu1 }
 0x199   : > { %v1596_v27 = vadd.f32 %v4788_v42, %v4676_v40  ;;  %v4791_v4 = vadd.f32 %v4790_v3, %v4789_v43 }
 0x19b   : > { %v1674_v6 = vadd.f32 %v1596_v27, %v1064_v63  ;;  %v1599_v23 = vadd.f32 %v4791_v4, %v4679_v2 }
 0x19c   : > { %v4680_v7 = vpop.f32.mrb[36].mxu0 }
 0x19d   : > { %1707 = vst.msk [vmem:[#allocation2 + $0x80] sm:$0xff] %vm1690_vm13, %v1674_v6  ;;  %v1675_v8 = vadd.f32 %v1599_v23, %v1065_v5  ;;  %v4792_v9 = vpop.f32.mrb[36].mxu1  ;;  %v4681_v10 = vpop.f32.mrb[37].mxu0 }
 0x19e   : > { %v4682_v47 = vadd.f32 %v4681_v10, %v4680_v7  ;;  %v4793_v54 = vpop.f32.mrb[37].mxu1  ;;  %v4683_v11 = vpop.f32.mrb[38].mxu0  ;;  %v1072_v7 = vld [vmem:[#allocation2 + $0xc0] sm:$0xff] }
 0x19f   : > { %1708 = vst.msk [vmem:[#allocation2 + $0x88] sm:$0xff] %vm1690_vm13, %v1675_v8  ;;  %v4794_v12 = vadd.f32 %v4793_v54, %v4792_v9  ;;  %v4795_v39 = vpop.f32.mrb[38].mxu1  ;;  %v4684_v33 = vpop.f32.mrb[39].mxu0  ;;  %v1073_v54 = vld [vmem:[#allocation2 + $0xc8] sm:$0xff] }
 0x1a0   : > { %v4685_v14 = vadd.f32 %v4684_v33, %v4683_v11  ;;  %v4796_v1 = vpop.f32.mrb[39].mxu1 }
 0x1a1   : > { %v1604_v48 = vadd.f32 %v4794_v12, %v4682_v47  ;;  %v4797_v49 = vadd.f32 %v4796_v1, %v4795_v39 }
 0x1a3   : > { %v1676_v18 = vadd.f32 %v1604_v48, %v1066_v36  ;;  %v1607_v52 = vadd.f32 %v4797_v49, %v4685_v14 }
 0x1a4   : > { %v4686_v53 = vpop.f32.mrb[40].mxu0 }
 0x1a5   : > { %1709 = vst.msk [vmem:[#allocation2 + $0x90] sm:$0xff] %vm1690_vm13, %v1676_v18  ;;  %v1677_v56 = vadd.f32 %v1607_v52, %v1067_v50  ;;  %v4798_v57 = vpop.f32.mrb[40].mxu1  ;;  %v4687_v55 = vpop.f32.mrb[41].mxu0 }
 0x1a6   : > { %v4688_v58 = vadd.f32 %v4687_v55, %v4686_v53  ;;  %v4799_v59 = vpop.f32.mrb[41].mxu1  ;;  %v4689_v60 = vpop.f32.mrb[42].mxu0  ;;  %v1074_v53 = vld [vmem:[#allocation2 + $0xd0] sm:$0xff] }
 0x1a7   : > { %1710 = vst.msk [vmem:[#allocation2 + $0x98] sm:$0xff] %vm1690_vm13, %v1677_v56  ;;  %v4800_v61 = vadd.f32 %v4799_v59, %v4798_v57  ;;  %v4801_v51 = vpop.f32.mrb[42].mxu1  ;;  %v4690_v62 = vpop.f32.mrb[43].mxu0  ;;  %v1075_v59 = vld [vmem:[#allocation2 + $0xd8] sm:$0xff] }
 0x1a8   : > { %v4691_v13 = vadd.f32 %v4690_v62, %v4689_v60  ;;  %v4802_v15 = vpop.f32.mrb[43].mxu1 }
 0x1a9   : > { %v1612_v16 = vadd.f32 %v4800_v61, %v4688_v58  ;;  %v4803_v17 = vadd.f32 %v4802_v15, %v4801_v51 }
 0x1ab   : > { %v1678_v19 = vadd.f32 %v1612_v16, %v1068_v0  ;;  %v1615_v24 = vadd.f32 %v4803_v17, %v4691_v13 }
 0x1ac   : > { %v4692_v25 = vpop.f32.mrb[44].mxu0 }
 0x1ad   : > { %1711 = vst.msk [vmem:[#allocation2 + $0xa0] sm:$0xff] %vm1690_vm13, %v1678_v19  ;;  %v1679_v26 = vadd.f32 %v1615_v24, %v1069_v22  ;;  %v4804_v28 = vpop.f32.mrb[44].mxu1  ;;  %v4693_v20 = vpop.f32.mrb[45].mxu0 }
 0x1ae   : > { %v4694_v29 = vadd.f32 %v4693_v20, %v4692_v25  ;;  %v4805_v30 = vpop.f32.mrb[45].mxu1  ;;  %v4695_v31 = vpop.f32.mrb[46].mxu0  ;;  %v1076_v25 = vld [vmem:[#allocation2 + $0xe0] sm:$0xff] }
 0x1af   : > { %1712 = vst.msk [vmem:[#allocation2 + $0xa8] sm:$0xff] %vm1690_vm13, %v1679_v26  ;;  %v4806_v32 = vadd.f32 %v4805_v30, %v4804_v28  ;;  %v4807_v44 = vpop.f32.mrb[46].mxu1  ;;  %v4696_v34 = vpop.f32.mrb[47].mxu0  ;;  %v1077_v30 = vld [vmem:[#allocation2 + $0xe8] sm:$0xff] }
 0x1b0   : > { %v4697_v35 = vadd.f32 %v4696_v34, %v4695_v31  ;;  %v4808_v37 = vpop.f32.mrb[47].mxu1 }
 0x1b1   : > { %v1620_v38 = vadd.f32 %v4806_v32, %v4694_v29  ;;  %v4809_v40 = vadd.f32 %v4808_v37, %v4807_v44 }
 0x1b3   : > { %v1680_v46 = vadd.f32 %v1620_v38, %v1070_v21  ;;  %v1623_v42 = vadd.f32 %v4809_v40, %v4697_v35 }
 0x1b4   : > { %v4698_v43 = vpop.f32.mrb[48].mxu0 }
 0x1b5   : > { %1713 = vst.msk [vmem:[#allocation2 + $0xb0] sm:$0xff] %vm1690_vm13, %v1680_v46  ;;  %v1681_v45 = vadd.f32 %v1623_v42, %v1071_v41  ;;  %v4810_v63 = vpop.f32.mrb[48].mxu1  ;;  %v4699_v2 = vpop.f32.mrb[49].mxu0 }
 0x1b6   : > { %v4700_v3 = vadd.f32 %v4699_v2, %v4698_v43  ;;  %v4811_v27 = vpop.f32.mrb[49].mxu1  ;;  %v4701_v4 = vpop.f32.mrb[50].mxu0  ;;  %v1078_v43 = vld [vmem:[#allocation2 + $0xf0] sm:$0xff] }
 0x1b7   : > { %1714 = vst.msk [vmem:[#allocation2 + $0xb8] sm:$0xff] %vm1690_vm13, %v1681_v45  ;;  %v4812_v5 = vadd.f32 %v4811_v27, %v4810_v63  ;;  %v4813_v6 = vpop.f32.mrb[50].mxu1  ;;  %v4702_v23 = vpop.f32.mrb[51].mxu0  ;;  %v1079_v27 = vld [vmem:[#allocation2 + $0xf8] sm:$0xff] }
 0x1b8   : > { %v4703_v8 = vadd.f32 %v4702_v23, %v4701_v4  ;;  %v4814_v9 = vpop.f32.mrb[51].mxu1 }
 0x1b9   : > { %v1628_v10 = vadd.f32 %v4812_v5, %v4700_v3  ;;  %v4815_v47 = vadd.f32 %v4814_v9, %v4813_v6 }
 0x1bb   : > { %v1682_v11 = vadd.f32 %v1628_v10, %v1072_v7  ;;  %v1631_v12 = vadd.f32 %v4815_v47, %v4703_v8 }
 0x1bc   : > { %v4704_v39 = vpop.f32.mrb[52].mxu0 }
 0x1bd   : > { %1715 = vst.msk [vmem:[#allocation2 + $0xc0] sm:$0xff] %vm1690_vm13, %v1682_v11  ;;  %v1683_v33 = vadd.f32 %v1631_v12, %v1073_v54  ;;  %v4816_v36 = vpop.f32.mrb[52].mxu1  ;;  %v4705_v14 = vpop.f32.mrb[53].mxu0 }
 0x1be   : > { %v4706_v1 = vadd.f32 %v4705_v14, %v4704_v39  ;;  %v4817_v48 = vpop.f32.mrb[53].mxu1  ;;  %v4707_v49 = vpop.f32.mrb[54].mxu0  ;;  %v1723_v39 = vld [vmem:[#allocation3] sm:$0xff] }
 0x1bf   : > { %1716 = vst.msk [vmem:[#allocation2 + $0xc8] sm:$0xff] %vm1690_vm13, %v1683_v33  ;;  %v4818_v50 = vadd.f32 %v4817_v48, %v4816_v36  ;;  %v4819_v18 = vpop.f32.mrb[54].mxu1  ;;  %v4708_v52 = vpop.f32.mrb[55].mxu0  ;;  %v1724_v48 = vld [vmem:[#allocation3 + $0x8] sm:$0xff] }
 0x1c0   : > { %v4709_v56 = vadd.f32 %v4708_v52, %v4707_v49  ;;  %v4820_v57 = vpop.f32.mrb[55].mxu1 }
 0x1c1   : > { %v1636_v55 = vadd.f32 %v4818_v50, %v4706_v1  ;;  %v4821_v58 = vadd.f32 %v4820_v57, %v4819_v18 }
 0x1c3   : > { %v1684_v60 = vadd.f32 %v1636_v55, %v1074_v53  ;;  %v1639_v61 = vadd.f32 %v4821_v58, %v4709_v56 }
 0x1c4   : > { %v4710_v51 = vpop.f32.mrb[56].mxu0 }
 0x1c5   : > { %1717 = vst.msk [vmem:[#allocation2 + $0xd0] sm:$0xff] %vm1690_vm13, %v1684_v60  ;;  %v1685_v62 = vadd.f32 %v1639_v61, %v1075_v59  ;;  %v4822_v0 = vpop.f32.mrb[56].mxu1  ;;  %v4711_v13 = vpop.f32.mrb[57].mxu0 }
 0x1c6   : > { %v4712_v15 = vadd.f32 %v4711_v13, %v4710_v51  ;;  %v4823_v16 = vpop.f32.mrb[57].mxu1  ;;  %v4713_v17 = vpop.f32.mrb[58].mxu0  ;;  %v1725_v51 = vld [vmem:[#allocation3 + $0x10] sm:$0xff] }
 0x1c7   : > { %1718 = vst.msk [vmem:[#allocation2 + $0xd8] sm:$0xff] %vm1690_vm13, %v1685_v62  ;;  %v4824_v22 = vadd.f32 %v4823_v16, %v4822_v0  ;;  %v4825_v19 = vpop.f32.mrb[58].mxu1  ;;  %v4714_v24 = vpop.f32.mrb[59].mxu0  ;;  %v1726_v16 = vld [vmem:[#allocation3 + $0x18] sm:$0xff] }
 0x1c8   : > { %v4715_v26 = vadd.f32 %v4714_v24, %v4713_v17  ;;  %v4826_v28 = vpop.f32.mrb[59].mxu1 }
 0x1c9   : > { %v1644_v20 = vadd.f32 %v4824_v22, %v4712_v15  ;;  %v4827_v29 = vadd.f32 %v4826_v28, %v4825_v19 }
 0x1cb   : > { %v1686_v31 = vadd.f32 %v1644_v20, %v1076_v25  ;;  %v1647_v32 = vadd.f32 %v4827_v29, %v4715_v26 }
 0x1cc   : > { %v4716_v44 = vpop.f32.mrb[60].mxu0 }
 0x1cd   : > { %1719 = vst.msk [vmem:[#allocation2 + $0xe0] sm:$0xff] %vm1690_vm13, %v1686_v31  ;;  %v1687_v34 = vadd.f32 %v1647_v32, %v1077_v30  ;;  %v4828_v21 = vpop.f32.mrb[60].mxu1  ;;  %v4717_v35 = vpop.f32.mrb[61].mxu0 }
 0x1ce   : > { %v4718_v37 = vadd.f32 %v4717_v35, %v4716_v44  ;;  %v4829_v38 = vpop.f32.mrb[61].mxu1  ;;  %v4719_v40 = vpop.f32.mrb[62].mxu0  ;;  %v1727_v44 = vld [vmem:[#allocation3 + $0x20] sm:$0xff] }
 0x1cf   : > { %1720 = vst.msk [vmem:[#allocation2 + $0xe8] sm:$0xff] %vm1690_vm13, %v1687_v34  ;;  %v4830_v41 = vadd.f32 %v4829_v38, %v4828_v21  ;;  %v4831_v46 = vpop.f32.mrb[62].mxu1  ;;  %v4720_v42 = vpop.f32.mrb[63].mxu0  ;;  %v1728_v38 = vld [vmem:[#allocation3 + $0x28] sm:$0xff] }
 0x1d0   : > { %v4721_v45 = vadd.f32 %v4720_v42, %v4719_v40  ;;  %v4832_v63 = vpop.f32.mrb[63].mxu1 }
 0x1d1   : > { %v1652_v2 = vadd.f32 %v4830_v41, %v4718_v37  ;;  %v4833_v3 = vadd.f32 %v4832_v63, %v4831_v46 }
 0x1d3   : > { %v1688_v4 = vadd.f32 %v1652_v2, %v1078_v43  ;;  %v1655_v5 = vadd.f32 %v4833_v3, %v4721_v45 }
 0x1d4   : > { %v4850_v6 = vpop.f32.mrb[64].mxu0 }
 0x1d5   : > { %1721 = vst.msk [vmem:[#allocation2 + $0xf0] sm:$0xff] %vm1690_vm13, %v1688_v4  ;;  %v1689_v23 = vadd.f32 %v1655_v5, %v1079_v27  ;;  %v4962_v7 = vpop.f32.mrb[64].mxu1  ;;  %v4851_v8 = vpop.f32.mrb[65].mxu0 }
 0x1d6   : > { %v4852_v9 = vadd.f32 %v4851_v8, %v4850_v6  ;;  %v4963_v10 = vpop.f32.mrb[65].mxu1  ;;  %v4853_v47 = vpop.f32.mrb[66].mxu0  ;;  %v1729_v6 = vld [vmem:[#allocation3 + $0x30] sm:$0xff] }
 0x1d7   : > { %1722 = vst.msk [vmem:[#allocation2 + $0xf8] sm:$0xff] %vm1690_vm13, %v1689_v23  ;;  %v4964_v54 = vadd.f32 %v4963_v10, %v4962_v7  ;;  %v4965_v11 = vpop.f32.mrb[66].mxu1  ;;  %v4854_v12 = vpop.f32.mrb[67].mxu0  ;;  %v1730_v10 = vld [vmem:[#allocation3 + $0x38] sm:$0xff] }
 0x1d8   : > { %v4855_v33 = vadd.f32 %v4854_v12, %v4853_v47  ;;  %v4966_v36 = vpop.f32.mrb[67].mxu1 }
 0x1d9   : > { %v1951_v14 = vadd.f32 %v4964_v54, %v4852_v9  ;;  %v4967_v1 = vadd.f32 %v4966_v36, %v4965_v11 }
 0x1db   : > { %v2077_v49 = vadd.f32 %v1951_v14, %v1723_v39  ;;  %v1954_v50 = vadd.f32 %v4967_v1, %v4855_v33 }
 0x1dc   : > { %v4856_v18 = vpop.f32.mrb[68].mxu0 }
 0x1dd   : > { %2110 = vst.msk [vmem:[#allocation3] sm:$0xff] %vm2109_vm10, %v2077_v49  ;;  %v2078_v52 = vadd.f32 %v1954_v50, %v1724_v48  ;;  %v4968_v53 = vpop.f32.mrb[68].mxu1  ;;  %v4857_v56 = vpop.f32.mrb[69].mxu0 }
 0x1de   : > { %v4858_v57 = vadd.f32 %v4857_v56, %v4856_v18  ;;  %v4969_v55 = vpop.f32.mrb[69].mxu1  ;;  %v4859_v58 = vpop.f32.mrb[70].mxu0  ;;  %v1731_v18 = vld [vmem:[#allocation3 + $0x40] sm:$0xff] }
 0x1df   : > { %2111 = vst.msk [vmem:[#allocation3 + $0x8] sm:$0xff] %vm2109_vm10, %v2078_v52  ;;  %v4970_v59 = vadd.f32 %v4969_v55, %v4968_v53  ;;  %v4971_v60 = vpop.f32.mrb[70].mxu1  ;;  %v4860_v61 = vpop.f32.mrb[71].mxu0  ;;  %v1732_v55 = vld [vmem:[#allocation3 + $0x48] sm:$0xff] }
 0x1e0   : > { %v4861_v62 = vadd.f32 %v4860_v61, %v4859_v58  ;;  %v4972_v0 = vpop.f32.mrb[71].mxu1 }
 0x1e1   : > { %v1959_v13 = vadd.f32 %v4970_v59, %v4858_v57  ;;  %v4973_v15 = vadd.f32 %v4972_v0, %v4971_v60 }
 0x1e3   : > { %v2079_v17 = vadd.f32 %v1959_v13, %v1725_v51  ;;  %v1962_v22 = vadd.f32 %v4973_v15, %v4861_v62 }
 0x1e4   : > { %v4862_v19 = vpop.f32.mrb[72].mxu0 }
 0x1e5   : > { %2112 = vst.msk [vmem:[#allocation3 + $0x10] sm:$0xff] %vm2109_vm10, %v2079_v17  ;;  %v2080_v24 = vadd.f32 %v1962_v22, %v1726_v16  ;;  %v4974_v25 = vpop.f32.mrb[72].mxu1  ;;  %v4863_v26 = vpop.f32.mrb[73].mxu0 }
 0x1e6   : > { %v4864_v28 = vadd.f32 %v4863_v26, %v4862_v19  ;;  %v4975_v20 = vpop.f32.mrb[73].mxu1  ;;  %v4865_v29 = vpop.f32.mrb[74].mxu0  ;;  %v1733_v19 = vld [vmem:[#allocation3 + $0x50] sm:$0xff] }
 0x1e7   : > { %2113 = vst.msk [vmem:[#allocation3 + $0x18] sm:$0xff] %vm2109_vm10, %v2080_v24  ;;  %v4976_v30 = vadd.f32 %v4975_v20, %v4974_v25  ;;  %v4977_v31 = vpop.f32.mrb[74].mxu1  ;;  %v4866_v32 = vpop.f32.mrb[75].mxu0  ;;  %v1734_v20 = vld [vmem:[#allocation3 + $0x58] sm:$0xff] }
 0x1e8   : > { %v4867_v34 = vadd.f32 %v4866_v32, %v4865_v29  ;;  %v4978_v21 = vpop.f32.mrb[75].mxu1 }
 0x1e9   : > { %v1967_v35 = vadd.f32 %v4976_v30, %v4864_v28  ;;  %v4979_v37 = vadd.f32 %v4978_v21, %v4977_v31 }
 0x1eb   : > { %v2081_v40 = vadd.f32 %v1967_v35, %v1727_v44  ;;  %v1970_v41 = vadd.f32 %v4979_v37, %v4867_v34 }
 0x1ec   : > { %v4868_v46 = vpop.f32.mrb[76].mxu0 }
 0x1ed   : > { %2114 = vst.msk [vmem:[#allocation3 + $0x20] sm:$0xff] %vm2109_vm10, %v2081_v40  ;;  %v2082_v42 = vadd.f32 %v1970_v41, %v1728_v38  ;;  %v4980_v43 = vpop.f32.mrb[76].mxu1  ;;  %v4869_v45 = vpop.f32.mrb[77].mxu0 }
 0x1ee   : > { %v4870_v63 = vadd.f32 %v4869_v45, %v4868_v46  ;;  %v4981_v2 = vpop.f32.mrb[77].mxu1  ;;  %v4871_v3 = vpop.f32.mrb[78].mxu0  ;;  %v1735_v46 = vld [vmem:[#allocation3 + $0x60] sm:$0xff] }
 0x1ef   : > { %2115 = vst.msk [vmem:[#allocation3 + $0x28] sm:$0xff] %vm2109_vm10, %v2082_v42  ;;  %v4982_v27 = vadd.f32 %v4981_v2, %v4980_v43  ;;  %v4983_v4 = vpop.f32.mrb[78].mxu1  ;;  %v4872_v5 = vpop.f32.mrb[79].mxu0  ;;  %v1736_v2 = vld [vmem:[#allocation3 + $0x68] sm:$0xff] }
 0x1f0   : > { %v4873_v23 = vadd.f32 %v4872_v5, %v4871_v3  ;;  %v4984_v7 = vpop.f32.mrb[79].mxu1 }
 0x1f1   : > { %v1975_v8 = vadd.f32 %v4982_v27, %v4870_v63  ;;  %v4985_v9 = vadd.f32 %v4984_v7, %v4983_v4 }
 0x1f3   : > { %v2083_v47 = vadd.f32 %v1975_v8, %v1729_v6  ;;  %v1978_v54 = vadd.f32 %v4985_v9, %v4873_v23 }
 0x1f4   : > { %v4874_v11 = vpop.f32.mrb[80].mxu0 }
 0x1f5   : > { %2116 = vst.msk [vmem:[#allocation3 + $0x30] sm:$0xff] %vm2109_vm10, %v2083_v47  ;;  %v2084_v12 = vadd.f32 %v1978_v54, %v1730_v10  ;;  %v4986_v39 = vpop.f32.mrb[80].mxu1  ;;  %v4875_v33 = vpop.f32.mrb[81].mxu0 }
 0x1f6   : > { %v4876_v36 = vadd.f32 %v4875_v33, %v4874_v11  ;;  %v4987_v14 = vpop.f32.mrb[81].mxu1  ;;  %v4877_v1 = vpop.f32.mrb[82].mxu0  ;;  %v1737_v11 = vld [vmem:[#allocation3 + $0x70] sm:$0xff] }
 0x1f7   : > { %2117 = vst.msk [vmem:[#allocation3 + $0x38] sm:$0xff] %vm2109_vm10, %v2084_v12  ;;  %v4988_v48 = vadd.f32 %v4987_v14, %v4986_v39  ;;  %v4989_v49 = vpop.f32.mrb[82].mxu1  ;;  %v4878_v50 = vpop.f32.mrb[83].mxu0  ;;  %v1738_v14 = vld [vmem:[#allocation3 + $0x78] sm:$0xff] }
 0x1f8   : > { %v4879_v52 = vadd.f32 %v4878_v50, %v4877_v1  ;;  %v4990_v53 = vpop.f32.mrb[83].mxu1 }
 0x1f9   : > { %v1983_v56 = vadd.f32 %v4988_v48, %v4876_v36  ;;  %v4991_v57 = vadd.f32 %v4990_v53, %v4989_v49 }
 0x1fb   : > { %v2085_v58 = vadd.f32 %v1983_v56, %v1731_v18  ;;  %v1986_v59 = vadd.f32 %v4991_v57, %v4879_v52 }
 0x1fc   : > { %v4880_v60 = vpop.f32.mrb[84].mxu0 }
 0x1fd   : > { %2118 = vst.msk [vmem:[#allocation3 + $0x40] sm:$0xff] %vm2109_vm10, %v2085_v58  ;;  %v2086_v61 = vadd.f32 %v1986_v59, %v1732_v55  ;;  %v4992_v51 = vpop.f32.mrb[84].mxu1  ;;  %v4881_v62 = vpop.f32.mrb[85].mxu0 }
 0x1fe   : > { %v4882_v0 = vadd.f32 %v4881_v62, %v4880_v60  ;;  %v4993_v13 = vpop.f32.mrb[85].mxu1  ;;  %v4883_v15 = vpop.f32.mrb[86].mxu0  ;;  %v1739_v60 = vld [vmem:[#allocation3 + $0x80] sm:$0xff] }
 0x1ff   : > { %2119 = vst.msk [vmem:[#allocation3 + $0x48] sm:$0xff] %vm2109_vm10, %v2086_v61  ;;  %v4994_v16 = vadd.f32 %v4993_v13, %v4992_v51  ;;  %v4995_v17 = vpop.f32.mrb[86].mxu1  ;;  %v4884_v22 = vpop.f32.mrb[87].mxu0  ;;  %v1740_v13 = vld [vmem:[#allocation3 + $0x88] sm:$0xff] }
 0x200   : > { %v4885_v24 = vadd.f32 %v4884_v22, %v4883_v15  ;;  %v4996_v25 = vpop.f32.mrb[87].mxu1 }
 0x201   : > { %v1991_v26 = vadd.f32 %v4994_v16, %v4882_v0  ;;  %v4997_v28 = vadd.f32 %v4996_v25, %v4995_v17 }
 0x203   : > { %v2087_v29 = vadd.f32 %v1991_v26, %v1733_v19  ;;  %v1994_v30 = vadd.f32 %v4997_v28, %v4885_v24 }
 0x204   : > { %v4886_v31 = vpop.f32.mrb[88].mxu0 }
 0x205   : > { %2120 = vst.msk [vmem:[#allocation3 + $0x50] sm:$0xff] %vm2109_vm10, %v2087_v29  ;;  %v2088_v32 = vadd.f32 %v1994_v30, %v1734_v20  ;;  %v4998_v44 = vpop.f32.mrb[88].mxu1  ;;  %v4887_v34 = vpop.f32.mrb[89].mxu0 }
 0x206   : > { %v4888_v21 = vadd.f32 %v4887_v34, %v4886_v31  ;;  %v4999_v35 = vpop.f32.mrb[89].mxu1  ;;  %v4889_v37 = vpop.f32.mrb[90].mxu0  ;;  %v1741_v31 = vld [vmem:[#allocation3 + $0x90] sm:$0xff] }
 0x207   : > { %2121 = vst.msk [vmem:[#allocation3 + $0x58] sm:$0xff] %vm2109_vm10, %v2088_v32  ;;  %v5000_v38 = vadd.f32 %v4999_v35, %v4998_v44  ;;  %v5001_v40 = vpop.f32.mrb[90].mxu1  ;;  %v4890_v41 = vpop.f32.mrb[91].mxu0  ;;  %v1742_v35 = vld [vmem:[#allocation3 + $0x98] sm:$0xff] }
 0x208   : > { %v4891_v42 = vadd.f32 %v4890_v41, %v4889_v37  ;;  %v5002_v43 = vpop.f32.mrb[91].mxu1 }
 0x209   : > { %v1999_v45 = vadd.f32 %v5000_v38, %v4888_v21  ;;  %v5003_v63 = vadd.f32 %v5002_v43, %v5001_v40 }
 0x20b   : > { %v2089_v3 = vadd.f32 %v1999_v45, %v1735_v46  ;;  %v2002_v27 = vadd.f32 %v5003_v63, %v4891_v42 }
 0x20c   : > { %v4892_v4 = vpop.f32.mrb[92].mxu0 }
 0x20d   : > { %2122 = vst.msk [vmem:[#allocation3 + $0x60] sm:$0xff] %vm2109_vm10, %v2089_v3  ;;  %v2090_v5 = vadd.f32 %v2002_v27, %v1736_v2  ;;  %v5004_v6 = vpop.f32.mrb[92].mxu1  ;;  %v4893_v23 = vpop.f32.mrb[93].mxu0 }
 0x20e   : > { %v4894_v7 = vadd.f32 %v4893_v23, %v4892_v4  ;;  %v5005_v8 = vpop.f32.mrb[93].mxu1  ;;  %v4895_v9 = vpop.f32.mrb[94].mxu0  ;;  %v1743_v4 = vld [vmem:[#allocation3 + $0xa0] sm:$0xff] }
 0x20f   : > { %2123 = vst.msk [vmem:[#allocation3 + $0x68] sm:$0xff] %vm2109_vm10, %v2090_v5  ;;  %v5006_v10 = vadd.f32 %v5005_v8, %v5004_v6  ;;  %v5007_v47 = vpop.f32.mrb[94].mxu1  ;;  %v4896_v54 = vpop.f32.mrb[95].mxu0  ;;  %v1744_v8 = vld [vmem:[#allocation3 + $0xa8] sm:$0xff] }
 0x210   : > { %v4897_v12 = vadd.f32 %v4896_v54, %v4895_v9  ;;  %v5008_v39 = vpop.f32.mrb[95].mxu1 }
 0x211   : > { %v2007_v33 = vadd.f32 %v5006_v10, %v4894_v7  ;;  %v5009_v36 = vadd.f32 %v5008_v39, %v5007_v47 }
 0x213   : > { %v2091_v1 = vadd.f32 %v2007_v33, %v1737_v11  ;;  %v2010_v48 = vadd.f32 %v5009_v36, %v4897_v12 }
 0x214   : > { %v4898_v49 = vpop.f32.mrb[96].mxu0 }
 0x215   : > { %2124 = vst.msk [vmem:[#allocation3 + $0x70] sm:$0xff] %vm2109_vm10, %v2091_v1  ;;  %v2092_v50 = vadd.f32 %v2010_v48, %v1738_v14  ;;  %v5010_v18 = vpop.f32.mrb[96].mxu1  ;;  %v4899_v52 = vpop.f32.mrb[97].mxu0 }
 0x216   : > { %v4900_v53 = vadd.f32 %v4899_v52, %v4898_v49  ;;  %v5011_v56 = vpop.f32.mrb[97].mxu1  ;;  %v4901_v57 = vpop.f32.mrb[98].mxu0  ;;  %v1745_v49 = vld [vmem:[#allocation3 + $0xb0] sm:$0xff] }
 0x217   : > { %2125 = vst.msk [vmem:[#allocation3 + $0x78] sm:$0xff] %vm2109_vm10, %v2092_v50  ;;  %v5012_v55 = vadd.f32 %v5011_v56, %v5010_v18  ;;  %v5013_v58 = vpop.f32.mrb[98].mxu1  ;;  %v4902_v59 = vpop.f32.mrb[99].mxu0  ;;  %v1746_v56 = vld [vmem:[#allocation3 + $0xb8] sm:$0xff] }
 0x218   : > { %v4903_v61 = vadd.f32 %v4902_v59, %v4901_v57  ;;  %v5014_v51 = vpop.f32.mrb[99].mxu1 }
 0x219   : > { %v2015_v62 = vadd.f32 %v5012_v55, %v4900_v53  ;;  %v5015_v0 = vadd.f32 %v5014_v51, %v5013_v58 }
 0x21b   : > { %v2093_v15 = vadd.f32 %v2015_v62, %v1739_v60  ;;  %v2018_v16 = vadd.f32 %v5015_v0, %v4903_v61 }
 0x21c   : > { %v4904_v17 = vpop.f32.mrb[100].mxu0 }
 0x21d   : > { %2126 = vst.msk [vmem:[#allocation3 + $0x80] sm:$0xff] %vm2109_vm10, %v2093_v15  ;;  %v2094_v22 = vadd.f32 %v2018_v16, %v1740_v13  ;;  %v5016_v19 = vpop.f32.mrb[100].mxu1  ;;  %v4905_v24 = vpop.f32.mrb[101].mxu0 }
 0x21e   : > { %v4906_v25 = vadd.f32 %v4905_v24, %v4904_v17  ;;  %v5017_v26 = vpop.f32.mrb[101].mxu1  ;;  %v4907_v28 = vpop.f32.mrb[102].mxu0  ;;  %v1747_v17 = vld [vmem:[#allocation3 + $0xc0] sm:$0xff] }
 0x21f   : > { %2127 = vst.msk [vmem:[#allocation3 + $0x88] sm:$0xff] %vm2109_vm10, %v2094_v22  ;;  %v5018_v20 = vadd.f32 %v5017_v26, %v5016_v19  ;;  %v5019_v29 = vpop.f32.mrb[102].mxu1  ;;  %v4908_v30 = vpop.f32.mrb[103].mxu0  ;;  %v1748_v26 = vld [vmem:[#allocation3 + $0xc8] sm:$0xff] }
 0x220   : > { %v4909_v32 = vadd.f32 %v4908_v30, %v4907_v28  ;;  %v5020_v44 = vpop.f32.mrb[103].mxu1 }
 0x221   : > { %v2023_v34 = vadd.f32 %v5018_v20, %v4906_v25  ;;  %v5021_v21 = vadd.f32 %v5020_v44, %v5019_v29 }
 0x223   : > { %v2095_v37 = vadd.f32 %v2023_v34, %v1741_v31  ;;  %v2026_v38 = vadd.f32 %v5021_v21, %v4909_v32 }
 0x224   : > { %v4910_v40 = vpop.f32.mrb[104].mxu0 }
 0x225   : > { %2128 = vst.msk [vmem:[#allocation3 + $0x90] sm:$0xff] %vm2109_vm10, %v2095_v37  ;;  %v2096_v41 = vadd.f32 %v2026_v38, %v1742_v35  ;;  %v5022_v46 = vpop.f32.mrb[104].mxu1  ;;  %v4911_v42 = vpop.f32.mrb[105].mxu0 }
 0x226   : > { %v4912_v43 = vadd.f32 %v4911_v42, %v4910_v40  ;;  %v5023_v45 = vpop.f32.mrb[105].mxu1  ;;  %v4913_v63 = vpop.f32.mrb[106].mxu0  ;;  %v1749_v40 = vld [vmem:[#allocation3 + $0xd0] sm:$0xff] }
 0x227   : > { %2129 = vst.msk [vmem:[#allocation3 + $0x98] sm:$0xff] %vm2109_vm10, %v2096_v41  ;;  %v5024_v2 = vadd.f32 %v5023_v45, %v5022_v46  ;;  %v5025_v3 = vpop.f32.mrb[106].mxu1  ;;  %v4914_v27 = vpop.f32.mrb[107].mxu0  ;;  %v1750_v45 = vld [vmem:[#allocation3 + $0xd8] sm:$0xff] }
 0x228   : > { %v4915_v5 = vadd.f32 %v4914_v27, %v4913_v63  ;;  %v5026_v6 = vpop.f32.mrb[107].mxu1 }
 0x229   : > { %v2031_v23 = vadd.f32 %v5024_v2, %v4912_v43  ;;  %v5027_v7 = vadd.f32 %v5026_v6, %v5025_v3 }
 0x22b   : > { %v2097_v9 = vadd.f32 %v2031_v23, %v1743_v4  ;;  %v2034_v10 = vadd.f32 %v5027_v7, %v4915_v5 }
 0x22c   : > { %v4916_v47 = vpop.f32.mrb[108].mxu0 }
 0x22d   : > { %2130 = vst.msk [vmem:[#allocation3 + $0xa0] sm:$0xff] %vm2109_vm10, %v2097_v9  ;;  %v2098_v54 = vadd.f32 %v2034_v10, %v1744_v8  ;;  %v5028_v11 = vpop.f32.mrb[108].mxu1  ;;  %v4917_v12 = vpop.f32.mrb[109].mxu0 }
 0x22e   : > { %v4918_v39 = vadd.f32 %v4917_v12, %v4916_v47  ;;  %v5029_v33 = vpop.f32.mrb[109].mxu1  ;;  %v4919_v36 = vpop.f32.mrb[110].mxu0  ;;  %v1751_v47 = vld [vmem:[#allocation3 + $0xe0] sm:$0xff] }
 0x22f   : > { %2131 = vst.msk [vmem:[#allocation3 + $0xa8] sm:$0xff] %vm2109_vm10, %v2098_v54  ;;  %v5030_v14 = vadd.f32 %v5029_v33, %v5028_v11  ;;  %v5031_v1 = vpop.f32.mrb[110].mxu1  ;;  %v4920_v48 = vpop.f32.mrb[111].mxu0  ;;  %v1752_v33 = vld [vmem:[#allocation3 + $0xe8] sm:$0xff] }
 0x230   : > { %v4921_v50 = vadd.f32 %v4920_v48, %v4919_v36  ;;  %v5032_v18 = vpop.f32.mrb[111].mxu1 }
 0x231   : > { %v2039_v52 = vadd.f32 %v5030_v14, %v4918_v39  ;;  %v5033_v53 = vadd.f32 %v5032_v18, %v5031_v1 }
 0x233   : > { %v2099_v57 = vadd.f32 %v2039_v52, %v1745_v49  ;;  %v2042_v55 = vadd.f32 %v5033_v53, %v4921_v50 }
 0x234   : > { %v4922_v58 = vpop.f32.mrb[112].mxu0 }
 0x235   : > { %2132 = vst.msk [vmem:[#allocation3 + $0xb0] sm:$0xff] %vm2109_vm10, %v2099_v57  ;;  %v2100_v59 = vadd.f32 %v2042_v55, %v1746_v56  ;;  %v5034_v60 = vpop.f32.mrb[112].mxu1  ;;  %v4923_v61 = vpop.f32.mrb[113].mxu0 }
 0x236   : > { %v4924_v51 = vadd.f32 %v4923_v61, %v4922_v58  ;;  %v5035_v62 = vpop.f32.mrb[113].mxu1  ;;  %v4925_v0 = vpop.f32.mrb[114].mxu0  ;;  %v1753_v58 = vld [vmem:[#allocation3 + $0xf0] sm:$0xff] }
 0x237   : > { %2133 = vst.msk [vmem:[#allocation3 + $0xb8] sm:$0xff] %vm2109_vm10, %v2100_v59  ;;  %v5036_v13 = vadd.f32 %v5035_v62, %v5034_v60  ;;  %v5037_v15 = vpop.f32.mrb[114].mxu1  ;;  %v4926_v16 = vpop.f32.mrb[115].mxu0  ;;  %v1754_v62 = vld [vmem:[#allocation3 + $0xf8] sm:$0xff] }
 0x238   : > { %v4927_v22 = vadd.f32 %v4926_v16, %v4925_v0  ;;  %v5038_v19 = vpop.f32.mrb[115].mxu1 }
 0x239   : > { %v2047_v24 = vadd.f32 %v5036_v13, %v4924_v51  ;;  %v5039_v25 = vadd.f32 %v5038_v19, %v5037_v15 }
 0x23b   : > { %v2101_v28 = vadd.f32 %v2047_v24, %v1747_v17  ;;  %v2050_v20 = vadd.f32 %v5039_v25, %v4927_v22 }
 0x23c   : > { %v4928_v29 = vpop.f32.mrb[116].mxu0 }
 0x23d   : > { %2134 = vst.msk [vmem:[#allocation3 + $0xc0] sm:$0xff] %vm2109_vm10, %v2101_v28  ;;  %v2102_v30 = vadd.f32 %v2050_v20, %v1748_v26  ;;  %v5040_v31 = vpop.f32.mrb[116].mxu1  ;;  %v4929_v32 = vpop.f32.mrb[117].mxu0 }
 0x23e   : > { %v4930_v44 = vadd.f32 %v4929_v32, %v4928_v29  ;;  %v5041_v34 = vpop.f32.mrb[117].mxu1  ;;  %v4931_v21 = vpop.f32.mrb[118].mxu0 }
 0x23f   : > { %2135 = vst.msk [vmem:[#allocation3 + $0xc8] sm:$0xff] %vm2109_vm10, %v2102_v30  ;;  %v5042_v35 = vadd.f32 %v5041_v34, %v5040_v31  ;;  %v5043_v37 = vpop.f32.mrb[118].mxu1  ;;  %v4932_v38 = vpop.f32.mrb[119].mxu0 }
 0x240   : > { %v4933_v41 = vadd.f32 %v4932_v38, %v4931_v21  ;;  %v5044_v46 = vpop.f32.mrb[119].mxu1 }
 0x241   : > { %v2055_v42 = vadd.f32 %v5042_v35, %v4930_v44  ;;  %v5045_v43 = vadd.f32 %v5044_v46, %v5043_v37 }
 0x243   : > { %v2103_v63 = vadd.f32 %v2055_v42, %v1749_v40  ;;  %v2058_v2 = vadd.f32 %v5045_v43, %v4933_v41 }
 0x244   : > { %v4934_v3 = vpop.f32.mrb[120].mxu0 }
 0x245   : > { %2136 = vst.msk [vmem:[#allocation3 + $0xd0] sm:$0xff] %vm2109_vm10, %v2103_v63  ;;  %v2104_v27 = vadd.f32 %v2058_v2, %v1750_v45  ;;  %v5046_v4 = vpop.f32.mrb[120].mxu1  ;;  %v4935_v5 = vpop.f32.mrb[121].mxu0 }
 0x246   : > { %v4936_v6 = vadd.f32 %v4935_v5, %v4934_v3  ;;  %v5047_v23 = vpop.f32.mrb[121].mxu1  ;;  %v4937_v7 = vpop.f32.mrb[122].mxu0 }
 0x247   : > { %2137 = vst.msk [vmem:[#allocation3 + $0xd8] sm:$0xff] %vm2109_vm10, %v2104_v27  ;;  %v5048_v8 = vadd.f32 %v5047_v23, %v5046_v4  ;;  %v5049_v9 = vpop.f32.mrb[122].mxu1  ;;  %v4938_v10 = vpop.f32.mrb[123].mxu0 }
 0x248   : > { %v4939_v54 = vadd.f32 %v4938_v10, %v4937_v7  ;;  %v5050_v11 = vpop.f32.mrb[123].mxu1 }
 0x249   : > { %v2063_v12 = vadd.f32 %v5048_v8, %v4936_v6  ;;  %v5051_v39 = vadd.f32 %v5050_v11, %v5049_v9 }
 0x24b   : > { %v2105_v36 = vadd.f32 %v2063_v12, %v1751_v47  ;;  %v2066_v14 = vadd.f32 %v5051_v39, %v4939_v54 }
 0x24c   : > { %v4940_v1 = vpop.f32.mrb[124].mxu0 }
 0x24d   : > { %2138 = vst.msk [vmem:[#allocation3 + $0xe0] sm:$0xff] %vm2109_vm10, %v2105_v36  ;;  %v2106_v48 = vadd.f32 %v2066_v14, %v1752_v33  ;;  %v5052_v49 = vpop.f32.mrb[124].mxu1  ;;  %v4941_v50 = vpop.f32.mrb[125].mxu0 }
 0x24e   : > { %v4942_v18 = vadd.f32 %v4941_v50, %v4940_v1  ;;  %v5053_v52 = vpop.f32.mrb[125].mxu1  ;;  %v4943_v53 = vpop.f32.mrb[126].mxu0 }
 0x24f   : > { %2139 = vst.msk [vmem:[#allocation3 + $0xe8] sm:$0xff] %vm2109_vm10, %v2106_v48  ;;  %v5054_v56 = vadd.f32 %v5053_v52, %v5052_v49  ;;  %v5055_v57 = vpop.f32.mrb[126].mxu1  ;;  %v4944_v55 = vpop.f32.mrb[127].mxu0 }
 0x250   : > { %v4945_v59 = vadd.f32 %v4944_v55, %v4943_v53  ;;  %v5056_v60 = vpop.f32.mrb[127].mxu1 }
 0x251   : > { %v2071_v61 = vadd.f32 %v5054_v56, %v4942_v18  ;;  %v5057_v51 = vadd.f32 %v5056_v60, %v5055_v57 }
 0x253   : > { %v2107_v0 = vadd.f32 %v2071_v61, %v1753_v58  ;;  %v2074_v13 = vadd.f32 %v5057_v51, %v4945_v59 }
 0x255   : > { %2140 = vst.msk [vmem:[#allocation3 + $0xf0] sm:$0xff] %vm2109_vm10, %v2107_v0  ;;  %v2108_v15 = vadd.f32 %v2074_v13, %v1754_v62 }
 0x257   : > { %2141 = vst.msk [vmem:[#allocation3 + $0xf8] sm:$0xff] %vm2109_vm10, %v2108_v15 }
 0x258 PF: > { %p4516_p6 = scmp.ne.s32.totalorder %s5778_s1, 2 }
 0x259   : > { %v2180_v16 = vld [vmem:[#allocation3 + $0x10] sm:$0xff] (!%p4516_p6)  ;;  %v2178_v17 = vld [vmem:[#allocation3] sm:$0xff] (!%p4516_p6)  ;;  %v2181_v22 = vld [vmem:[#allocation3 + $0x18] sm:$0xff] (!%p4516_p6)  ;;  %v5801_v19 = vmov (!%p4516_p6), 0   ;;  %vm2534_vm13 = vcmask (!%p4516_p6), 261120  }
 0x25a   : > { %2145 = sbr.rel (%p4516_p6) target bundleno = 1595 (0x63b), region = 72  ;;  %5385 = vset.pattern.permute.xlu1 (!%p4516_p6), %v5801_v19  ;;  %5384 = vset.pattern.permute.xlu0 (!%p4516_p6), %v5801_v19  ;;  %v2212_v24 = vmax.f32 (!%p4516_p6), %v2180_v16, 1.0  ;;  %v2210_v25 = vmax.f32 (!%p4516_p6), %v2178_v17, 1.0  ;;  %v2179_v26 = vld [vmem:[#allocation3 + $0x8] sm:$0xff] (!%p4516_p6)  ;;  %v2213_v28 = vmax.f32 (!%p4516_p6), %v2181_v22, 1.0  ;;  %v2182_v30 = vld [vmem:[#allocation3 + $0x20] sm:$0xff] (!%p4516_p6) }
 0x25b   : > { %v2211_v20 = vmax.f32 (!%p4516_p6), %v2179_v26, 1.0  ;;  %v2183_v29 = vld [vmem:[#allocation3 + $0x28] sm:$0xff] (!%p4516_p6)  ;;  %v2214_v32 = vmax.f32 (!%p4516_p6), %v2182_v30, 1.0  ;;  %v2185_v44 = vld [vmem:[#allocation3 + $0x38] sm:$0xff] (!%p4516_p6)  ;;  %v2184_v34 = vld [vmem:[#allocation3 + $0x30] sm:$0xff] (!%p4516_p6) }
 0x25c   : > { %2254 = vperm.xlu1 (!%p4516_p6), %5385, %v2212_v24   ;;  %2244 = vperm.xlu0 (!%p4516_p6), %5384, %v2210_v25   ;;  %v2215_v31 = vmax.f32 (!%p4516_p6), %v2183_v29, 1.0  ;;  %v2217_v21 = vmax.f32 (!%p4516_p6), %v2185_v44, 1.0  ;;  %v2187_v35 = vld [vmem:[#allocation3 + $0x48] sm:$0xff] (!%p4516_p6)  ;;  %v2216_v37 = vmax.f32 (!%p4516_p6), %v2184_v34, 1.0  ;;  %v2186_v38 = vld [vmem:[#allocation3 + $0x40] sm:$0xff] (!%p4516_p6)  ;;  %v2189_v46 = vld [vmem:[#allocation3 + $0x58] sm:$0xff] (!%p4516_p6) }
 0x25d   : > { %v5386_v40 = vld [vmem:[%s7981_s6] sm:$0xff] (!%p4516_p6)   ;;  %v2219_v41 = vmax.f32 (!%p4516_p6), %v2187_v35, 1.0  ;;  %v2218_v42 = vmax.f32 (!%p4516_p6), %v2186_v38, 1.0  ;;  %v2188_v43 = vld [vmem:[#allocation3 + $0x50] sm:$0xff] (!%p4516_p6)  ;;  %v5387_v45 = vld [vmem:[%s7981_s6 + $0x8] sm:$0xff] (!%p4516_p6)   ;;  %v2221_v63 = vmax.f32 (!%p4516_p6), %v2189_v46, 1.0 }
 0x25e   : > { %5130 = vmatprep.subr.bf16.mxu0 (!%p4516_p6), %v5386_v40  ;;  %v2220_v2 = vmax.f32 (!%p4516_p6), %v2188_v43, 1.0  ;;  %v2191_v3 = vld [vmem:[#allocation3 + $0x68] sm:$0xff] (!%p4516_p6)  ;;  %v2190_v27 = vld [vmem:[#allocation3 + $0x60] sm:$0xff] (!%p4516_p6)  ;;  %v2193_v23 = vld [vmem:[#allocation3 + $0x78] sm:$0xff] (!%p4516_p6) }
 0x25f   : > { %5131 = vmatpush3.bf16.msra.mxu0 (!%p4516_p6), %v5386_v40  ;;  %v7427_v4 = vld [vmem:[%s7980_s5] sm:$0xff] (!%p4516_p6)   ;;  %v2223_v5 = vmax.f32 (!%p4516_p6), %v2191_v3, 1.0  ;;  %v2222_v6 = vmax.f32 (!%p4516_p6), %v2190_v27, 1.0  ;;  %v2192_v7 = vld [vmem:[#allocation3 + $0x70] sm:$0xff] (!%p4516_p6)  ;;  %v2225_v8 = vmax.f32 (!%p4516_p6), %v2193_v23, 1.0  ;;  %v2195_v10 = vld [vmem:[#allocation3 + $0x88] sm:$0xff] (!%p4516_p6) }
 0x260   : > { %2259 = vperm.xlu1 (!%p4516_p6), %5385, %v2213_v28   ;;  %2249 = vperm.xlu0 (!%p4516_p6), %5384, %v2211_v20   ;;  %v2224_v9 = vmax.f32 (!%p4516_p6), %v2192_v7, 1.0  ;;  %v2194_v47 = vld [vmem:[#allocation3 + $0x80] sm:$0xff] (!%p4516_p6)  ;;  %v2227_v54 = vmax.f32 (!%p4516_p6), %v2195_v10, 1.0  ;;  %v2197_v12 = vld [vmem:[#allocation3 + $0x98] sm:$0xff] (!%p4516_p6)  ;;  %v2196_v39 = vld [vmem:[#allocation3 + $0x90] sm:$0xff] (!%p4516_p6) }
 0x261   : > { %5132 = vmatprep.subr.bf16.mxu0 %v5387_v45  ;;  %v2226_v11 = vmax.f32 %v2194_v47, 1.0  ;;  %v2229_v33 = vmax.f32 %v2197_v12, 1.0  ;;  %v2228_v36 = vmax.f32 %v2196_v39, 1.0  ;;  %v2199_v14 = vld [vmem:[#allocation3 + $0xa8] sm:$0xff]  ;;  %v2198_v1 = vld [vmem:[#allocation3 + $0xa0] sm:$0xff]  ;;  %v2201_v50 = vld [vmem:[#allocation3 + $0xb8] sm:$0xff] }
 0x262   : > { %v2231_v48 = vmax.f32 %v2199_v14, 1.0  ;;  %v2230_v49 = vmax.f32 %v2198_v1, 1.0  ;;  %v2200_v18 = vld [vmem:[#allocation3 + $0xb0] sm:$0xff]  ;;  %v2233_v52 = vmax.f32 %v2201_v50, 1.0  ;;  %v2203_v56 = vld [vmem:[#allocation3 + $0xc8] sm:$0xff]  ;;  %v2202_v57 = vld [vmem:[#allocation3 + $0xc0] sm:$0xff] }
 0x263   : > { %5133 = vmatpush3.bf16.msra.mxu0 %v5387_v45  ;;  %v2232_v53 = vmax.f32 %v2200_v18, 1.0  ;;  %v2235_v55 = vmax.f32 %v2203_v56, 1.0  ;;  %v2234_v58 = vmax.f32 %v2202_v57, 1.0  ;;  %v2205_v59 = vld [vmem:[#allocation3 + $0xd8] sm:$0xff]  ;;  %v2204_v60 = vld [vmem:[#allocation3 + $0xd0] sm:$0xff]  ;;  %v2207_v62 = vld [vmem:[#allocation3 + $0xe8] sm:$0xff] }
 0x264   : > { %2269 = vperm.xlu1 %5385, %v2215_v31   ;;  %2264 = vperm.xlu0 %5384, %v2214_v32   ;;  %v2237_v61 = vmax.f32 %v2205_v59, 1.0  ;;  %v2236_v51 = vmax.f32 %v2204_v60, 1.0  ;;  %v2206_v0 = vld [vmem:[#allocation3 + $0xe0] sm:$0xff]  ;;  %v2239_v13 = vmax.f32 %v2207_v62, 1.0  ;;  %v2209_v16 = vld [vmem:[#allocation3 + $0xf8] sm:$0xff]  ;;  %v2208_v17 = vld [vmem:[#allocation3 + $0xf0] sm:$0xff] }
 0x265   : > { %5166 = vmatprep.subr.bf16.mxu0 %v7427_v4  ;;  %v2238_v15 = vmax.f32 %v2206_v0, 1.0  ;;  %v2241_v22 = vmax.f32 %v2209_v16, 1.0  ;;  %v2240_v19 = vmax.f32 %v2208_v17, 1.0  ;;  %v2148_v44 = vld [vmem:[#allocation2 + $0x10] sm:$0xff]  ;;  %v2149_v34 = vld [vmem:[#allocation2 + $0x18] sm:$0xff]  ;;  %v2146_v35 = vld [vmem:[#allocation2] sm:$0xff] }
 0x266   : > { %v2150_v27 = vld [vmem:[#allocation2 + $0x20] sm:$0xff]  ;;  %v5389_v10 = vld [vmem:[%s7980_s5 + $0x8] sm:$0xff]   ;;  %v2156_v59 = vld [vmem:[#allocation2 + $0x50] sm:$0xff] }
 0x267   : > { %v2154_v50 = vld [vmem:[#allocation2 + $0x40] sm:$0xff]  ;;  %v2159_v16 = vld [vmem:[#allocation2 + $0x68] sm:$0xff] }
 0x268   : > { %2279 = vperm.xlu1 %5385, %v2217_v21   ;;  %2274 = vperm.xlu0 %5384, %v2216_v37   ;;  %v2147_v37 = vld [vmem:[#allocation2 + $0x8] sm:$0xff]  ;;  %v2158_v17 = vld [vmem:[#allocation2 + $0x60] sm:$0xff] }
 0x26c   : > { %2289 = vperm.xlu1 %5385, %v2219_v41   ;;  %2284 = vperm.xlu0 %5384, %v2218_v42  }
 0x270   : > { %2299 = vperm.xlu1 %5385, %v2221_v63   ;;  %2294 = vperm.xlu0 %5384, %v2220_v2   ;;  %v2151_v2 = vld [vmem:[#allocation2 + $0x28] sm:$0xff] }
 0x274   : > { %2309 = vperm.xlu1 %5385, %v2223_v5   ;;  %2304 = vperm.xlu0 %5384, %v2222_v6  }
 0x278   : > { %2319 = vperm.xlu1 %5385, %v2225_v8   ;;  %2314 = vperm.xlu0 %5384, %v2224_v9  }
 0x27c   : > { %2329 = vperm.xlu1 %5385, %v2227_v54   ;;  %2324 = vperm.xlu0 %5384, %v2226_v11   ;;  %v2153_v54 = vld [vmem:[#allocation2 + $0x38] sm:$0xff]  ;;  %v2152_v11 = vld [vmem:[#allocation2 + $0x30] sm:$0xff] }
 0x280   : > { %2339 = vperm.xlu1 %5385, %v2229_v33   ;;  %2334 = vperm.xlu0 %5384, %v2228_v36  }
 0x284   : > { %2349 = vperm.xlu1 %5385, %v2231_v48   ;;  %2344 = vperm.xlu0 %5384, %v2230_v49   ;;  %v2155_v49 = vld [vmem:[#allocation2 + $0x48] sm:$0xff] }
 0x288   : > { %2359 = vperm.xlu1 %5385, %v2233_v52   ;;  %2354 = vperm.xlu0 %5384, %v2232_v53  }
 0x28c   : > { %2369 = vperm.xlu1 %5385, %v2235_v55   ;;  %2364 = vperm.xlu0 %5384, %v2234_v58   ;;  %v2157_v58 = vld [vmem:[#allocation2 + $0x58] sm:$0xff] }
 0x290   : > { %2379 = vperm.xlu1 %5385, %v2237_v61   ;;  %2374 = vperm.xlu0 %5384, %v2236_v51  }
 0x294   : > { %2389 = vperm.xlu1 %5385, %v2239_v13   ;;  %2384 = vperm.xlu0 %5384, %v2238_v15  }
 0x298   : > { %2399 = vperm.xlu1 %5385, %v2241_v22   ;;  %2394 = vperm.xlu0 %5384, %v2240_v19  }
 0x2db   : > { %v2255_v24 = vpop.permute.xlu1 %2254  ;;  %v2245_v25 = vpop.permute.xlu0 %2244 }
 0x2dc   : > { %5410 = vrcp.f32 %v2255_v24 }
 0x2dd   : > { %5412 = vrcp.f32 %v2245_v25 }
 0x2df   : > { %v2260_v26 = vpop.permute.xlu1 %2259  ;;  %v2250_v28 = vpop.permute.xlu0 %2249 }
 0x2e0   : > { %5414 = vrcp.f32 %v2260_v26 }
 0x2e1   : > { %5416 = vrcp.f32 %v2250_v28 }
 0x2e3   : > { %v2270_v20 = vpop.permute.xlu1 %2269  ;;  %v2265_v29 = vpop.permute.xlu0 %2264 }
 0x2e4   : > { %5418 = vrcp.f32 %v2270_v20 }
 0x2e5   : > { %5420 = vrcp.f32 %v2265_v29  ;;  %v2161_v29 = vld [vmem:[#allocation2 + $0x78] sm:$0xff] }
 0x2e6   : > { %v5411_v32 = vpop.eup %5410 }
 0x2e7   : > { %v2280_v30 = vpop.permute.xlu1 %2279  ;;  %v2275_v31 = vpop.permute.xlu0 %2274  ;;  %v2407_v42 = vmul.f32 %v5411_v32, %v2148_v44 }
 0x2e8   : > { %5422 = vrcp.f32 %v2280_v30  ;;  %v5413_v21 = vpop.eup %5412  ;;  %v2160_v30 = vld [vmem:[#allocation2 + $0x70] sm:$0xff] }
 0x2e9   : > { %5424 = vrcp.f32 %v2275_v31  ;;  %v2403_v45 = vmul.f32 %v5413_v21, %v2146_v35 }
 0x2ea   : > { %v5415_v38 = vpop.eup %5414 }
 0x2eb   : > { %v5417_v40 = vpop.eup %5416  ;;  %v2290_v41 = vpop.permute.xlu1 %2289  ;;  %v2409_v43 = vmul.f32 %v5415_v38, %v2149_v34  ;;  %v2163_v38 = vld [vmem:[#allocation2 + $0x88] sm:$0xff] }
 0x2ec   : > { %v2285_v46 = vpop.permute.xlu0 %2284  ;;  %5426 = vrcp.f32 %v2290_v41  ;;  %v2405_v63 = vmul.f32 %v5417_v40, %v2147_v37  ;;  %v2162_v40 = vld [vmem:[#allocation2 + $0x80] sm:$0xff] }
 0x2ed   : > { %5428 = vrcp.f32 %v2285_v46  ;;  %v2503_v3 = vpack.c.bf16 %v2409_v43, %v2407_v42 }
 0x2ee   : > { %v5419_v5 = vpop.eup %5418  ;;  %v2502_v6 = vpack.c.bf16 %v2405_v63, %v2403_v45 }
 0x2ef   : > { %v5421_v23 = vpop.eup %5420  ;;  %v2300_v7 = vpop.permute.xlu1 %2299  ;;  %v2413_v9 = vmul.f32 %v5419_v5, %v2151_v2 }
 0x2f0   : > { %v2295_v8 = vpop.permute.xlu0 %2294  ;;  %5430 = vrcp.f32 %v2300_v7  ;;  %5134 = vmatprep.mubr.msk.bf16.mxu0 %vm2534_vm13, %v2502_v6  ;;  %v2411_v47 = vmul.f32 %v5421_v23, %v2150_v27  ;;  %v2164_v27 = vld [vmem:[#allocation2 + $0x90] sm:$0xff] }
 0x2f1   : > { %5432 = vrcp.f32 %v2295_v8  ;;  %5135 = vmatmul.mubr.msk.bf16.vlgmr.msra.gmra.mrb[0].mxu0 %vm2534_vm13, %v2503_v3  ;;  %v2165_v3 = vld [vmem:[#allocation2 + $0x98] sm:$0xff] }
 0x2f2   : > { %v5423_v12 = vpop.eup %5422  ;;  %5167 = vmatpush3.bf16.msra.mxu0 %v7427_v4  ;;  %v2504_v39 = vpack.c.bf16 %v2413_v9, %v2411_v47  ;;  %v2167_v47 = vld [vmem:[#allocation2 + $0xa8] sm:$0xff] }
 0x2f3   : > { %v5425_v33 = vpop.eup %5424  ;;  %v2310_v36 = vpop.permute.xlu1 %2309  ;;  %v2417_v1 = vmul.f32 %v5423_v12, %v2153_v54  ;;  %5168 = vmatprep.subr.bf16.mxu0 %v5389_v10  ;;  %v2166_v54 = vld [vmem:[#allocation2 + $0xa0] sm:$0xff] }
 0x2f4   : > { %v2305_v14 = vpop.permute.xlu0 %2304  ;;  %5434 = vrcp.f32 %v2310_v36  ;;  %5138 = vmatprep.mubr.msk.bf16.mxu0 %vm2534_vm13, %v2504_v39  ;;  %v2415_v48 = vmul.f32 %v5425_v33, %v2152_v11 }
 0x2f5   : > { %5436 = vrcp.f32 %v2305_v14 }
 0x2f6   : > { %v5427_v18 = vpop.eup %5426  ;;  %v2505_v52 = vpack.c.bf16 %v2417_v1, %v2415_v48  ;;  %5169 = vmatpush3.bf16.msra.mxu0 %v5389_v10  ;;  %v2169_v48 = vld [vmem:[#allocation2 + $0xb8] sm:$0xff] }
 0x2f7   : > { %v5429_v53 = vpop.eup %5428  ;;  %v2320_v56 = vpop.permute.xlu1 %2319  ;;  %v2421_v4 = vmul.f32 %v5427_v18, %v2155_v49  ;;  %v2168_v49 = vld [vmem:[#allocation2 + $0xb0] sm:$0xff] }
 0x2f8   : > { %v2315_v57 = vpop.permute.xlu0 %2314  ;;  %5438 = vrcp.f32 %v2320_v56  ;;  %v2419_v55 = vmul.f32 %v5429_v53, %v2154_v50 }
 0x2f9   : > { %5440 = vrcp.f32 %v2315_v57  ;;  %5139 = vmatmul.mubr.msk.bf16.gmra.mrb[4].mxu0 %vm2534_vm13, %v2505_v52 }
 0x2fa   : > { %v5431_v60 = vpop.eup %5430  ;;  %v2506_v61 = vpack.c.bf16 %v2421_v4, %v2419_v55  ;;  %v2171_v55 = vld [vmem:[#allocation2 + $0xc8] sm:$0xff] }
 0x2fb   : > { %v5433_v51 = vpop.eup %5432  ;;  %v2330_v62 = vpop.permute.xlu1 %2329  ;;  %v2425_v13 = vmul.f32 %v5431_v60, %v2157_v58  ;;  %v2170_v58 = vld [vmem:[#allocation2 + $0xc0] sm:$0xff] }
 0x2fc   : > { %v2325_v0 = vpop.permute.xlu0 %2324  ;;  %5442 = vrcp.f32 %v2330_v62  ;;  %5142 = vmatprep.mubr.msk.bf16.mxu0 %vm2534_vm13, %v2506_v61  ;;  %v2423_v15 = vmul.f32 %v5433_v51, %v2156_v59 }
 0x2fd   : > { %5444 = vrcp.f32 %v2325_v0 }
 0x2fe   : > { %v5435_v22 = vpop.eup %5434  ;;  %v2507_v19 = vpack.c.bf16 %v2425_v13, %v2423_v15  ;;  %v2173_v15 = vld [vmem:[#allocation2 + $0xd8] sm:$0xff] }
 0x2ff   : > { %v5437_v24 = vpop.eup %5436  ;;  %v2340_v25 = vpop.permute.xlu1 %2339  ;;  %v2429_v28 = vmul.f32 %v5435_v22, %v2159_v16  ;;  %v2172_v16 = vld [vmem:[#allocation2 + $0xd0] sm:$0xff] }
 0x300   : > { %v2335_v26 = vpop.permute.xlu0 %2334  ;;  %5446 = vrcp.f32 %v2340_v25  ;;  %v2427_v20 = vmul.f32 %v5437_v24, %v2158_v17 }
 0x301   : > { %5448 = vrcp.f32 %v2335_v26  ;;  %5143 = vmatmul.mubr.msk.bf16.gmra.mrb[8].mxu0 %vm2534_vm13, %v2507_v19  ;;  %v2175_v26 = vld [vmem:[#allocation2 + $0xe8] sm:$0xff] }
 0x302   : > { %v5439_v31 = vpop.eup %5438  ;;  %v2508_v32 = vpack.c.bf16 %v2429_v28, %v2427_v20  ;;  %v2174_v28 = vld [vmem:[#allocation2 + $0xe0] sm:$0xff] }
 0x303   : > { %v5441_v44 = vpop.eup %5440  ;;  %v2350_v34 = vpop.permute.xlu1 %2349  ;;  %v2433_v35 = vmul.f32 %v5439_v31, %v2161_v29 }
 0x304   : > { %v2345_v21 = vpop.permute.xlu0 %2344  ;;  %5450 = vrcp.f32 %v2350_v34  ;;  %5146 = vmatprep.mubr.msk.bf16.mxu0 %vm2534_vm13, %v2508_v32  ;;  %v2431_v37 = vmul.f32 %v5441_v44, %v2160_v30  ;;  %v2177_v44 = vld [vmem:[#allocation2 + $0xf8] sm:$0xff]  ;;  %v2176_v34 = vld [vmem:[#allocation2 + $0xf0] sm:$0xff] }
 0x305   : > { %5452 = vrcp.f32 %v2345_v21 }
 0x306   : > { %v5443_v41 = vpop.eup %5442  ;;  %v2509_v46 = vpack.c.bf16 %v2433_v35, %v2431_v37 }
 0x307   : > { %v5445_v42 = vpop.eup %5444  ;;  %v2360_v43 = vpop.permute.xlu1 %2359  ;;  %v2437_v63 = vmul.f32 %v5443_v41, %v2163_v38 }
 0x308   : > { %v2355_v45 = vpop.permute.xlu0 %2354  ;;  %5454 = vrcp.f32 %v2360_v43  ;;  %v2435_v2 = vmul.f32 %v5445_v42, %v2162_v40  ;;  %v5391_v42 = vld [vmem:[%s5913_s27 + $0x8] sm:$0xff]   ;;  %v5392_v43 = vld [vmem:[%s5913_s27 + $0x10] sm:$0xff]  }
 0x309   : > { %5456 = vrcp.f32 %v2355_v45  ;;  %5147 = vmatmul.mubr.msk.bf16.gmra.mrb[12].mxu0 %vm2534_vm13, %v2509_v46  ;;  %v5390_v46 = vld [vmem:[%s5913_s27] sm:$0xff]   ;;  %v5393_v45 = vld [vmem:[%s5913_s27 + $0x18] sm:$0xff]  }
 0x30a   : > { %v5447_v5 = vpop.eup %5446  ;;  %v2510_v6 = vpack.c.bf16 %v2437_v63, %v2435_v2  ;;  %v5394_v63 = vld [vmem:[%s5913_s27 + $0x20] sm:$0xff]   ;;  %v5395_v2 = vld [vmem:[%s5913_s27 + $0x28] sm:$0xff]  }
 0x30b   : > { %v5449_v23 = vpop.eup %5448  ;;  %v2370_v7 = vpop.permute.xlu1 %2369  ;;  %v2441_v9 = vmul.f32 %v5447_v5, %v2165_v3  ;;  %v5396_v3 = vld [vmem:[%s5913_s27 + $0x30] sm:$0xff]   ;;  %v5398_v5 = vld [vmem:[%s5913_s27 + $0x40] sm:$0xff]  }
 0x30c   : > { %v2365_v8 = vpop.permute.xlu0 %2364  ;;  %5458 = vrcp.f32 %v2370_v7  ;;  %5150 = vmatprep.mubr.msk.bf16.mxu0 %vm2534_vm13, %v2510_v6  ;;  %v2439_v10 = vmul.f32 %v5449_v23, %v2164_v27  ;;  %v5397_v27 = vld [vmem:[%s5913_s27 + $0x38] sm:$0xff]   ;;  %v5399_v6 = vld [vmem:[%s5913_s27 + $0x48] sm:$0xff]   ;;  %v5400_v23 = vld [vmem:[%s5913_s27 + $0x50] sm:$0xff]  }
 0x30d   : > { %5460 = vrcp.f32 %v2365_v8  ;;  %v5401_v7 = vld [vmem:[%s5913_s27 + $0x58] sm:$0xff]   ;;  %v5402_v8 = vld [vmem:[%s5913_s27 + $0x60] sm:$0xff]  }
 0x30e   : > { %v5451_v11 = vpop.eup %5450  ;;  %v2511_v12 = vpack.c.bf16 %v2441_v9, %v2439_v10  ;;  %v5403_v9 = vld [vmem:[%s5913_s27 + $0x68] sm:$0xff]   ;;  %v5404_v10 = vld [vmem:[%s5913_s27 + $0x70] sm:$0xff]  }
 0x30f   : > { %v5453_v39 = vpop.eup %5452  ;;  %v2380_v33 = vpop.permute.xlu1 %2379  ;;  %v2445_v14 = vmul.f32 %v5451_v11, %v2167_v47  ;;  %v5405_v47 = vld [vmem:[%s5913_s27 + $0x78] sm:$0xff]   ;;  %v5407_v11 = vld [vmem:[%s7983_s8 + $0x8] sm:$0xff]  }
 0x310   : > { %v2375_v36 = vpop.permute.xlu0 %2374  ;;  %5462 = vrcp.f32 %v2380_v33  ;;  %v2443_v1 = vmul.f32 %v5453_v39, %v2166_v54  ;;  %v5406_v54 = vld [vmem:[%s7983_s8] sm:$0xff]  }
 0x311   : > { %5464 = vrcp.f32 %v2375_v36  ;;  %5151 = vmatmul.mubr.msk.bf16.gmra.mrb[16].mxu0 %vm2534_vm13, %v2511_v12  ;;  %5202 = vmatprep.subr.bf16.mxu1 %v5406_v54  ;;  %v7491_v12 = vld [vmem:[%s7985_s10] sm:$0xff]  }
 0x312   : > { %v5455_v50 = vpop.eup %5454  ;;  %v2512_v18 = vpack.c.bf16 %v2445_v14, %v2443_v1  ;;  %5203 = vmatpush3.bf16.msra.mxu1 %v5406_v54  ;;  %v7497_v39 = vld [vmem:[%s7982_s7] ss:$0 sm:$0xff] }
 0x313   : > { %v5457_v52 = vpop.eup %5456  ;;  %v2390_v53 = vpop.permute.xlu1 %2389  ;;  %v2449_v57 = vmul.f32 %v5455_v50, %v2169_v48  ;;  %5204 = vmatprep.subr.bf16.mxu1 %v5407_v11 }
 0x314   : > { %v2385_v56 = vpop.permute.xlu0 %2384  ;;  %5466 = vrcp.f32 %v2390_v53  ;;  %5154 = vmatprep.mubr.msk.bf16.mxu0 %vm2534_vm13, %v2512_v18  ;;  %v2447_v4 = vmul.f32 %v5457_v52, %v2168_v49 }
 0x315   : > { %5468 = vrcp.f32 %v2385_v56 }
 0x316   : > { %v5459_v59 = vpop.eup %5458  ;;  %v2513_v60 = vpack.c.bf16 %v2449_v57, %v2447_v4  ;;  %5205 = vmatpush3.bf16.msra.mxu1 %v5407_v11 }
 0x317   : > { %v5461_v61 = vpop.eup %5460  ;;  %v2400_v51 = vpop.permute.xlu1 %2399  ;;  %v2453_v0 = vmul.f32 %v5459_v59, %v2171_v55  ;;  %5238 = vmatprep.subr.bf16.mxu1 %v7491_v12 }
 0x318   : > { %v2395_v62 = vpop.permute.xlu0 %2394  ;;  %5470 = vrcp.f32 %v2400_v51  ;;  %v2451_v13 = vmul.f32 %v5461_v61, %v2170_v58 }
 0x319   : > { %5472 = vrcp.f32 %v2395_v62  ;;  %5155 = vmatmul.mubr.msk.bf16.gmra.mrb[20].mxu0 %vm2534_vm13, %v2513_v60 }
 0x31a   : > { %v5463_v17 = vpop.eup %5462  ;;  %v2514_v22 = vpack.c.bf16 %v2453_v0, %v2451_v13 }
 0x31b   : > { %v5465_v19 = vpop.eup %5464  ;;  %v2457_v24 = vmul.f32 %v5463_v17, %v2173_v15 }
 0x31c   : > { %5158 = vmatprep.mubr.msk.bf16.mxu0 %vm2534_vm13, %v2514_v22  ;;  %v2455_v25 = vmul.f32 %v5465_v19, %v2172_v16 }
 0x31e   : > { %v5467_v20 = vpop.eup %5466  ;;  %v2515_v29 = vpack.c.bf16 %v2457_v24, %v2455_v25 }
 0x31f   : > { %v5469_v30 = vpop.eup %5468  ;;  %v2461_v31 = vmul.f32 %v5467_v20, %v2175_v26 }
 0x320   : > { %v2459_v32 = vmul.f32 %v5469_v30, %v2174_v28 }
 0x321   : > { %5159 = vmatmul.mubr.msk.bf16.gmra.mrb[24].mxu0 %vm2534_vm13, %v2515_v29 }
 0x322   : > { %v5471_v21 = vpop.eup %5470  ;;  %v2516_v35 = vpack.c.bf16 %v2461_v31, %v2459_v32 }
 0x323   : > { %v5473_v37 = vpop.eup %5472  ;;  %v2465_v38 = vmul.f32 %v5471_v21, %v2177_v44 }
 0x324   : > { %5162 = vmatprep.mubr.msk.bf16.mxu0 %vm2534_vm13, %v2516_v35  ;;  %v2463_v40 = vmul.f32 %v5473_v37, %v2176_v34 }
 0x326   : > { %v2517_v41 = vpack.c.bf16 %v2465_v38, %v2463_v40 }
 0x329   : > { %5163 = vmatmul.mubr.msk.bf16.gmra.mrb[28].mxu0 %vm2534_vm13, %v2517_v41 }
 0x32a   : > { %5170 = vmatprep.mubr.msk.bf16.mxu0 %vm2534_vm13, %v5390_v46 }
 0x331   : > { %5171 = vmatmul.mubr.msk.bf16.vlgmr.msra.gmra.mrb[0].mxu0 %vm2534_vm13, %v5391_v42 }
 0x332   : > { %5174 = vmatprep.mubr.msk.bf16.mxu0 %vm2534_vm13, %v5392_v43 }
 0x339   : > { %5175 = vmatmul.mubr.msk.bf16.gmra.mrb[4].mxu0 %vm2534_vm13, %v5393_v45 }
 0x33a   : > { %5178 = vmatprep.mubr.msk.bf16.mxu0 %vm2534_vm13, %v5394_v63 }
 0x341   : > { %5179 = vmatmul.mubr.msk.bf16.gmra.mrb[8].mxu0 %vm2534_vm13, %v5395_v2 }
 0x342   : > { %5182 = vmatprep.mubr.msk.bf16.mxu0 %vm2534_vm13, %v5396_v3 }
 0x349   : > { %5183 = vmatmul.mubr.msk.bf16.gmra.mrb[12].mxu0 %vm2534_vm13, %v5397_v27 }
 0x34a   : > { %5186 = vmatprep.mubr.msk.bf16.mxu0 %vm2534_vm13, %v5398_v5 }
 0x351   : > { %5187 = vmatmul.mubr.msk.bf16.gmra.mrb[16].mxu0 %vm2534_vm13, %v5399_v6 }
 0x352   : > { %5190 = vmatprep.mubr.msk.bf16.mxu0 %vm2534_vm13, %v5400_v23 }
 0x359   : > { %5191 = vmatmul.mubr.msk.bf16.gmra.mrb[20].mxu0 %vm2534_vm13, %v5401_v7 }
 0x35a   : > { %5194 = vmatprep.mubr.msk.bf16.mxu0 %vm2534_vm13, %v5402_v8 }
 0x361   : > { %5195 = vmatmul.mubr.msk.bf16.gmra.mrb[24].mxu0 %vm2534_vm13, %v5403_v9 }
 0x362   : > { %5198 = vmatprep.mubr.msk.bf16.mxu0 %vm2534_vm13, %v5404_v10 }
 0x369   : > { %5199 = vmatmul.mubr.msk.bf16.gmra.mrb[28].mxu0 %vm2534_vm13, %v5405_v47 }
 0x404   : > { %v5172_v33 = vpop.f32.mrb[0].mxu0 }
 0x405   : > { %v7500_v36 = vadd.f32 %v5172_v33, %v7497_v39  ;;  %v2918_v14 = vpop.f32.mrb[1].mxu0 }
 0x406   : > { %v7503_v1 = vadd.f32 %v7497_v39, %v2918_v14  ;;  %v5173_v48 = vpop.f32.mrb[2].mxu0 }
 0x407   : > { %v3086_v49 = vsub.f32 0.0, %v7500_v36  ;;  %v7507_v50 = vadd.f32 %v5173_v48, %v7497_v39  ;;  %v2921_v18 = vpop.f32.mrb[3].mxu0 }
 0x408   : > { %v3084_v52 = vsub.f32 0.0, %v7503_v1  ;;  %v7511_v53 = vadd.f32 %v7497_v39, %v2921_v18 }
 0x409   : > { %v3120_v56 = vmul.f32 1.442695, %v3086_v49  ;;  %v3087_v57 = vsub.f32 0.0, %v7507_v50 }
 0x40a   : > { %v3116_v4 = vmul.f32 1.442695, %v3084_v52  ;;  %v3085_v55 = vsub.f32 0.0, %v7511_v53 }
 0x40b   : > { %5474 = vpow2.f32 %v3120_v56  ;;  %v3122_v58 = vmul.f32 1.442695, %v3087_v57 }
 0x40c   : > { %5476 = vpow2.f32 %v3116_v4  ;;  %v3118_v59 = vmul.f32 1.442695, %v3085_v55  ;;  %v5176_v60 = vpop.f32.mrb[4].mxu0 }
 0x40d   : > { %5478 = vpow2.f32 %v3122_v58  ;;  %v7516_v61 = vadd.f32 %v5176_v60, %v7497_v39  ;;  %v2934_v51 = vpop.f32.mrb[5].mxu0 }
 0x40e   : > { %5480 = vpow2.f32 %v3118_v59  ;;  %v7519_v62 = vadd.f32 %v7497_v39, %v2934_v51  ;;  %v5177_v0 = vpop.f32.mrb[6].mxu0 }
 0x40f   : > { %v3090_v13 = vsub.f32 0.0, %v7516_v61  ;;  %v7523_v15 = vadd.f32 %v5177_v0, %v7497_v39  ;;  %v2937_v16 = vpop.f32.mrb[7].mxu0 }
 0x410   : > { %v3088_v17 = vsub.f32 0.0, %v7519_v62  ;;  %v7527_v22 = vadd.f32 %v7497_v39, %v2937_v16 }
 0x411   : > { %v3128_v19 = vmul.f32 1.442695, %v3090_v13  ;;  %v3091_v24 = vsub.f32 0.0, %v7523_v15 }
 0x412   : > { %v3124_v25 = vmul.f32 1.442695, %v3088_v17  ;;  %v3089_v26 = vsub.f32 0.0, %v7527_v22 }
 0x413   : > { %5482 = vpow2.f32 %v3128_v19  ;;  %v3130_v28 = vmul.f32 1.442695, %v3091_v24 }
 0x414   : > { %5484 = vpow2.f32 %v3124_v25  ;;  %v3126_v20 = vmul.f32 1.442695, %v3089_v26  ;;  %v5180_v29 = vpop.f32.mrb[8].mxu0 }
 0x415   : > { %v5475_v30 = vpop.eup %5474  ;;  %5486 = vpow2.f32 %v3130_v28  ;;  %v7532_v31 = vadd.f32 %v5180_v29, %v7497_v39  ;;  %v2950_v32 = vpop.f32.mrb[9].mxu0 }
 0x416   : > { %v5477_v44 = vpop.eup %5476  ;;  %v3182_v34 = vadd.f32 1.0, %v5475_v30  ;;  %5488 = vpow2.f32 %v3126_v20  ;;  %v7535_v21 = vadd.f32 %v7497_v39, %v2950_v32  ;;  %v5181_v35 = vpop.f32.mrb[10].mxu0 }
 0x417   : > { %v5479_v37 = vpop.eup %5478  ;;  %v3180_v38 = vadd.f32 1.0, %v5477_v44  ;;  %v3094_v40 = vsub.f32 0.0, %v7532_v31  ;;  %v7539_v41 = vadd.f32 %v5181_v35, %v7497_v39  ;;  %v2953_v46 = vpop.f32.mrb[11].mxu0 }
 0x418   : > { %v5481_v42 = vpop.eup %5480  ;;  %5490 = vrcp.f32 %v3182_v34  ;;  %v3183_v43 = vadd.f32 1.0, %v5479_v37  ;;  %v3092_v45 = vsub.f32 0.0, %v7535_v21  ;;  %v7543_v63 = vadd.f32 %v7497_v39, %v2953_v46 }
 0x419   : > { %5492 = vrcp.f32 %v3180_v38  ;;  %v3181_v2 = vadd.f32 1.0, %v5481_v42  ;;  %v3136_v3 = vmul.f32 1.442695, %v3094_v40  ;;  %v3095_v27 = vsub.f32 0.0, %v7539_v41 }
 0x41a   : > { %5494 = vrcp.f32 %v3183_v43  ;;  %v3132_v5 = vmul.f32 1.442695, %v3092_v45  ;;  %v3093_v6 = vsub.f32 0.0, %v7543_v63 }
 0x41b   : > { %5496 = vrcp.f32 %v3181_v2  ;;  %v3138_v23 = vmul.f32 1.442695, %v3095_v27 }
 0x41c   : > { %5498 = vpow2.f32 %v3136_v3  ;;  %v3134_v7 = vmul.f32 1.442695, %v3093_v6  ;;  %v5184_v8 = vpop.f32.mrb[12].mxu0 }
 0x41d   : > { %v5483_v9 = vpop.eup %5482  ;;  %5500 = vpow2.f32 %v3132_v5  ;;  %v7548_v10 = vadd.f32 %v5184_v8, %v7497_v39  ;;  %v2966_v47 = vpop.f32.mrb[13].mxu0 }
 0x41e   : > { %v5485_v54 = vpop.eup %5484  ;;  %v3186_v11 = vadd.f32 1.0, %v5483_v9  ;;  %5502 = vpow2.f32 %v3138_v23  ;;  %v7551_v33 = vadd.f32 %v7497_v39, %v2966_v47  ;;  %v5185_v14 = vpop.f32.mrb[14].mxu0 }
 0x41f   : > { %v5487_v48 = vpop.eup %5486  ;;  %v3184_v49 = vadd.f32 1.0, %v5485_v54  ;;  %5504 = vpow2.f32 %v3134_v7  ;;  %v3098_v18 = vsub.f32 0.0, %v7548_v10  ;;  %v7555_v52 = vadd.f32 %v5185_v14, %v7497_v39  ;;  %v2969_v56 = vpop.f32.mrb[15].mxu0 }
 0x420   : > { %v5489_v57 = vpop.eup %5488  ;;  %5506 = vrcp.f32 %v3186_v11  ;;  %v3187_v4 = vadd.f32 1.0, %v5487_v48  ;;  %v3096_v55 = vsub.f32 0.0, %v7551_v33  ;;  %v7559_v58 = vadd.f32 %v7497_v39, %v2969_v56 }
 0x421   : > { %5508 = vrcp.f32 %v3184_v49  ;;  %v3185_v59 = vadd.f32 1.0, %v5489_v57  ;;  %v3144_v60 = vmul.f32 1.442695, %v3098_v18  ;;  %v3099_v51 = vsub.f32 0.0, %v7555_v52 }
 0x422   : > { %v5491_v0 = vpop.eup %5490  ;;  %5510 = vrcp.f32 %v3187_v4  ;;  %v3140_v13 = vmul.f32 1.442695, %v3096_v55  ;;  %v3097_v16 = vsub.f32 0.0, %v7559_v58 }
 0x423   : > { %v5493_v17 = vpop.eup %5492  ;;  %5512 = vrcp.f32 %v3185_v59  ;;  %v3146_v19 = vmul.f32 1.442695, %v3099_v51  ;;  %v3246_v20 = vmul.f32 %v5491_v0, %v7500_v36 }
 0x424   : > { %v5495_v24 = vpop.eup %5494  ;;  %5514 = vpow2.f32 %v3144_v60  ;;  %v3142_v25 = vmul.f32 1.442695, %v3097_v16  ;;  %v5188_v26 = vpop.f32.mrb[16].mxu0  ;;  %v3244_v34 = vmul.f32 %v5493_v17, %v7503_v1 }
 0x425   : > { %v5497_v28 = vpop.eup %5496  ;;  %v3247_v29 = vmul.f32 %v5495_v24, %v7507_v50  ;;  %5516 = vpow2.f32 %v3140_v13  ;;  %v7566_v30 = vadd.f32 %v5188_v26, %v7497_v39  ;;  %v2982_v32 = vpop.f32.mrb[17].mxu0 }
 0x426   : > { %v5499_v44 = vpop.eup %5498  ;;  %v3245_v35 = vmul.f32 %v5497_v28, %v7511_v53  ;;  %5518 = vpow2.f32 %v3146_v19  ;;  %v7571_v37 = vadd.f32 %v7497_v39, %v2982_v32  ;;  %v5189_v38 = vpop.f32.mrb[18].mxu0 }
 0x427   : > { %v5501_v40 = vpop.eup %5500  ;;  %v3277_v46 = vpack.c.bf16 %v3247_v29, %v3246_v20  ;;  %v3190_v36 = vadd.f32 1.0, %v5499_v44  ;;  %5520 = vpow2.f32 %v3142_v25  ;;  %v3102_v50 = vsub.f32 0.0, %v7566_v30  ;;  %v2985_v42 = vpop.f32.mrb[19].mxu0 }
 0x428   : > { %v5503_v43 = vpop.eup %5502  ;;  %v3188_v45 = vadd.f32 1.0, %v5501_v40  ;;  %v3100_v2 = vsub.f32 0.0, %v7571_v37  ;;  %v7576_v1 = vadd.f32 %v5189_v38, %v7497_v39  ;;  %v7579_v53 = vadd.f32 %v7497_v39, %v2985_v42 }
 0x429   : > { %v5505_v3 = vpop.eup %5504  ;;  %5522 = vrcp.f32 %v3190_v36  ;;  %v3191_v27 = vadd.f32 1.0, %v5503_v43  ;;  %v3152_v5 = vmul.f32 1.442695, %v3102_v50  ;;  %v3276_v6 = vpack.c.bf16 %v3245_v35, %v3244_v34 }
 0x42a   : > { %v5507_v23 = vpop.eup %5506  ;;  %5524 = vrcp.f32 %v3188_v45  ;;  %v3189_v7 = vadd.f32 1.0, %v5505_v3  ;;  %v3148_v8 = vmul.f32 1.442695, %v3100_v2  ;;  %v3103_v9 = vsub.f32 0.0, %v7576_v1 }
 0x42b   : > { %v5509_v47 = vpop.eup %5508  ;;  %5526 = vrcp.f32 %v3191_v27  ;;  %v3101_v54 = vsub.f32 0.0, %v7579_v53  ;;  %5206 = vmatprep.mubr.msk.bf16.mxu1 %vm2534_vm13, %v3276_v6  ;;  %v3250_v14 = vmul.f32 %v5507_v23, %v7516_v61 }
 0x42c   : > { %v5511_v11 = vpop.eup %5510  ;;  %5528 = vrcp.f32 %v3189_v7  ;;  %v3154_v48 = vmul.f32 1.442695, %v3103_v9  ;;  %5207 = vmatmul.mubr.msk.bf16.vlgmr.msra.gmra.mrb[0].mxu1 %vm2534_vm13, %v3277_v46  ;;  %v5192_v49 = vpop.f32.mrb[20].mxu0  ;;  %v3248_v60 = vmul.f32 %v5509_v47, %v7519_v62 }
 0x42d   : > { %v5513_v18 = vpop.eup %5512  ;;  %v3251_v56 = vmul.f32 %v5511_v11, %v7523_v15  ;;  %5530 = vpow2.f32 %v3152_v5  ;;  %v3150_v57 = vmul.f32 1.442695, %v3101_v54  ;;  %v7588_v4 = vadd.f32 %v5192_v49, %v7497_v39  ;;  %v2998_v55 = vpop.f32.mrb[21].mxu0  ;;  %5239 = vmatpush3.bf16.msra.mxu1 %v7491_v12 }
 0x42e   : > { %v5515_v59 = vpop.eup %5514  ;;  %v3249_v61 = vmul.f32 %v5513_v18, %v7527_v22  ;;  %5532 = vpow2.f32 %v3148_v8  ;;  %v7594_v51 = vadd.f32 %v7497_v39, %v2998_v55  ;;  %v5193_v0 = vpop.f32.mrb[22].mxu0 }
 0x42f   : > { %v5517_v13 = vpop.eup %5516  ;;  %v3279_v15 = vpack.c.bf16 %v3251_v56, %v3250_v14  ;;  %v3194_v16 = vadd.f32 1.0, %v5515_v59  ;;  %5534 = vpow2.f32 %v3154_v48  ;;  %v3106_v17 = vsub.f32 0.0, %v7588_v4  ;;  %v3001_v19 = vpop.f32.mrb[23].mxu0 }
 0x430   : > { %v5519_v24 = vpop.eup %5518  ;;  %v3278_v25 = vpack.c.bf16 %v3249_v61, %v3248_v60  ;;  %v3192_v12 = vadd.f32 1.0, %v5517_v13  ;;  %5536 = vpow2.f32 %v3150_v57  ;;  %v3104_v62 = vsub.f32 0.0, %v7594_v51 }
 0x431   : > { %v5521_v26 = vpop.eup %5520  ;;  %5538 = vrcp.f32 %v3194_v16  ;;  %v3195_v22 = vadd.f32 1.0, %v5519_v24  ;;  %v3160_v28 = vmul.f32 1.442695, %v3106_v17  ;;  %v7599_v20 = vadd.f32 %v5193_v0, %v7497_v39 }
 0x432   : > { %5540 = vrcp.f32 %v3192_v12  ;;  %v3193_v29 = vadd.f32 1.0, %v5521_v26  ;;  %v3156_v32 = vmul.f32 1.442695, %v3104_v62  ;;  %v7602_v44 = vadd.f32 %v7497_v39, %v3001_v19  ;;  %5210 = vmatprep.mubr.msk.bf16.mxu1 %vm2534_vm13, %v3278_v25 }
 0x433   : > { %v5523_v34 = vpop.eup %5522  ;;  %5542 = vrcp.f32 %v3195_v22  ;;  %v3107_v35 = vsub.f32 0.0, %v7599_v20 }
 0x434   : > { %v5525_v38 = vpop.eup %5524  ;;  %v3254_v40 = vmul.f32 %v5523_v34, %v7532_v31  ;;  %5544 = vrcp.f32 %v3193_v29  ;;  %v3105_v46 = vsub.f32 0.0, %v7602_v44  ;;  %5211 = vmatmul.mubr.msk.bf16.gmra.mrb[4].mxu1 %vm2534_vm13, %v3279_v15  ;;  %v5196_v36 = vpop.f32.mrb[24].mxu0 }
 0x435   : > { %v5527_v50 = vpop.eup %5526  ;;  %v3252_v42 = vmul.f32 %v5525_v38, %v7535_v21  ;;  %5546 = vpow2.f32 %v3160_v28  ;;  %v3162_v43 = vmul.f32 1.442695, %v3107_v35  ;;  %v7611_v45 = vadd.f32 %v5196_v36, %v7497_v39  ;;  %v3014_v2 = vpop.f32.mrb[25].mxu0 }
 0x436   : > { %v5529_v3 = vpop.eup %5528  ;;  %v3255_v27 = vmul.f32 %v5527_v50, %v7539_v41  ;;  %5548 = vpow2.f32 %v3156_v32  ;;  %v3158_v31 = vmul.f32 1.442695, %v3105_v46  ;;  %v7615_v5 = vadd.f32 %v7497_v39, %v3014_v2  ;;  %v5197_v6 = vpop.f32.mrb[26].mxu0 }
 0x437   : > { %v5531_v23 = vpop.eup %5530  ;;  %v3253_v7 = vmul.f32 %v5529_v3, %v7543_v63  ;;  %5550 = vpow2.f32 %v3162_v43  ;;  %v3110_v21 = vsub.f32 0.0, %v7611_v45  ;;  %v7620_v8 = vadd.f32 %v5197_v6, %v7497_v39  ;;  %v3017_v9 = vpop.f32.mrb[27].mxu0 }
 0x438   : > { %v5533_v47 = vpop.eup %5532  ;;  %v3281_v54 = vpack.c.bf16 %v3255_v27, %v3254_v40  ;;  %v3198_v11 = vadd.f32 1.0, %v5531_v23  ;;  %5552 = vpow2.f32 %v3158_v31  ;;  %v3108_v41 = vsub.f32 0.0, %v7615_v5 }
 0x439   : > { %v5535_v14 = vpop.eup %5534  ;;  %v3280_v48 = vpack.c.bf16 %v3253_v7, %v3252_v42  ;;  %v3196_v49 = vadd.f32 1.0, %v5533_v47  ;;  %v3111_v18 = vsub.f32 0.0, %v7620_v8  ;;  %v3168_v57 = vmul.f32 1.442695, %v3110_v21 }
 0x43a   : > { %v5537_v56 = vpop.eup %5536  ;;  %5554 = vrcp.f32 %v3198_v11  ;;  %v3199_v63 = vadd.f32 1.0, %v5535_v14  ;;  %v7625_v55 = vadd.f32 %v7497_v39, %v3017_v9  ;;  %v3164_v61 = vmul.f32 1.442695, %v3108_v41 }
 0x43b   : > { %v5539_v59 = vpop.eup %5538  ;;  %5556 = vrcp.f32 %v3196_v49  ;;  %v3197_v60 = vadd.f32 1.0, %v5537_v56  ;;  %5214 = vmatprep.mubr.msk.bf16.mxu1 %vm2534_vm13, %v3280_v48  ;;  %v3170_v13 = vmul.f32 1.442695, %v3111_v18 }
 0x43c   : > { %v5541_v0 = vpop.eup %5540  ;;  %5558 = vrcp.f32 %v3199_v63  ;;  %v3109_v15 = vsub.f32 0.0, %v7625_v55  ;;  %5215 = vmatmul.mubr.msk.bf16.gmra.mrb[8].mxu1 %vm2534_vm13, %v3281_v54  ;;  %v5200_v16 = vpop.f32.mrb[28].mxu0  ;;  %v3258_v19 = vmul.f32 %v5539_v59, %v7548_v10 }
 0x43d   : > { %v5543_v17 = vpop.eup %5542  ;;  %v3256_v24 = vmul.f32 %v5541_v0, %v7551_v33  ;;  %5560 = vrcp.f32 %v3197_v60  ;;  %v7633_v25 = vadd.f32 %v5200_v16, %v7497_v39  ;;  %v3030_v12 = vpop.f32.mrb[29].mxu0 }
 0x43e   : > { %v5545_v62 = vpop.eup %5544  ;;  %v3259_v26 = vmul.f32 %v5543_v17, %v7555_v52  ;;  %5562 = vpow2.f32 %v3168_v57  ;;  %v3166_v22 = vmul.f32 1.442695, %v3109_v15  ;;  %v7637_v28 = vadd.f32 %v7497_v39, %v3030_v12  ;;  %v5201_v29 = vpop.f32.mrb[30].mxu0 }
 0x43f   : > { %v5547_v32 = vpop.eup %5546  ;;  %v3257_v34 = vmul.f32 %v5545_v62, %v7559_v58  ;;  %5564 = vpow2.f32 %v3164_v61  ;;  %v3114_v10 = vsub.f32 0.0, %v7633_v25  ;;  %v7642_v33 = vadd.f32 %v5201_v29, %v7497_v39  ;;  %v3033_v35 = vpop.f32.mrb[31].mxu0 }
 0x440   : > { %v5549_v38 = vpop.eup %5548  ;;  %v3283_v40 = vpack.c.bf16 %v3259_v26, %v3258_v19  ;;  %v3202_v46 = vadd.f32 1.0, %v5547_v32  ;;  %5566 = vpow2.f32 %v3170_v13  ;;  %v3112_v52 = vsub.f32 0.0, %v7637_v28 }
 0x441   : > { %v5551_v36 = vpop.eup %5550  ;;  %v3282_v50 = vpack.c.bf16 %v3257_v34, %v3256_v24  ;;  %v3200_v42 = vadd.f32 1.0, %v5549_v38  ;;  %5568 = vpow2.f32 %v3166_v22  ;;  %v3176_v2 = vmul.f32 1.442695, %v3114_v10 }
 0x442   : > { %v5553_v43 = vpop.eup %5552  ;;  %5570 = vrcp.f32 %v3202_v46  ;;  %v3203_v58 = vadd.f32 1.0, %v5551_v36  ;;  %v3115_v3 = vsub.f32 0.0, %v7642_v33  ;;  %v3172_v31 = vmul.f32 1.442695, %v3112_v52 }
 0x443   : > { %5572 = vrcp.f32 %v3200_v42  ;;  %v3201_v27 = vadd.f32 1.0, %v5553_v43  ;;  %v7647_v6 = vadd.f32 %v7497_v39, %v3033_v35  ;;  %5218 = vmatprep.mubr.msk.bf16.mxu1 %vm2534_vm13, %v3282_v50 }
 0x444   : > { %v5555_v23 = vpop.eup %5554  ;;  %5574 = vrcp.f32 %v3203_v58  ;;  %v3178_v7 = vmul.f32 1.442695, %v3115_v3  ;;  %5219 = vmatmul.mubr.msk.bf16.gmra.mrb[12].mxu1 %vm2534_vm13, %v3283_v40 }
 0x445   : > { %v5557_v21 = vpop.eup %5556  ;;  %5576 = vrcp.f32 %v3201_v27  ;;  %v3113_v9 = vsub.f32 0.0, %v7647_v6  ;;  %v3262_v11 = vmul.f32 %v5555_v23, %v7566_v30 }
 0x446   : > { %v5559_v47 = vpop.eup %5558  ;;  %5578 = vpow2.f32 %v3176_v2  ;;  %v3260_v48 = vmul.f32 %v5557_v21, %v7571_v37 }
 0x447   : > { %v5561_v54 = vpop.eup %5560  ;;  %v3263_v41 = vmul.f32 %v5559_v47, %v7576_v1  ;;  %5580 = vpow2.f32 %v3172_v31  ;;  %v3174_v39 = vmul.f32 1.442695, %v3113_v9  ;;  %v5409_v31 = vld [vmem:[%s7985_s10 + $0x8] sm:$0xff]  }
 0x448   : > { %v5563_v14 = vpop.eup %5562  ;;  %v3261_v49 = vmul.f32 %v5561_v54, %v7579_v53  ;;  %5582 = vpow2.f32 %v3178_v7  ;;  %5240 = vmatprep.subr.bf16.mxu1 %v5409_v31 }
 0x449   : > { %v5565_v18 = vpop.eup %5564  ;;  %v3285_v56 = vpack.c.bf16 %v3263_v41, %v3262_v11  ;;  %v3206_v63 = vadd.f32 1.0, %v5563_v14  ;;  %5584 = vpow2.f32 %v3174_v39  ;;  %5241 = vmatpush3.bf16.msra.mxu1 %v5409_v31 }
 0x44a   : > { %v5567_v57 = vpop.eup %5566  ;;  %v3284_v59 = vpack.c.bf16 %v3261_v49, %v3260_v48  ;;  %v3204_v60 = vadd.f32 1.0, %v5565_v18 }
 0x44b   : > { %v5569_v61 = vpop.eup %5568  ;;  %5586 = vrcp.f32 %v3206_v63  ;;  %v3207_v30 = vadd.f32 1.0, %v5567_v57 }
 0x44c   : > { %v5571_v0 = vpop.eup %5570  ;;  %5588 = vrcp.f32 %v3204_v60  ;;  %v3205_v1 = vadd.f32 1.0, %v5569_v61  ;;  %5222 = vmatprep.mubr.msk.bf16.mxu1 %vm2534_vm13, %v3284_v59 }
 0x44d   : > { %v5573_v13 = vpop.eup %5572  ;;  %5590 = vrcp.f32 %v3207_v30  ;;  %5223 = vmatmul.mubr.msk.bf16.gmra.mrb[16].mxu1 %vm2534_vm13, %v3285_v56  ;;  %v3266_v15 = vmul.f32 %v5571_v0, %v7588_v4 }
 0x44e   : > { %v5575_v37 = vpop.eup %5574  ;;  %5592 = vrcp.f32 %v3205_v1  ;;  %v3264_v19 = vmul.f32 %v5573_v13, %v7594_v51 }
 0x44f   : > { %v5577_v53 = vpop.eup %5576  ;;  %v3267_v16 = vmul.f32 %v5575_v37, %v7599_v20 }
 0x450   : > { %v5579_v17 = vpop.eup %5578  ;;  %v3265_v24 = vmul.f32 %v5577_v53, %v7602_v44 }
 0x451   : > { %v5581_v12 = vpop.eup %5580  ;;  %v3287_v62 = vpack.c.bf16 %v3267_v16, %v3266_v15  ;;  %v3210_v26 = vadd.f32 1.0, %v5579_v17 }
 0x452   : > { %v5583_v22 = vpop.eup %5582  ;;  %v3286_v29 = vpack.c.bf16 %v3265_v24, %v3264_v19  ;;  %v3208_v32 = vadd.f32 1.0, %v5581_v12 }
 0x453   : > { %v5585_v34 = vpop.eup %5584  ;;  %5594 = vrcp.f32 %v3210_v26  ;;  %v3211_v10 = vadd.f32 1.0, %v5583_v22 }
 0x454   : > { %5596 = vrcp.f32 %v3208_v32  ;;  %v3209_v35 = vadd.f32 1.0, %v5585_v34  ;;  %5226 = vmatprep.mubr.msk.bf16.mxu1 %vm2534_vm13, %v3286_v29 }
 0x455   : > { %v5587_v4 = vpop.eup %5586  ;;  %5598 = vrcp.f32 %v3211_v10  ;;  %5227 = vmatmul.mubr.msk.bf16.gmra.mrb[20].mxu1 %vm2534_vm13, %v3287_v62 }
 0x456   : > { %v5589_v51 = vpop.eup %5588  ;;  %5600 = vrcp.f32 %v3209_v35  ;;  %v3270_v38 = vmul.f32 %v5587_v4, %v7611_v45 }
 0x457   : > { %v5591_v20 = vpop.eup %5590  ;;  %v3268_v46 = vmul.f32 %v5589_v51, %v7615_v5 }
 0x458   : > { %v5593_v44 = vpop.eup %5592  ;;  %v3271_v40 = vmul.f32 %v5591_v20, %v7620_v8 }
 0x459   : > { %v3269_v52 = vmul.f32 %v5593_v44, %v7625_v55 }
 0x45a   : > { %v3289_v36 = vpack.c.bf16 %v3271_v40, %v3270_v38 }
 0x45b   : > { %v3288_v50 = vpack.c.bf16 %v3269_v52, %v3268_v46 }
 0x45d   : > { %v5595_v42 = vpop.eup %5594  ;;  %5230 = vmatprep.mubr.msk.bf16.mxu1 %vm2534_vm13, %v3288_v50 }
 0x45e   : > { %v5597_v43 = vpop.eup %5596  ;;  %5231 = vmatmul.mubr.msk.bf16.gmra.mrb[24].mxu1 %vm2534_vm13, %v3289_v36  ;;  %v3274_v3 = vmul.f32 %v5595_v42, %v7633_v25  ;;  %v7682_v25 = vld [vmem:[%s7984_s9] ss:$0 sm:$0xff] }
 0x45f   : > { %v5599_v58 = vpop.eup %5598  ;;  %v3272_v8 = vmul.f32 %v5597_v43, %v7637_v28 }
 0x460   : > { %v5601_v2 = vpop.eup %5600  ;;  %v3275_v45 = vmul.f32 %v5599_v58, %v7642_v33 }
 0x461   : > { %v3273_v5 = vmul.f32 %v5601_v2, %v7647_v6 }
 0x462   : > { %v3291_v27 = vpack.c.bf16 %v3275_v45, %v3274_v3 }
 0x463   : > { %v3290_v55 = vpack.c.bf16 %v3273_v5, %v3272_v8 }
 0x465   : > { %5234 = vmatprep.mubr.msk.bf16.mxu1 %vm2534_vm13, %v3290_v55 }
 0x466   : > { %5235 = vmatmul.mubr.msk.bf16.gmra.mrb[28].mxu1 %vm2534_vm13, %v3291_v27 }
 0x4ff   : > { %v5208_v28 = vpop.f32.mrb[0].mxu1 }
 0x500   : > { %v7685_v33 = vadd.f32 %v5208_v28, %v7682_v25  ;;  %v3397_v6 = vpop.f32.mrb[1].mxu1 }
 0x501   : > { %v7688_v23 = vadd.f32 %v7682_v25, %v3397_v6  ;;  %v5209_v7 = vpop.f32.mrb[2].mxu1 }
 0x502   : > { %v3526_v21 = vsub.f32 0.0, %v7685_v33  ;;  %v7692_v9 = vadd.f32 %v5209_v7, %v7682_v25  ;;  %v3400_v47 = vpop.f32.mrb[3].mxu1 }
 0x503   : > { %v3524_v54 = vsub.f32 0.0, %v7688_v23  ;;  %v7696_v11 = vadd.f32 %v7682_v25, %v3400_v47 }
 0x504   : > { %v3560_v41 = vmul.f32 1.442695, %v3526_v21  ;;  %v3527_v39 = vsub.f32 0.0, %v7692_v9 }
 0x505   : > { %v3556_v14 = vmul.f32 1.442695, %v3524_v54  ;;  %v3525_v48 = vsub.f32 0.0, %v7696_v11 }
 0x506   : > { %5602 = vpow2.f32 %v3560_v41  ;;  %v3562_v49 = vmul.f32 1.442695, %v3527_v39 }
 0x507   : > { %5604 = vpow2.f32 %v3556_v14  ;;  %v3558_v18 = vmul.f32 1.442695, %v3525_v48  ;;  %v5212_v56 = vpop.f32.mrb[4].mxu1 }
 0x508   : > { %5606 = vpow2.f32 %v3562_v49  ;;  %v7701_v63 = vadd.f32 %v5212_v56, %v7682_v25  ;;  %v3413_v57 = vpop.f32.mrb[5].mxu1 }
 0x509   : > { %5608 = vpow2.f32 %v3558_v18  ;;  %v7704_v59 = vadd.f32 %v7682_v25, %v3413_v57  ;;  %v5213_v60 = vpop.f32.mrb[6].mxu1 }
 0x50a   : > { %v3530_v61 = vsub.f32 0.0, %v7701_v63  ;;  %v7708_v30 = vadd.f32 %v5213_v60, %v7682_v25  ;;  %v3416_v0 = vpop.f32.mrb[7].mxu1 }
 0x50b   : > { %v3528_v1 = vsub.f32 0.0, %v7704_v59  ;;  %v7712_v13 = vadd.f32 %v7682_v25, %v3416_v0 }
 0x50c   : > { %v3568_v37 = vmul.f32 1.442695, %v3530_v61  ;;  %v3531_v53 = vsub.f32 0.0, %v7708_v30 }
 0x50d   : > { %v3564_v15 = vmul.f32 1.442695, %v3528_v1  ;;  %v3529_v16 = vsub.f32 0.0, %v7712_v13 }
 0x50e   : > { %5610 = vpow2.f32 %v3568_v37  ;;  %v3570_v17 = vmul.f32 1.442695, %v3531_v53 }
 0x50f   : > { %5612 = vpow2.f32 %v3564_v15  ;;  %v3566_v19 = vmul.f32 1.442695, %v3529_v16  ;;  %v5216_v24 = vpop.f32.mrb[8].mxu1 }
 0x510   : > { %v5603_v12 = vpop.eup %5602  ;;  %5614 = vpow2.f32 %v3570_v17  ;;  %v7717_v62 = vadd.f32 %v5216_v24, %v7682_v25  ;;  %v3429_v26 = vpop.f32.mrb[9].mxu1 }
 0x511   : > { %v5605_v22 = vpop.eup %5604  ;;  %v3622_v29 = vadd.f32 1.0, %v5603_v12  ;;  %5616 = vpow2.f32 %v3566_v19  ;;  %v7720_v32 = vadd.f32 %v7682_v25, %v3429_v26  ;;  %v5217_v34 = vpop.f32.mrb[10].mxu1 }
 0x512   : > { %v5607_v10 = vpop.eup %5606  ;;  %v3620_v35 = vadd.f32 1.0, %v5605_v22  ;;  %v3534_v4 = vsub.f32 0.0, %v7717_v62  ;;  %v7724_v51 = vadd.f32 %v5217_v34, %v7682_v25  ;;  %v3432_v20 = vpop.f32.mrb[11].mxu1 }
 0x513   : > { %v5609_v44 = vpop.eup %5608  ;;  %5618 = vrcp.f32 %v3622_v29  ;;  %v3623_v38 = vadd.f32 1.0, %v5607_v10  ;;  %v3532_v40 = vsub.f32 0.0, %v7720_v32  ;;  %v7728_v46 = vadd.f32 %v7682_v25, %v3432_v20 }
 0x514   : > { %5620 = vrcp.f32 %v3620_v35  ;;  %v3621_v52 = vadd.f32 1.0, %v5609_v44  ;;  %v3576_v36 = vmul.f32 1.442695, %v3534_v4  ;;  %v3535_v50 = vsub.f32 0.0, %v7724_v51 }
 0x515   : > { %5622 = vrcp.f32 %v3623_v38  ;;  %v3572_v42 = vmul.f32 1.442695, %v3532_v40  ;;  %v3533_v43 = vsub.f32 0.0, %v7728_v46 }
 0x516   : > { %5624 = vrcp.f32 %v3621_v52  ;;  %v3578_v58 = vmul.f32 1.442695, %v3535_v50 }
 0x517   : > { %5626 = vpow2.f32 %v3576_v36  ;;  %v3574_v2 = vmul.f32 1.442695, %v3533_v43  ;;  %v5220_v3 = vpop.f32.mrb[12].mxu1 }
 0x518   : > { %v5611_v45 = vpop.eup %5610  ;;  %5628 = vpow2.f32 %v3572_v42  ;;  %v7733_v8 = vadd.f32 %v5220_v3, %v7682_v25  ;;  %v3445_v5 = vpop.f32.mrb[13].mxu1 }
 0x519   : > { %v5613_v27 = vpop.eup %5612  ;;  %v3626_v55 = vadd.f32 1.0, %v5611_v45  ;;  %5630 = vpow2.f32 %v3578_v58  ;;  %v7736_v31 = vadd.f32 %v7682_v25, %v3445_v5  ;;  %v5221_v28 = vpop.f32.mrb[14].mxu1 }
 0x51a   : > { %v5615_v6 = vpop.eup %5614  ;;  %v3624_v7 = vadd.f32 1.0, %v5613_v27  ;;  %5632 = vpow2.f32 %v3574_v2  ;;  %v3538_v21 = vsub.f32 0.0, %v7733_v8  ;;  %v7740_v47 = vadd.f32 %v5221_v28, %v7682_v25  ;;  %v3448_v54 = vpop.f32.mrb[15].mxu1 }
 0x51b   : > { %v5617_v41 = vpop.eup %5616  ;;  %5634 = vrcp.f32 %v3626_v55  ;;  %v3627_v39 = vadd.f32 1.0, %v5615_v6  ;;  %v3536_v14 = vsub.f32 0.0, %v7736_v31  ;;  %v7744_v48 = vadd.f32 %v7682_v25, %v3448_v54 }
 0x51c   : > { %5636 = vrcp.f32 %v3624_v7  ;;  %v3625_v49 = vadd.f32 1.0, %v5617_v41  ;;  %v3584_v18 = vmul.f32 1.442695, %v3538_v21  ;;  %v3539_v56 = vsub.f32 0.0, %v7740_v47 }
 0x51d   : > { %v5619_v57 = vpop.eup %5618  ;;  %5638 = vrcp.f32 %v3627_v39  ;;  %v3580_v60 = vmul.f32 1.442695, %v3536_v14  ;;  %v3537_v61 = vsub.f32 0.0, %v7744_v48 }
 0x51e   : > { %v5621_v0 = vpop.eup %5620  ;;  %5640 = vrcp.f32 %v3625_v49  ;;  %v3586_v1 = vmul.f32 1.442695, %v3539_v56  ;;  %v3686_v16 = vmul.f32 %v5619_v57, %v7685_v33 }
 0x51f   : > { %v5623_v37 = vpop.eup %5622  ;;  %5642 = vpow2.f32 %v3584_v18  ;;  %v3582_v53 = vmul.f32 1.442695, %v3537_v61  ;;  %v3684_v12 = vmul.f32 %v5621_v0, %v7688_v23 }
 0x520   : > { %v5625_v15 = vpop.eup %5624  ;;  %v3687_v17 = vmul.f32 %v5623_v37, %v7692_v9  ;;  %5644 = vpow2.f32 %v3580_v60  ;;  %v5224_v19 = vpop.f32.mrb[16].mxu1 }
 0x521   : > { %v5627_v24 = vpop.eup %5626  ;;  %v3685_v26 = vmul.f32 %v5625_v15, %v7696_v11  ;;  %5646 = vpow2.f32 %v3586_v1  ;;  %v7753_v22 = vadd.f32 %v5224_v19, %v7682_v25  ;;  %v3461_v29 = vpop.f32.mrb[17].mxu1 }
 0x522   : > { %v5629_v34 = vpop.eup %5628  ;;  %v3717_v10 = vpack.c.bf16 %v3687_v17, %v3686_v16  ;;  %v3630_v35 = vadd.f32 1.0, %v5627_v24  ;;  %5648 = vpow2.f32 %v3582_v53  ;;  %v7756_v33 = vadd.f32 %v7682_v25, %v3461_v29  ;;  %v5225_v9 = vpop.f32.mrb[18].mxu1 }
 0x523   : > { %v5631_v4 = vpop.eup %5630  ;;  %v3716_v20 = vpack.c.bf16 %v3685_v26, %v3684_v12  ;;  %v3628_v44 = vadd.f32 1.0, %v5629_v34  ;;  %v3542_v23 = vsub.f32 0.0, %v7753_v22  ;;  %v7760_v11 = vadd.f32 %v5225_v9, %v7682_v25  ;;  %v3464_v38 = vpop.f32.mrb[19].mxu1 }
 0x524   : > { %v5633_v40 = vpop.eup %5632  ;;  %5650 = vrcp.f32 %v3630_v35  ;;  %v3631_v52 = vadd.f32 1.0, %v5631_v4  ;;  %v3540_v36 = vsub.f32 0.0, %v7756_v33  ;;  %v7764_v50 = vadd.f32 %v7682_v25, %v3464_v38 }
 0x525   : > { %v5635_v42 = vpop.eup %5634  ;;  %5652 = vrcp.f32 %v3628_v44  ;;  %v3629_v43 = vadd.f32 1.0, %v5633_v40  ;;  %v3592_v58 = vmul.f32 1.442695, %v3542_v23  ;;  %v3543_v2 = vsub.f32 0.0, %v7760_v11  ;;  %5242 = vmatprep.mubr.msk.bf16.mxu1 %vm2534_vm13, %v3716_v20 }
 0x526   : > { %v5637_v3 = vpop.eup %5636  ;;  %5654 = vrcp.f32 %v3631_v52  ;;  %v3588_v45 = vmul.f32 1.442695, %v3540_v36  ;;  %v3541_v5 = vsub.f32 0.0, %v7764_v50  ;;  %5243 = vmatmul.mubr.msk.bf16.vlgmr.msra.gmra.mrb[32].mxu1 %vm2534_vm13, %v3717_v10  ;;  %v3690_v6 = vmul.f32 %v5635_v42, %v7701_v63 }
 0x527   : > { %v5639_v27 = vpop.eup %5638  ;;  %5656 = vrcp.f32 %v3629_v43  ;;  %v3594_v55 = vmul.f32 1.442695, %v3543_v2  ;;  %v3688_v39 = vmul.f32 %v5637_v3, %v7704_v59 }
 0x528   : > { %v5641_v28 = vpop.eup %5640  ;;  %v3691_v7 = vmul.f32 %v5639_v27, %v7708_v30  ;;  %5658 = vpow2.f32 %v3592_v58  ;;  %v3590_v21 = vmul.f32 1.442695, %v3541_v5  ;;  %v5228_v54 = vpop.f32.mrb[20].mxu1 }
 0x529   : > { %v5643_v41 = vpop.eup %5642  ;;  %v3689_v14 = vmul.f32 %v5641_v28, %v7712_v13  ;;  %5660 = vpow2.f32 %v3588_v45  ;;  %v7775_v49 = vadd.f32 %v5228_v54, %v7682_v25  ;;  %v3477_v18 = vpop.f32.mrb[21].mxu1 }
 0x52a   : > { %v5645_v56 = vpop.eup %5644  ;;  %v3719_v57 = vpack.c.bf16 %v3691_v7, %v3690_v6  ;;  %v3634_v60 = vadd.f32 1.0, %v5643_v41  ;;  %5662 = vpow2.f32 %v3594_v55  ;;  %v7778_v63 = vadd.f32 %v7682_v25, %v3477_v18  ;;  %v5229_v30 = vpop.f32.mrb[22].mxu1 }
 0x52b   : > { %v5647_v61 = vpop.eup %5646  ;;  %v3718_v0 = vpack.c.bf16 %v3689_v14, %v3688_v39  ;;  %v3632_v1 = vadd.f32 1.0, %v5645_v56  ;;  %5664 = vpow2.f32 %v3590_v21  ;;  %v3546_v59 = vsub.f32 0.0, %v7775_v49  ;;  %v3480_v13 = vpop.f32.mrb[23].mxu1 }
 0x52c   : > { %v5649_v37 = vpop.eup %5648  ;;  %5666 = vrcp.f32 %v3634_v60  ;;  %v3635_v53 = vadd.f32 1.0, %v5647_v61  ;;  %v3544_v15 = vsub.f32 0.0, %v7778_v63  ;;  %v7783_v16 = vadd.f32 %v5229_v30, %v7682_v25 }
 0x52d   : > { %5668 = vrcp.f32 %v3632_v1  ;;  %v3633_v17 = vadd.f32 1.0, %v5649_v37  ;;  %v3600_v19 = vmul.f32 1.442695, %v3546_v59  ;;  %v7786_v24 = vadd.f32 %v7682_v25, %v3480_v13  ;;  %5246 = vmatprep.mubr.msk.bf16.mxu1 %vm2534_vm13, %v3718_v0 }
 0x52e   : > { %v5651_v12 = vpop.eup %5650  ;;  %5670 = vrcp.f32 %v3635_v53  ;;  %v3596_v26 = vmul.f32 1.442695, %v3544_v15  ;;  %v3547_v29 = vsub.f32 0.0, %v7783_v16  ;;  %5247 = vmatmul.mubr.msk.bf16.gmra.mrb[36].mxu1 %vm2534_vm13, %v3719_v57 }
 0x52f   : > { %v5653_v34 = vpop.eup %5652  ;;  %5672 = vrcp.f32 %v3633_v17  ;;  %v3545_v10 = vsub.f32 0.0, %v7786_v24  ;;  %v3694_v20 = vmul.f32 %v5651_v12, %v7717_v62 }
 0x530   : > { %v5655_v35 = vpop.eup %5654  ;;  %5674 = vpow2.f32 %v3600_v19  ;;  %v3602_v9 = vmul.f32 1.442695, %v3547_v29  ;;  %v3692_v52 = vmul.f32 %v5653_v34, %v7720_v32 }
 0x531   : > { %v5657_v4 = vpop.eup %5656  ;;  %v3695_v44 = vmul.f32 %v5655_v35, %v7724_v51  ;;  %5676 = vpow2.f32 %v3596_v26  ;;  %v3598_v23 = vmul.f32 1.442695, %v3545_v10  ;;  %v5232_v38 = vpop.f32.mrb[24].mxu1 }
 0x532   : > { %v5659_v40 = vpop.eup %5658  ;;  %v3693_v36 = vmul.f32 %v5657_v4, %v7728_v46  ;;  %5678 = vpow2.f32 %v3602_v9  ;;  %v7797_v42 = vadd.f32 %v5232_v38, %v7682_v25  ;;  %v3493_v43 = vpop.f32.mrb[25].mxu1 }
 0x533   : > { %v5661_v58 = vpop.eup %5660  ;;  %v3721_v2 = vpack.c.bf16 %v3695_v44, %v3694_v20  ;;  %v3638_v3 = vadd.f32 1.0, %v5659_v40  ;;  %5680 = vpow2.f32 %v3598_v23  ;;  %v7800_v62 = vadd.f32 %v7682_v25, %v3493_v43  ;;  %v5233_v51 = vpop.f32.mrb[26].mxu1 }
 0x534   : > { %v5663_v45 = vpop.eup %5662  ;;  %v3720_v5 = vpack.c.bf16 %v3693_v36, %v3692_v52  ;;  %v3636_v27 = vadd.f32 1.0, %v5661_v58  ;;  %v3550_v32 = vsub.f32 0.0, %v7797_v42  ;;  %v7804_v46 = vadd.f32 %v5233_v51, %v7682_v25  ;;  %v3496_v55 = vpop.f32.mrb[27].mxu1 }
 0x535   : > { %v5665_v28 = vpop.eup %5664  ;;  %5682 = vrcp.f32 %v3638_v3  ;;  %v3639_v6 = vadd.f32 1.0, %v5663_v45  ;;  %v3548_v7 = vsub.f32 0.0, %v7800_v62  ;;  %v7808_v21 = vadd.f32 %v7682_v25, %v3496_v55 }
 0x536   : > { %v5667_v54 = vpop.eup %5666  ;;  %5684 = vrcp.f32 %v3636_v27  ;;  %v3637_v41 = vadd.f32 1.0, %v5665_v28  ;;  %v3608_v39 = vmul.f32 1.442695, %v3550_v32  ;;  %v3551_v14 = vsub.f32 0.0, %v7804_v46  ;;  %5250 = vmatprep.mubr.msk.bf16.mxu1 %vm2534_vm13, %v3720_v5 }
 0x537   : > { %v5669_v18 = vpop.eup %5668  ;;  %5686 = vrcp.f32 %v3639_v6  ;;  %v3604_v56 = vmul.f32 1.442695, %v3548_v7  ;;  %v3549_v57 = vsub.f32 0.0, %v7808_v21  ;;  %5251 = vmatmul.mubr.msk.bf16.gmra.mrb[40].mxu1 %vm2534_vm13, %v3721_v2  ;;  %v3698_v0 = vmul.f32 %v5667_v54, %v7733_v8 }
 0x538   : > { %v5671_v60 = vpop.eup %5670  ;;  %5688 = vrcp.f32 %v3637_v41  ;;  %v3610_v30 = vmul.f32 1.442695, %v3551_v14  ;;  %v3696_v53 = vmul.f32 %v5669_v18, %v7736_v31 }
 0x539   : > { %v5673_v61 = vpop.eup %5672  ;;  %v3699_v1 = vmul.f32 %v5671_v60, %v7740_v47  ;;  %5690 = vpow2.f32 %v3608_v39  ;;  %v3606_v59 = vmul.f32 1.442695, %v3549_v57  ;;  %v5236_v13 = vpop.f32.mrb[28].mxu1 }
 0x53a   : > { %v5675_v37 = vpop.eup %5674  ;;  %v3697_v15 = vmul.f32 %v5673_v61, %v7744_v48  ;;  %5692 = vpow2.f32 %v3604_v56  ;;  %v7819_v17 = vadd.f32 %v5236_v13, %v7682_v25  ;;  %v3509_v19 = vpop.f32.mrb[29].mxu1 }
 0x53b   : > { %v5677_v12 = vpop.eup %5676  ;;  %v3723_v26 = vpack.c.bf16 %v3699_v1, %v3698_v0  ;;  %v3642_v29 = vadd.f32 1.0, %v5675_v37  ;;  %5694 = vpow2.f32 %v3610_v30  ;;  %v7822_v8 = vadd.f32 %v7682_v25, %v3509_v19  ;;  %v5237_v47 = vpop.f32.mrb[30].mxu1 }
 0x53c   : > { %v5679_v34 = vpop.eup %5678  ;;  %v3722_v10 = vpack.c.bf16 %v3697_v15, %v3696_v53  ;;  %v3640_v35 = vadd.f32 1.0, %v5677_v12  ;;  %5696 = vpow2.f32 %v3606_v59  ;;  %v3554_v31 = vsub.f32 0.0, %v7819_v17  ;;  %v3512_v48 = vpop.f32.mrb[31].mxu1 }
 0x53d   : > { %v5681_v9 = vpop.eup %5680  ;;  %5698 = vrcp.f32 %v3642_v29  ;;  %v3643_v4 = vadd.f32 1.0, %v5679_v34  ;;  %v3552_v20 = vsub.f32 0.0, %v7822_v8  ;;  %v7827_v44 = vadd.f32 %v5237_v47, %v7682_v25 }
 0x53e   : > { %5700 = vrcp.f32 %v3640_v35  ;;  %v3641_v23 = vadd.f32 1.0, %v5681_v9  ;;  %v3616_v38 = vmul.f32 1.442695, %v3554_v31  ;;  %v7830_v40 = vadd.f32 %v7682_v25, %v3512_v48  ;;  %5254 = vmatprep.mubr.msk.bf16.mxu1 %vm2534_vm13, %v3722_v10 }
 0x53f   : > { %v5683_v52 = vpop.eup %5682  ;;  %5702 = vrcp.f32 %v3643_v4  ;;  %v3612_v36 = vmul.f32 1.442695, %v3552_v20  ;;  %v3555_v43 = vsub.f32 0.0, %v7827_v44  ;;  %5255 = vmatmul.mubr.msk.bf16.gmra.mrb[44].mxu1 %vm2534_vm13, %v3723_v26 }
 0x540   : > { %v5685_v58 = vpop.eup %5684  ;;  %5704 = vrcp.f32 %v3641_v23  ;;  %v3553_v2 = vsub.f32 0.0, %v7830_v40  ;;  %v3702_v25 = vmul.f32 %v5683_v52, %v7753_v22 }
 0x541   : > { %v5687_v3 = vpop.eup %5686  ;;  %5706 = vpow2.f32 %v3616_v38  ;;  %v3618_v51 = vmul.f32 1.442695, %v3555_v43  ;;  %v3700_v55 = vmul.f32 %v5685_v58, %v7756_v33 }
 0x542   : > { %v5689_v45 = vpop.eup %5688  ;;  %v3703_v5 = vmul.f32 %v5687_v3, %v7760_v11  ;;  %5708 = vpow2.f32 %v3612_v36  ;;  %v3614_v27 = vmul.f32 1.442695, %v3553_v2  ;;  %v7863_v36 = vld [vmem:[%s7986_s11] ss:$0 sm:$0xff] }
 0x543   : > { %v5691_v32 = vpop.eup %5690  ;;  %v3701_v28 = vmul.f32 %v5689_v45, %v7764_v50  ;;  %5710 = vpow2.f32 %v3618_v51 }
 0x544   : > { %v5693_v6 = vpop.eup %5692  ;;  %v3725_v7 = vpack.c.bf16 %v3703_v5, %v3702_v25  ;;  %v3646_v54 = vadd.f32 1.0, %v5691_v32  ;;  %5712 = vpow2.f32 %v3614_v27 }
 0x545   : > { %v5695_v41 = vpop.eup %5694  ;;  %v3724_v39 = vpack.c.bf16 %v3701_v28, %v3700_v55  ;;  %v3644_v14 = vadd.f32 1.0, %v5693_v6 }
 0x546   : > { %v5697_v18 = vpop.eup %5696  ;;  %5714 = vrcp.f32 %v3646_v54  ;;  %v3647_v22 = vadd.f32 1.0, %v5695_v41 }
 0x547   : > { %v5699_v56 = vpop.eup %5698  ;;  %5716 = vrcp.f32 %v3644_v14  ;;  %v3645_v11 = vadd.f32 1.0, %v5697_v18  ;;  %5258 = vmatprep.mubr.msk.bf16.mxu1 %vm2534_vm13, %v3724_v39 }
 0x548   : > { %v5701_v57 = vpop.eup %5700  ;;  %5718 = vrcp.f32 %v3647_v22  ;;  %5259 = vmatmul.mubr.msk.bf16.gmra.mrb[48].mxu1 %vm2534_vm13, %v3725_v7  ;;  %v3706_v60 = vmul.f32 %v5699_v56, %v7775_v49 }
 0x549   : > { %v5703_v33 = vpop.eup %5702  ;;  %5720 = vrcp.f32 %v3645_v11  ;;  %v3704_v0 = vmul.f32 %v5701_v57, %v7778_v63 }
 0x54a   : > { %v5705_v50 = vpop.eup %5704  ;;  %v3707_v30 = vmul.f32 %v5703_v33, %v7783_v16 }
 0x54b   : > { %v5707_v61 = vpop.eup %5706  ;;  %v3705_v1 = vmul.f32 %v5705_v50, %v7786_v24 }
 0x54c   : > { %v5709_v59 = vpop.eup %5708  ;;  %v3727_v13 = vpack.c.bf16 %v3707_v30, %v3706_v60  ;;  %v3650_v37 = vadd.f32 1.0, %v5707_v61 }
 0x54d   : > { %v5711_v53 = vpop.eup %5710  ;;  %v3726_v15 = vpack.c.bf16 %v3705_v1, %v3704_v0  ;;  %v3648_v19 = vadd.f32 1.0, %v5709_v59 }
 0x54e   : > { %v5713_v12 = vpop.eup %5712  ;;  %5722 = vrcp.f32 %v3650_v37  ;;  %v3651_v26 = vadd.f32 1.0, %v5711_v53 }
 0x54f   : > { %5724 = vrcp.f32 %v3648_v19  ;;  %v3649_v29 = vadd.f32 1.0, %v5713_v12  ;;  %5262 = vmatprep.mubr.msk.bf16.mxu1 %vm2534_vm13, %v3726_v15 }
 0x550   : > { %v5715_v49 = vpop.eup %5714  ;;  %5726 = vrcp.f32 %v3651_v26  ;;  %5263 = vmatmul.mubr.msk.bf16.gmra.mrb[52].mxu1 %vm2534_vm13, %v3727_v13 }
 0x551   : > { %v5717_v63 = vpop.eup %5716  ;;  %5728 = vrcp.f32 %v3649_v29  ;;  %v3710_v47 = vmul.f32 %v5715_v49, %v7797_v42 }
 0x552   : > { %v5719_v16 = vpop.eup %5718  ;;  %v3708_v10 = vmul.f32 %v5717_v63, %v7800_v62 }
 0x553   : > { %v5721_v24 = vpop.eup %5720  ;;  %v3711_v34 = vmul.f32 %v5719_v16, %v7804_v46 }
 0x554   : > { %v3709_v35 = vmul.f32 %v5721_v24, %v7808_v21 }
 0x555   : > { %v3729_v31 = vpack.c.bf16 %v3711_v34, %v3710_v47 }
 0x556   : > { %v3728_v48 = vpack.c.bf16 %v3709_v35, %v3708_v10 }
 0x558   : > { %v5723_v9 = vpop.eup %5722  ;;  %5266 = vmatprep.mubr.msk.bf16.mxu1 %vm2534_vm13, %v3728_v48 }
 0x559   : > { %v5725_v4 = vpop.eup %5724  ;;  %5267 = vmatmul.mubr.msk.bf16.gmra.mrb[56].mxu1 %vm2534_vm13, %v3729_v31  ;;  %v3714_v38 = vmul.f32 %v5723_v9, %v7819_v17 }
 0x55a   : > { %v5727_v20 = vpop.eup %5726  ;;  %v3712_v62 = vmul.f32 %v5725_v4, %v7822_v8 }
 0x55b   : > { %v5729_v23 = vpop.eup %5728  ;;  %v3715_v42 = vmul.f32 %v5727_v20, %v7827_v44 }
 0x55c   : > { %v3713_v46 = vmul.f32 %v5729_v23, %v7830_v40 }
 0x55d   : > { %v3731_v21 = vpack.c.bf16 %v3715_v42, %v3714_v38 }
 0x55e   : > { %v3730_v52 = vpack.c.bf16 %v3713_v46, %v3712_v62 }
 0x560   : > { %5270 = vmatprep.mubr.msk.bf16.mxu1 %vm2534_vm13, %v3730_v52 }
 0x561   : > { %5271 = vmatmul.mubr.msk.bf16.gmra.mrb[60].mxu1 %vm2534_vm13, %v3731_v21 }
 0x5f9   : > { %v5244_v17 = vpop.f32.mrb[32].mxu1 }
 0x5fa   : > { %v3846_v44 = vadd.f32 %v5244_v17, %v7863_v36  ;;  %v3837_v8 = vpop.f32.mrb[33].mxu1 }
 0x5fb   : > { %v3838_v40 = vadd.f32 %v7863_v36, %v3837_v8  ;;  %v5245_v43 = vpop.f32.mrb[34].mxu1 }
 0x5fc   : > { %3966 = vst.msk [vmem:[%s5918_s0 + $0x10] sm:$0xff] %vm2534_vm13, %v3846_v44  ;;  %v3849_v58 = vadd.f32 %v5245_v43, %v7863_v36  ;;  %v3840_v2 = vpop.f32.mrb[35].mxu1 }
 0x5fd   : > { %3964 = vst.msk [vmem:[%s5918_s0] sm:$0xff] %vm2534_vm13, %v3838_v40  ;;  %v3841_v3 = vadd.f32 %v7863_v36, %v3840_v2 }
 0x5fe   : > { %3967 = vst.msk [vmem:[%s5918_s0 + $0x18] sm:$0xff] %vm2534_vm13, %v3849_v58 }
 0x5ff   : > { %3965 = vst.msk [vmem:[%s5918_s0 + $0x8] sm:$0xff] %vm2534_vm13, %v3841_v3 }
 0x601   : > { %v5248_v51 = vpop.f32.mrb[36].mxu1 }
 0x602   : > { %v3862_v45 = vadd.f32 %v5248_v51, %v7863_v36  ;;  %v3853_v25 = vpop.f32.mrb[37].mxu1 }
 0x603   : > { %v3854_v5 = vadd.f32 %v7863_v36, %v3853_v25  ;;  %v5249_v27 = vpop.f32.mrb[38].mxu1 }
 0x604   : > { %3970 = vst.msk [vmem:[%s5918_s0 + $0x30] sm:$0xff] %vm2534_vm13, %v3862_v45  ;;  %v3865_v32 = vadd.f32 %v5249_v27, %v7863_v36  ;;  %v3856_v55 = vpop.f32.mrb[39].mxu1 }
 0x605   : > { %3968 = vst.msk [vmem:[%s5918_s0 + $0x20] sm:$0xff] %vm2534_vm13, %v3854_v5  ;;  %v3857_v28 = vadd.f32 %v7863_v36, %v3856_v55 }
 0x606   : > { %3971 = vst.msk [vmem:[%s5918_s0 + $0x38] sm:$0xff] %vm2534_vm13, %v3865_v32 }
 0x607   : > { %3969 = vst.msk [vmem:[%s5918_s0 + $0x28] sm:$0xff] %vm2534_vm13, %v3857_v28 }
 0x60a   : > { %v5252_v6 = vpop.f32.mrb[40].mxu1 }
 0x60b   : > { %v3878_v7 = vadd.f32 %v5252_v6, %v7863_v36  ;;  %v3869_v54 = vpop.f32.mrb[41].mxu1 }
 0x60c   : > { %v3870_v41 = vadd.f32 %v7863_v36, %v3869_v54  ;;  %v5253_v39 = vpop.f32.mrb[42].mxu1 }
 0x60d   : > { %3974 = vst.msk [vmem:[%s5918_s0 + $0x50] sm:$0xff] %vm2534_vm13, %v3878_v7  ;;  %v3881_v14 = vadd.f32 %v5253_v39, %v7863_v36  ;;  %v3872_v18 = vpop.f32.mrb[43].mxu1 }
 0x60e   : > { %3972 = vst.msk [vmem:[%s5918_s0 + $0x40] sm:$0xff] %vm2534_vm13, %v3870_v41  ;;  %v3873_v22 = vadd.f32 %v7863_v36, %v3872_v18 }
 0x60f   : > { %3975 = vst.msk [vmem:[%s5918_s0 + $0x58] sm:$0xff] %vm2534_vm13, %v3881_v14 }
 0x610   : > { %3973 = vst.msk [vmem:[%s5918_s0 + $0x48] sm:$0xff] %vm2534_vm13, %v3873_v22 }
 0x612   : > { %v5256_v56 = vpop.f32.mrb[44].mxu1 }
 0x613   : > { %v3894_v11 = vadd.f32 %v5256_v56, %v7863_v36  ;;  %v3885_v57 = vpop.f32.mrb[45].mxu1 }
 0x614   : > { %v3886_v33 = vadd.f32 %v7863_v36, %v3885_v57  ;;  %v5257_v50 = vpop.f32.mrb[46].mxu1 }
 0x615   : > { %3978 = vst.msk [vmem:[%s5918_s0 + $0x70] sm:$0xff] %vm2534_vm13, %v3894_v11  ;;  %v3897_v60 = vadd.f32 %v5257_v50, %v7863_v36  ;;  %v3888_v30 = vpop.f32.mrb[47].mxu1 }
 0x616   : > { %3976 = vst.msk [vmem:[%s5918_s0 + $0x60] sm:$0xff] %vm2534_vm13, %v3886_v33  ;;  %v3889_v61 = vadd.f32 %v7863_v36, %v3888_v30 }
 0x617   : > { %3979 = vst.msk [vmem:[%s5918_s0 + $0x78] sm:$0xff] %vm2534_vm13, %v3897_v60 }
 0x618   : > { %3977 = vst.msk [vmem:[%s5918_s0 + $0x68] sm:$0xff] %vm2534_vm13, %v3889_v61 }
 0x61b   : > { %v5260_v0 = vpop.f32.mrb[48].mxu1 }
 0x61c   : > { %v3910_v1 = vadd.f32 %v5260_v0, %v7863_v36  ;;  %v3901_v59 = vpop.f32.mrb[49].mxu1 }
 0x61d   : > { %v3902_v13 = vadd.f32 %v7863_v36, %v3901_v59  ;;  %v5261_v37 = vpop.f32.mrb[50].mxu1 }
 0x61e   : > { %3982 = vst.msk [vmem:[%s5918_s0 + $0x90] sm:$0xff] %vm2534_vm13, %v3910_v1  ;;  %v3913_v53 = vadd.f32 %v5261_v37, %v7863_v36  ;;  %v3904_v15 = vpop.f32.mrb[51].mxu1 }
 0x61f   : > { %3980 = vst.msk [vmem:[%s5918_s0 + $0x80] sm:$0xff] %vm2534_vm13, %v3902_v13  ;;  %v3905_v19 = vadd.f32 %v7863_v36, %v3904_v15 }
 0x620   : > { %3983 = vst.msk [vmem:[%s5918_s0 + $0x98] sm:$0xff] %vm2534_vm13, %v3913_v53 }
 0x621   : > { %3981 = vst.msk [vmem:[%s5918_s0 + $0x88] sm:$0xff] %vm2534_vm13, %v3905_v19 }
 0x623   : > { %v5264_v12 = vpop.f32.mrb[52].mxu1 }
 0x624   : > { %v3926_v26 = vadd.f32 %v5264_v12, %v7863_v36  ;;  %v3917_v29 = vpop.f32.mrb[53].mxu1 }
 0x625   : > { %v3918_v49 = vadd.f32 %v7863_v36, %v3917_v29  ;;  %v5265_v63 = vpop.f32.mrb[54].mxu1 }
 0x626   : > { %3986 = vst.msk [vmem:[%s5918_s0 + $0xb0] sm:$0xff] %vm2534_vm13, %v3926_v26  ;;  %v3929_v16 = vadd.f32 %v5265_v63, %v7863_v36  ;;  %v3920_v24 = vpop.f32.mrb[55].mxu1 }
 0x627   : > { %3984 = vst.msk [vmem:[%s5918_s0 + $0xa0] sm:$0xff] %vm2534_vm13, %v3918_v49  ;;  %v3921_v47 = vadd.f32 %v7863_v36, %v3920_v24 }
 0x628   : > { %3987 = vst.msk [vmem:[%s5918_s0 + $0xb8] sm:$0xff] %vm2534_vm13, %v3929_v16 }
 0x629   : > { %3985 = vst.msk [vmem:[%s5918_s0 + $0xa8] sm:$0xff] %vm2534_vm13, %v3921_v47 }
 0x62c   : > { %v5268_v34 = vpop.f32.mrb[56].mxu1 }
 0x62d   : > { %v3942_v10 = vadd.f32 %v5268_v34, %v7863_v36  ;;  %v3933_v35 = vpop.f32.mrb[57].mxu1 }
 0x62e   : > { %v3934_v31 = vadd.f32 %v7863_v36, %v3933_v35  ;;  %v5269_v48 = vpop.f32.mrb[58].mxu1 }
 0x62f   : > { %3990 = vst.msk [vmem:[%s5918_s0 + $0xd0] sm:$0xff] %vm2534_vm13, %v3942_v10  ;;  %v3945_v9 = vadd.f32 %v5269_v48, %v7863_v36  ;;  %v3936_v4 = vpop.f32.mrb[59].mxu1 }
 0x630   : > { %3988 = vst.msk [vmem:[%s5918_s0 + $0xc0] sm:$0xff] %vm2534_vm13, %v3934_v31  ;;  %v3937_v20 = vadd.f32 %v7863_v36, %v3936_v4 }
 0x631   : > { %3991 = vst.msk [vmem:[%s5918_s0 + $0xd8] sm:$0xff] %vm2534_vm13, %v3945_v9 }
 0x632   : > { %3989 = vst.msk [vmem:[%s5918_s0 + $0xc8] sm:$0xff] %vm2534_vm13, %v3937_v20 }
 0x634   : > { %v5272_v23 = vpop.f32.mrb[60].mxu1 }
 0x635   : > { %v3958_v38 = vadd.f32 %v5272_v23, %v7863_v36  ;;  %v3949_v42 = vpop.f32.mrb[61].mxu1 }
 0x636   : > { %v3950_v62 = vadd.f32 %v7863_v36, %v3949_v42  ;;  %v5273_v46 = vpop.f32.mrb[62].mxu1 }
 0x637   : > { %3994 = vst.msk [vmem:[%s5918_s0 + $0xf0] sm:$0xff] %vm2534_vm13, %v3958_v38  ;;  %v3961_v21 = vadd.f32 %v5273_v46, %v7863_v36  ;;  %v3952_v52 = vpop.f32.mrb[63].mxu1 }
 0x638   : > { %3992 = vst.msk [vmem:[%s5918_s0 + $0xe0] sm:$0xff] %vm2534_vm13, %v3950_v62  ;;  %v3953_v17 = vadd.f32 %v7863_v36, %v3952_v52 }
 0x639   : > { %3995 = vst.msk [vmem:[%s5918_s0 + $0xf8] sm:$0xff] %vm2534_vm13, %v3961_v21 }
 0x63a   : > { %3993 = vst.msk [vmem:[%s5918_s0 + $0xe8] sm:$0xff] %vm2534_vm13, %v3953_v17 }
 0x63b PF: > { %s32_s15 = sadd.s32 1, %s5794_s15   ;;  %s8370_s29 = sld [smem:[#allocation8_spill]] }
 0x63c   : > { %p29_p7 = scmp.ge.s32.totalorder %s32_s15, 8   ;;  %s8371_s19 = sld [smem:[#allocation9_spill]] }
 0x63d   : > { %s8372_s1 = smov %s5786_s13  ;;  %s8373_s30 = smov %s5790_s14 }
 0x63e   :  { %31 = sbr.rel (!%p29_p7) target bundleno = 29 (0x1d), region = 108 }
 0x641   : > { %s8374_s13 = smov %s8370_s29 }
 0x642   : > { %s8375_s14 = smov %s8371_s19 }

</bundles_post_ra>
